<compile_context>
chip_gen: v7x
topology: tpu7x:2x2x1
jax: 0.10.0
libtpu: 0.0.40
codegen_flags: <defaults>
</compile_context>

<pallas_src>
import functools

import jax
import jax.numpy as jnp
from jax import lax
from jax.experimental import pallas as pl
from jax.experimental.pallas import tpu as pltpu


# ---------------------------------------------------------------------------
# Fused Pallas kernel: conv1 -> ReLU -> pad -> conv2 -> ReLU -> BN affine
# ---------------------------------------------------------------------------
def _im2col_conv(x_hwc, w_flat, *, Ho, Wo, KH, KW, cin_g, cout_g, groups):
    """Grouped stride-1 'valid' conv as one im2col matmul per group.

    x_hwc:  (Hp, Wp, Cin) value (already zero-padded).
    w_flat: (KH*KW*cin_g, cout_g*groups) value, rows ordered (kh, kw, ci).
    Returns (Ho*Wo, cout_g*groups) float32.
    """
    outs = []
    for g in range(groups):
        cols = []
        for kh in range(KH):
            for kw in range(KW):
                win = x_hwc[kh:kh + Ho, kw:kw + Wo,
                            g * cin_g:(g + 1) * cin_g]          # (Ho, Wo, cin_g)
                cols.append(win.reshape(Ho * Wo, cin_g))
        patches = cols[0] if len(cols) == 1 else jnp.concatenate(cols, axis=-1)
        outs.append(jnp.dot(patches, w_flat[:, g * cout_g:(g + 1) * cout_g],
                            preferred_element_type=jnp.float32))
    return outs[0] if groups == 1 else jnp.concatenate(outs, axis=-1)


def _fused_forward_kernel(x_ref, w1_ref, b1_ref, w2_ref, b2_ref,
                          scale_ref, shift_ref, o_ref, *,
                          Ho, Wo, K1, C1, C2, cin_g, groups):
    """One batch element of the whole mini_model forward.

    x_ref:  (1, Hp1, Wp1, Cin) padded NHWC input tile.
    w1_ref: (K1*K1*cin_g, C1); w2_ref: (9*C1/groups, C2).
    b1/b2/scale/shift: (1, C) row vectors (scale/shift already BN-folded and
    expanded to conv2 output channels).
    o_ref:  (1, C2, Ho*Wo) lane-dense channel-major output slab.
    """
    x = x_ref[0]                                                # (Hp1, Wp1, Cin)

    # ---- conv1 + bias + ReLU: single im2col contraction per group ----
    h1 = _im2col_conv(x, w1_ref[...], Ho=Ho, Wo=Wo, KH=K1, KW=K1,
                      cin_g=cin_g, cout_g=C1 // groups, groups=groups)
    h1 = jnp.maximum(h1 + b1_ref[...], 0.0).reshape(Ho, Wo, C1)

    # ---- zero-pad (pad=1) for conv2, staying entirely in vregs/VMEM ----
    zrow = jnp.zeros((1, Wo, C1), h1.dtype)
    zcol = jnp.zeros((Ho + 2, 1, C1), h1.dtype)
    h1p = jnp.concatenate([zrow, h1, zrow], axis=0)             # (Ho+2, Wo, C1)
    h1p = jnp.concatenate([zcol, h1p, zcol], axis=1)            # (Ho+2, Wo+2, C1)

    # ---- conv2 + bias + ReLU, with the eval-mode BN affine folded in ----
    # (the post-pixel-shuffle ReLU is the identity on this non-negative y)
    y = _im2col_conv(h1p, w2_ref[...], Ho=Ho, Wo=Wo, KH=3, KW=3,
                     cin_g=C1 // groups, cout_g=C2 // groups, groups=groups)
    y = jnp.maximum(y + b2_ref[...], 0.0)
    y = y * scale_ref[...] + shift_ref[...]                     # (Ho*Wo, C2)

    # ---- lane-dense channel-major store: (C2, Ho*Wo) puts 256 in lanes ----
    o_ref[...] = jnp.transpose(y).reshape(1, C2, Ho * Wo).astype(o_ref.dtype)


# ---------------------------------------------------------------------------
# Wrapper: layout glue (NCHW<->NHWC, padding, pixel shuffle) + pallas_call
# ---------------------------------------------------------------------------
def mini_model_forward(x_nchw, p, *, scale_factor, padding, groups, eps=1e-5):
    N, Cin, H, W = x_nchw.shape
    C1, Cin_g, K1, _ = p["w1"].shape
    C2, C1_g, _, _ = p["w2"].shape
    Ho = H + 2 * padding - K1 + 1
    Wo = W + 2 * padding - K1 + 1          # conv2 (k=3, pad=1) keeps (Ho, Wo)
    r = scale_factor

    # NCHW -> NHWC and spatial zero-padding for conv1 (pure layout glue).
    x = jnp.transpose(x_nchw, (0, 2, 3, 1))
    xp = jnp.pad(x, ((0, 0), (padding, padding), (padding, padding), (0, 0)))
    Hp, Wp = xp.shape[1], xp.shape[2]

    # Weights: OIHW -> (KH*KW*Cin_g, Cout), rows ordered (kh, kw, ci) to match
    # the in-kernel im2col column order.
    w1_flat = jnp.transpose(p["w1"], (2, 3, 1, 0)).reshape(K1 * K1 * Cin_g, C1)
    w2_flat = jnp.transpose(p["w2"], (2, 3, 1, 0)).reshape(9 * C1_g, C2)
    b1 = p["b1"].reshape(1, C1)
    b2 = p["b2"].reshape(1, C2)

    # Eval-mode BN affine, folded and expanded to conv2 output channels
    # (conv2 channel oc maps to BN channel oc // r^2 under PixelShuffle).
    scale = p["bn_gamma"] / jnp.sqrt(p["bn_var"] + eps)
    shift = p["bn_beta"] - p["bn_mean"] * scale
    scale_exp = jnp.repeat(scale, r * r).reshape(1, C2)
    shift_exp = jnp.repeat(shift, r * r).reshape(1, C2)

    kern = functools.partial(_fused_forward_kernel, Ho=Ho, Wo=Wo, K1=K1,
                             C1=C1, C2=C2, cin_g=Cin_g, groups=groups)

    y = pl.pallas_call(
        kern,
        out_shape=jax.ShapeDtypeStruct((N, C2, Ho * Wo), x_nchw.dtype),
        grid=(N,),
        in_specs=[
            pl.BlockSpec((1, Hp, Wp, Cin), lambda n: (n, 0, 0, 0)),
            pl.BlockSpec(w1_flat.shape, lambda n: (0, 0)),
            pl.BlockSpec(b1.shape, lambda n: (0, 0)),
            pl.BlockSpec(w2_flat.shape, lambda n: (0, 0)),
            pl.BlockSpec(b2.shape, lambda n: (0, 0)),
            pl.BlockSpec(scale_exp.shape, lambda n: (0, 0)),
            pl.BlockSpec(shift_exp.shape, lambda n: (0, 0)),
        ],
        out_specs=pl.BlockSpec((1, C2, Ho * Wo), lambda n: (n, 0, 0)),
        compiler_params=pltpu.CompilerParams(
            dimension_semantics=("parallel",)),
    )(xp, w1_flat, b1, w2_flat, b2, scale_exp, shift_exp)

    # Kernel output is channel-major (N, C2, Ho*Wo): reshape to NCHW and apply
    # the PyTorch PixelShuffle permutation (pure layout glue, BN already done).
    # TODO(synk): Dropout(0.3) and train-mode BatchNorm batch statistics are
    # stochastic / batch-dependent; eval-mode semantics are implemented.
    y = y.reshape(N, C2, Ho, Wo)
    C_out = C2 // (r * r)
    y = y.reshape(N, C_out, r, r, Ho, Wo)
    y = jnp.transpose(y, (0, 1, 4, 2, 5, 3))
    return y.reshape(N, C_out, Ho * r, Wo * r)


# ---------------------------------------------------------------------------
# Parameters + pure-JAX reference (for correctness check)
# ---------------------------------------------------------------------------
def init_params(key, n_channel, scale_factor, in_channel, kernel_size, groups):
    ks = jax.random.split(key, 8)
    c2_out = scale_factor ** 2 * n_channel
    return {
        "w1": 0.1 * jax.random.normal(
            ks[0], (n_channel, in_channel // groups, kernel_size, kernel_size),
            jnp.float32),
        "b1": 0.1 * jax.random.normal(ks[1], (n_channel,), jnp.float32),
        "w2": 0.1 * jax.random.normal(
            ks[2], (c2_out, n_channel // groups, 3, 3), jnp.float32),
        "b2": 0.1 * jax.random.normal(ks[3], (c2_out,), jnp.float32),
        "bn_gamma": 1.0 + 0.1 * jax.random.normal(ks[4], (n_channel,), jnp.float32),
        "bn_beta": 0.1 * jax.random.normal(ks[5], (n_channel,), jnp.float32),
        "bn_mean": 0.1 * jax.random.normal(ks[6], (n_channel,), jnp.float32),
        "bn_var": jnp.abs(1.0 + 0.1 * jax.random.normal(ks[7], (n_channel,),
                                                        jnp.float32)),
    }


def reference_forward(x_nchw, p, *, scale_factor, padding, groups, eps=1e-5):
    dn1 = lax.conv_dimension_numbers(x_nchw.shape, p["w1"].shape,
                                     ("NCHW", "OIHW", "NCHW"))
    y = lax.conv_general_dilated(x_nchw, p["w1"], (1, 1),
                                 [(padding, padding)] * 2,
                                 dimension_numbers=dn1,
                                 feature_group_count=groups)
    y = jnp.maximum(y + p["b1"][None, :, None, None], 0.0)
    dn2 = lax.conv_dimension_numbers(y.shape, p["w2"].shape,
                                     ("NCHW", "OIHW", "NCHW"))
    y = lax.conv_general_dilated(y, p["w2"], (1, 1), [(1, 1)] * 2,
                                 dimension_numbers=dn2,
                                 feature_group_count=groups)
    y = jnp.maximum(y + p["b2"][None, :, None, None], 0.0)
    N, Cr2, H, W = y.shape
    r = scale_factor
    C = Cr2 // (r * r)
    y = y.reshape(N, C, r, r, H, W).transpose(0, 1, 4, 2, 5, 3)
    y = y.reshape(N, C, H * r, W * r)
    y = jnp.maximum(y, 0.0)
    scale = p["bn_gamma"] / jnp.sqrt(p["bn_var"] + eps)
    shift = p["bn_beta"] - p["bn_mean"] * scale
    return y * scale[None, :, None, None] + shift[None, :, None, None]


# ---------------------------------------------------------------------------
if __name__ == "__main__":
    # mini_model(n_channel=8, scale_factor=2, in_channel=4, kernel_size=3,
    #            padding=1, groups=1)
    n_channel, scale_factor, in_channel = 8, 2, 4
    kernel_size, padding, groups = 3, 1, 1
    N, H, W = 2, 16, 16

    key = jax.random.PRNGKey(0)
    kx, kp = jax.random.split(key)
    x = jax.random.normal(kx, (N, in_channel, H, W), jnp.float32)
    params = init_params(kp, n_channel, scale_factor, in_channel,
                         kernel_size, groups)

    fwd = jax.jit(functools.partial(mini_model_forward,
                                    scale_factor=scale_factor,
                                    padding=padding, groups=groups))
    out = jax.block_until_ready(fwd(x, params))

    ref = reference_forward(x, params, scale_factor=scale_factor,
                            padding=padding, groups=groups)

    assert out.shape == (N, n_channel, H * scale_factor, W * scale_factor), out.shape
    max_err = float(jnp.max(jnp.abs(out - ref)))
    assert jnp.allclose(out, ref, rtol=1e-2, atol=1e-2), f"max_err={max_err}"

    print("KERNEL_OK")
</pallas_src>

<mosaic_0001>
module attributes {stable_mosaic.version = 11 : i64} {
  func.func @_fused_forward_kernel(%arg0: i32, %arg1: memref<1x18x18x4xf32, #tpu.memory_space<vmem>>, %arg2: memref<36x8xf32, #tpu.memory_space<vmem>>, %arg3: memref<1x8xf32, #tpu.memory_space<vmem>>, %arg4: memref<72x32xf32, #tpu.memory_space<vmem>>, %arg5: memref<1x32xf32, #tpu.memory_space<vmem>>, %arg6: memref<1x32xf32, #tpu.memory_space<vmem>>, %arg7: memref<1x32xf32, #tpu.memory_space<vmem>>, %arg8: memref<1x32x256xf32, #tpu.memory_space<vmem>>) attributes {dimension_semantics = [#tpu.dimension_semantics<parallel>], iteration_bounds = array<i64: 2>, scalar_prefetch = 0 : i64, scratch_operands = 0 : i64, tpu.core_type = #tpu.core_type<tc>, window_params = [{transform_indices = @transform_0, window_bounds = array<i64: 1, 18, 18, 4>}, {pipeline_mode = #tpu.pipeline_mode<synchronous>, transform_indices = @transform_1, window_bounds = array<i64: 36, 8>}, {pipeline_mode = #tpu.pipeline_mode<synchronous>, transform_indices = @transform_2, window_bounds = array<i64: 1, 8>}, {pipeline_mode = #tpu.pipeline_mode<synchronous>, transform_indices = @transform_3, window_bounds = array<i64: 72, 32>}, {pipeline_mode = #tpu.pipeline_mode<synchronous>, transform_indices = @transform_4, window_bounds = array<i64: 1, 32>}, {pipeline_mode = #tpu.pipeline_mode<synchronous>, transform_indices = @transform_5, window_bounds = array<i64: 1, 32>}, {pipeline_mode = #tpu.pipeline_mode<synchronous>, transform_indices = @transform_6, window_bounds = array<i64: 1, 32>}, {transform_indices = @transform_7, window_bounds = array<i64: 1, 32, 256>}]} {
    %c0 = arith.constant 0 : index
    %c0_0 = arith.constant 0 : index
    %c0_1 = arith.constant 0 : index
    %c0_2 = arith.constant 0 : index
    %0 = vector.load %arg1[%c0, %c0_0, %c0_1, %c0_2] : memref<1x18x18x4xf32, #tpu.memory_space<vmem>>, vector<1x18x18x4xf32>
    %1 = vector.shape_cast %0 : vector<1x18x18x4xf32> to vector<18x18x4xf32>
    %c0_3 = arith.constant 0 : index
    %c0_4 = arith.constant 0 : index
    %2 = vector.load %arg2[%c0_3, %c0_4] : memref<36x8xf32, #tpu.memory_space<vmem>>, vector<36x8xf32>
    %3 = vector.extract_strided_slice %1 {offsets = [0, 0, 0], sizes = [16, 16, 4], strides = [1, 1, 1]} : vector<18x18x4xf32> to vector<16x16x4xf32>
    %4 = vector.shape_cast %3 : vector<16x16x4xf32> to vector<256x4xf32>
    %5 = vector.extract_strided_slice %1 {offsets = [0, 1, 0], sizes = [16, 16, 4], strides = [1, 1, 1]} : vector<18x18x4xf32> to vector<16x16x4xf32>
    %6 = vector.shape_cast %5 : vector<16x16x4xf32> to vector<256x4xf32>
    %7 = vector.extract_strided_slice %1 {offsets = [0, 2, 0], sizes = [16, 16, 4], strides = [1, 1, 1]} : vector<18x18x4xf32> to vector<16x16x4xf32>
    %8 = vector.shape_cast %7 : vector<16x16x4xf32> to vector<256x4xf32>
    %9 = vector.extract_strided_slice %1 {offsets = [1, 0, 0], sizes = [16, 16, 4], strides = [1, 1, 1]} : vector<18x18x4xf32> to vector<16x16x4xf32>
    %10 = vector.shape_cast %9 : vector<16x16x4xf32> to vector<256x4xf32>
    %11 = vector.extract_strided_slice %1 {offsets = [1, 1, 0], sizes = [16, 16, 4], strides = [1, 1, 1]} : vector<18x18x4xf32> to vector<16x16x4xf32>
    %12 = vector.shape_cast %11 : vector<16x16x4xf32> to vector<256x4xf32>
    %13 = vector.extract_strided_slice %1 {offsets = [1, 2, 0], sizes = [16, 16, 4], strides = [1, 1, 1]} : vector<18x18x4xf32> to vector<16x16x4xf32>
    %14 = vector.shape_cast %13 : vector<16x16x4xf32> to vector<256x4xf32>
    %15 = vector.extract_strided_slice %1 {offsets = [2, 0, 0], sizes = [16, 16, 4], strides = [1, 1, 1]} : vector<18x18x4xf32> to vector<16x16x4xf32>
    %16 = vector.shape_cast %15 : vector<16x16x4xf32> to vector<256x4xf32>
    %17 = vector.extract_strided_slice %1 {offsets = [2, 1, 0], sizes = [16, 16, 4], strides = [1, 1, 1]} : vector<18x18x4xf32> to vector<16x16x4xf32>
    %18 = vector.shape_cast %17 : vector<16x16x4xf32> to vector<256x4xf32>
    %19 = vector.extract_strided_slice %1 {offsets = [2, 2, 0], sizes = [16, 16, 4], strides = [1, 1, 1]} : vector<18x18x4xf32> to vector<16x16x4xf32>
    %20 = vector.shape_cast %19 : vector<16x16x4xf32> to vector<256x4xf32>
    %21 = tpu.concatenate %4, %6, %8, %10, %12, %14, %16, %18, %20 in 1 : vector<256x4xf32>, vector<256x4xf32>, vector<256x4xf32>, vector<256x4xf32>, vector<256x4xf32>, vector<256x4xf32>, vector<256x4xf32>, vector<256x4xf32>, vector<256x4xf32> -> vector<256x36xf32>
    %cst = arith.constant dense<0.000000e+00> : vector<256x8xf32>
    %22 = tpu.matmul %21, %2, %cst {dimension_numbers = #tpu.dot_dimension_numbers<[1], [0], [0], [1], [0, 0, 1, 1], [], []>} : vector<256x36xf32>, vector<36x8xf32>, vector<256x8xf32> -> vector<256x8xf32>
    %c0_5 = arith.constant 0 : index
    %c0_6 = arith.constant 0 : index
    %23 = vector.load %arg3[%c0_5, %c0_6] : memref<1x8xf32, #tpu.memory_space<vmem>>, vector<1x8xf32>
    %24 = vector.broadcast %23 : vector<1x8xf32> to vector<256x8xf32>
    %25 = arith.addf %22, %24 : vector<256x8xf32>
    %cst_7 = arith.constant 0.000000e+00 : f32
    %26 = vector.broadcast %cst_7 : f32 to vector<256x8xf32>
    %27 = arith.maximumf %25, %26 : vector<256x8xf32>
    %28 = vector.shape_cast %27 : vector<256x8xf32> to vector<16x16x8xf32>
    %cst_8 = arith.constant 0.000000e+00 : f32
    %29 = vector.broadcast %cst_8 : f32 to vector<1x16x8xf32>
    %cst_9 = arith.constant 0.000000e+00 : f32
    %30 = vector.broadcast %cst_9 : f32 to vector<18x1x8xf32>
    %31 = tpu.concatenate %29, %28, %29 in 0 : vector<1x16x8xf32>, vector<16x16x8xf32>, vector<1x16x8xf32> -> vector<18x16x8xf32>
    %32 = tpu.concatenate %30, %31, %30 in 1 : vector<18x1x8xf32>, vector<18x16x8xf32>, vector<18x1x8xf32> -> vector<18x18x8xf32>
    %c0_10 = arith.constant 0 : index
    %c0_11 = arith.constant 0 : index
    %33 = vector.load %arg4[%c0_10, %c0_11] : memref<72x32xf32, #tpu.memory_space<vmem>>, vector<72x32xf32>
    %34 = vector.extract_strided_slice %32 {offsets = [0, 0, 0], sizes = [16, 16, 8], strides = [1, 1, 1]} : vector<18x18x8xf32> to vector<16x16x8xf32>
    %35 = vector.shape_cast %34 : vector<16x16x8xf32> to vector<256x8xf32>
    %36 = vector.extract_strided_slice %32 {offsets = [0, 1, 0], sizes = [16, 16, 8], strides = [1, 1, 1]} : vector<18x18x8xf32> to vector<16x16x8xf32>
    %37 = vector.shape_cast %36 : vector<16x16x8xf32> to vector<256x8xf32>
    %38 = vector.extract_strided_slice %32 {offsets = [0, 2, 0], sizes = [16, 16, 8], strides = [1, 1, 1]} : vector<18x18x8xf32> to vector<16x16x8xf32>
    %39 = vector.shape_cast %38 : vector<16x16x8xf32> to vector<256x8xf32>
    %40 = vector.extract_strided_slice %32 {offsets = [1, 0, 0], sizes = [16, 16, 8], strides = [1, 1, 1]} : vector<18x18x8xf32> to vector<16x16x8xf32>
    %41 = vector.shape_cast %40 : vector<16x16x8xf32> to vector<256x8xf32>
    %42 = vector.extract_strided_slice %32 {offsets = [1, 1, 0], sizes = [16, 16, 8], strides = [1, 1, 1]} : vector<18x18x8xf32> to vector<16x16x8xf32>
    %43 = vector.shape_cast %42 : vector<16x16x8xf32> to vector<256x8xf32>
    %44 = vector.extract_strided_slice %32 {offsets = [1, 2, 0], sizes = [16, 16, 8], strides = [1, 1, 1]} : vector<18x18x8xf32> to vector<16x16x8xf32>
    %45 = vector.shape_cast %44 : vector<16x16x8xf32> to vector<256x8xf32>
    %46 = vector.extract_strided_slice %32 {offsets = [2, 0, 0], sizes = [16, 16, 8], strides = [1, 1, 1]} : vector<18x18x8xf32> to vector<16x16x8xf32>
    %47 = vector.shape_cast %46 : vector<16x16x8xf32> to vector<256x8xf32>
    %48 = vector.extract_strided_slice %32 {offsets = [2, 1, 0], sizes = [16, 16, 8], strides = [1, 1, 1]} : vector<18x18x8xf32> to vector<16x16x8xf32>
    %49 = vector.shape_cast %48 : vector<16x16x8xf32> to vector<256x8xf32>
    %50 = vector.extract_strided_slice %32 {offsets = [2, 2, 0], sizes = [16, 16, 8], strides = [1, 1, 1]} : vector<18x18x8xf32> to vector<16x16x8xf32>
    %51 = vector.shape_cast %50 : vector<16x16x8xf32> to vector<256x8xf32>
    %52 = tpu.concatenate %35, %37, %39, %41, %43, %45, %47, %49, %51 in 1 : vector<256x8xf32>, vector<256x8xf32>, vector<256x8xf32>, vector<256x8xf32>, vector<256x8xf32>, vector<256x8xf32>, vector<256x8xf32>, vector<256x8xf32>, vector<256x8xf32> -> vector<256x72xf32>
    %cst_12 = arith.constant dense<0.000000e+00> : vector<256x32xf32>
    %53 = tpu.matmul %52, %33, %cst_12 {dimension_numbers = #tpu.dot_dimension_numbers<[1], [0], [0], [1], [0, 0, 1, 1], [], []>} : vector<256x72xf32>, vector<72x32xf32>, vector<256x32xf32> -> vector<256x32xf32>
    %c0_13 = arith.constant 0 : index
    %c0_14 = arith.constant 0 : index
    %54 = vector.load %arg5[%c0_13, %c0_14] : memref<1x32xf32, #tpu.memory_space<vmem>>, vector<1x32xf32>
    %55 = vector.broadcast %54 : vector<1x32xf32> to vector<256x32xf32>
    %56 = arith.addf %53, %55 : vector<256x32xf32>
    %cst_15 = arith.constant 0.000000e+00 : f32
    %57 = vector.broadcast %cst_15 : f32 to vector<256x32xf32>
    %58 = arith.maximumf %56, %57 : vector<256x32xf32>
    %c0_16 = arith.constant 0 : index
    %c0_17 = arith.constant 0 : index
    %59 = vector.load %arg6[%c0_16, %c0_17] : memref<1x32xf32, #tpu.memory_space<vmem>>, vector<1x32xf32>
    %60 = vector.broadcast %59 : vector<1x32xf32> to vector<256x32xf32>
    %61 = arith.mulf %58, %60 : vector<256x32xf32>
    %c0_18 = arith.constant 0 : index
    %c0_19 = arith.constant 0 : index
    %62 = vector.load %arg7[%c0_18, %c0_19] : memref<1x32xf32, #tpu.memory_space<vmem>>, vector<1x32xf32>
    %63 = vector.broadcast %62 : vector<1x32xf32> to vector<256x32xf32>
    %64 = arith.addf %61, %63 : vector<256x32xf32>
    %65 = tpu.transpose %64, [1, 0] : vector<256x32xf32> -> vector<32x256xf32>
    %66 = vector.shape_cast %65 : vector<32x256xf32> to vector<1x32x256xf32>
    %c0_20 = arith.constant 0 : index
    %c0_21 = arith.constant 0 : index
    %c0_22 = arith.constant 0 : index
    %67 = vector.load %arg8[%c0_20, %c0_21, %c0_22] : memref<1x32x256xf32, #tpu.memory_space<vmem>>, vector<1x32x256xf32>
    tpu.vector_store %arg8[%c0_20, %c0_21, %c0_22], %66 {strides = array<i32>} : memref<1x32x256xf32, #tpu.memory_space<vmem>>, vector<1x32x256xf32>,
    return
  }
  func.func @transform_0(%arg0: i32) -> (i32, i32, i32, i32) {
    %c0_i32 = arith.constant 0 : i32
    %c0_i32_0 = arith.constant 0 : i32
    %c0_i32_1 = arith.constant 0 : i32
    %c0_i32_2 = arith.constant 0 : i32
    return %arg0, %c0_i32, %c0_i32_0, %c0_i32_1 : i32, i32, i32, i32
  }
  func.func @transform_1(%arg0: i32) -> (i32, i32) {
    %c0_i32 = arith.constant 0 : i32
    %c0_i32_0 = arith.constant 0 : i32
    %c0_i32_1 = arith.constant 0 : i32
    return %c0_i32, %c0_i32_0 : i32, i32
  }
  func.func @transform_2(%arg0: i32) -> (i32, i32) {
    %c0_i32 = arith.constant 0 : i32
    %c0_i32_0 = arith.constant 0 : i32
    %c0_i32_1 = arith.constant 0 : i32
    return %c0_i32, %c0_i32_0 : i32, i32
  }
  func.func @transform_3(%arg0: i32) -> (i32, i32) {
    %c0_i32 = arith.constant 0 : i32
    %c0_i32_0 = arith.constant 0 : i32
    %c0_i32_1 = arith.constant 0 : i32
    return %c0_i32, %c0_i32_0 : i32, i32
  }
  func.func @transform_4(%arg0: i32) -> (i32, i32) {
    %c0_i32 = arith.constant 0 : i32
    %c0_i32_0 = arith.constant 0 : i32
    %c0_i32_1 = arith.constant 0 : i32
    return %c0_i32, %c0_i32_0 : i32, i32
  }
  func.func @transform_5(%arg0: i32) -> (i32, i32) {
    %c0_i32 = arith.constant 0 : i32
    %c0_i32_0 = arith.constant 0 : i32
    %c0_i32_1 = arith.constant 0 : i32
    return %c0_i32, %c0_i32_0 : i32, i32
  }
  func.func @transform_6(%arg0: i32) -> (i32, i32) {
    %c0_i32 = arith.constant 0 : i32
    %c0_i32_0 = arith.constant 0 : i32
    %c0_i32_1 = arith.constant 0 : i32
    return %c0_i32, %c0_i32_0 : i32, i32
  }
  func.func @transform_7(%arg0: i32) -> (i32, i32, i32) {
    %c0_i32 = arith.constant 0 : i32
    %c0_i32_0 = arith.constant 0 : i32
    %c0_i32_1 = arith.constant 0 : i32
    return %arg0, %c0_i32, %c0_i32_0 : i32, i32, i32
  }
}

</mosaic_0001>

<bundles_post_ra>
// kernel: mini_model_forward.1
= control target key start
LH: loop header
LB: loop body
LE: loop exit
PB: predicated region body
PF: predicated region fallthrough
CT: control target
= control target key end

     0   :  { %s4395_s24 = smov 0   ;;  %s8160_s0 = inlined_call_operand.vmem [shape: f32[2,18,18,4], index: 0, kind: input, shape index: {}]   ;;  %s8161_s1 = inlined_call_operand.vmem [shape: f32[36,8], index: 1, kind: input, shape index: {}]   ;;  %s8162_s2 = inlined_call_operand.vmem [shape: f32[1,8], index: 2, kind: input, shape index: {}]   ;;  %s8163_s3 = inlined_call_operand.vmem [shape: f32[72,32], index: 3, kind: input, shape index: {}]   ;;  %s8164_s4 = inlined_call_operand.vmem [shape: f32[1,32], index: 4, kind: input, shape index: {}]   ;;  %s8165_s5 = inlined_call_operand.vmem [shape: f32[1,32], index: 5, kind: input, shape index: {}]   ;;  %s8166_s6 = inlined_call_operand.vmem [shape: f32[1,32], index: 6, kind: input, shape index: {}]   ;;  %s8167_s7 = inlined_call_operand.vmem [shape: f32[2,32,256], index: 7, kind: output, shape index: {}]  }
   0x1 LB: > { %s3945_s25 = sadd.s32 4294967295, %s4340_s24   ;;  %p3949_p0 = scmp.ge.s32.totalorder %s4340_s24, 1  ;;  %s4340_s24 = sphi %s4395_s24, %s17_s24  }
   0x2   : > { %p237_p1 = scmp.lt.s32.totalorder %s4340_s24, 3 }
   0x4   : > { %p238_p2 = pnand %p3949_p0, %p237_p1 }
   0x6   : > { %241 = sbr.rel (%p238_p2) target bundleno = 1731 (0x6c3), region = 48 }
   0xd   : > { %p269_p3 = scmp.lt.s32.totalorder %s3945_s25, 1  ;;  %vm386_vm0 = vcmask 1046528   ;;  %s4342_s30 = smov 4   ;;  %vm467_vm1 = vcmask 1045504   ;;  %vm1342_vm2 = vcmask 31744   ;;  %vm1375_vm3 = vcmask 64512  }
   0xe   : > { %s4343_s8 = smov 8   ;;  %s4344_s9 = smov 12   ;;  %vm1408_vm4 = vcmask 97280   ;;  %vm1710_vm5 = vcmask 1043456   ;;  %vm1441_vm6 = vcmask 130048   ;;  %vm1474_vm7 = vcmask 162816  }
   0xf   : > { %s9049_s25 = smov (!%p269_p3, %s3945_s25), 1  ;;  %s4345_s10 = smov 16   ;;  %vm1507_vm8 = vcmask 195584   ;;  %vm1540_vm9 = vcmask 228352   ;;  %vm1573_vm10 = vcmask 261120   ;;  %vm1613_vm11 = vcmask 293888  }
  0x10   : > { %s4261_s26 = smul.u32 432, %s9049_s25  ;;  %s4346_s11 = smov 20   ;;  %vm2004_vm12 = vcmask 1040384   ;;  %vm3247_vm13 = vcmask 326656   ;;  %vm3280_vm14 = vcmask 392192   ;;  %vm3313_vm15 = vcmask 457728  }
  0x11   : > { %s4347_s12 = smov 24   ;;  %s4348_s13 = smov 28  }
  0x12   : > { %s4409_s29 = scalar_lea.vmem %s8160_s0, %s4261_s26  ;;  %s4349_s26 = smov 32  }
  0x13   : > { %v4412_v0 = vld [vmem:[%s4409_s29 + $0x18] sm:$0xff]  ;;  %v4415_v1 = vld [vmem:[%s4409_s29 + $0x20] sm:$0xff]  ;;  %v4423_v5 = vld [vmem:[%s4409_s29 + $0x8] sm:$0xff]  ;;  %s4351_s22 = smov 40   ;;  %s4352_s28 = smov 48  }
  0x14   : > { %v4418_v2 = vld [vmem:[%s4409_s29] sm:$0xff]  ;;  %v392_v3 = vrot.slane %v4412_v0, 1  ;;  %v393_v4 = vrot.slane %v4415_v1, 1  ;;  %v4427_v7 = vld [vmem:[%s4409_s29 + $0x28] sm:$0x3]  ;;  %v388_v8 = vrot.slane %v4423_v5, 1 }
  0x15   : > { %v387_v6 = vrot.slane %v4418_v2, 1  ;;  %v395_v9 = vrot.slane %v4427_v7, 1  ;;  %v4432_v10 = vld [vmem:[%s4409_s29 + $0x10] sm:$0x3]  ;;  %v4435_v11 = vld [vmem:[%s4409_s29 + $0x38] sm:$0xff]  ;;  %v4465_v24 = vld [vmem:[%s4409_s29 + $0x48] sm:$0xff] }
  0x16   : > { %v4438_v12 = vsel %vm386_vm0, %v392_v3, %v393_v4  ;;  %v390_v13 = vrot.slane %v4432_v10, 1  ;;  %v4442_v14 = vld [vmem:[%s4409_s29 + $0x40] sm:$0x3]  ;;  %v4445_v15 = vld [vmem:[%s4409_s29 + $0x30] sm:$0xff]  ;;  %v398_v18 = vrot.slane %v4435_v11, 1  ;;  %v402_v29 = vrot.slane %v4465_v24, 1 }
  0x17   : > { %578 = vrot.lane.b32.xlu1 %v4438_v12, %s4342_s30  ;;  %v389_v16 = vsel %vm386_vm0, %v387_v6, %v388_v8  ;;  %v4452_v17 = vsel %vm386_vm0, %v393_v4, %v395_v9  ;;  %v400_v19 = vrot.slane %v4442_v14, 1  ;;  %v397_v21 = vrot.slane %v4445_v15, 1  ;;  %v4459_v22 = vld [vmem:[%s4409_s29 + $0x50] sm:$0xff]  ;;  %v4462_v23 = vld [vmem:[%s4409_s29 + $0x58] sm:$0x3]  ;;  %v4480_v30 = vld [vmem:[%s4409_s29 + $0x68] sm:$0xff] }
  0x18   : > { %574 = vrot.lane.b32.xlu0 %v389_v16, %s4342_s30  ;;  %v391_v20 = vsel %vm386_vm0, %v388_v8, %v390_v13  ;;  %v403_v26 = vrot.slane %v4459_v22, 1  ;;  %v405_v27 = vrot.slane %v4462_v23, 1  ;;  %v4483_v31 = vld [vmem:[%s4409_s29 + $0x70] sm:$0x3]  ;;  %v4486_v32 = vld [vmem:[%s4409_s29 + $0x60] sm:$0xff]  ;;  %v408_v34 = vrot.slane %v4480_v30, 1 }
  0x19   : > { %v4471_v25 = vsel %vm386_vm0, %v398_v18, %v400_v19  ;;  %v4476_v28 = vsel %vm386_vm0, %v397_v21, %v398_v18  ;;  %v410_v35 = vrot.slane %v4483_v31, 1  ;;  %v407_v37 = vrot.slane %v4486_v32, 1  ;;  %v4502_v38 = vld [vmem:[%s4409_s29 + $0x80] sm:$0xff]  ;;  %v4505_v39 = vld [vmem:[%s4409_s29 + $0x88] sm:$0x3]  ;;  %v4508_v40 = vld [vmem:[%s4409_s29 + $0x78] sm:$0xff] }
  0x1a   : > { %8373 = vst [vmem:[#allocation2_spill] sm:$0xff] %v4471_v25  ;;  %8374 = vst [vmem:[#allocation3_spill] sm:$0xff] %v4476_v28  ;;  %v4493_v33 = vsel %vm386_vm0, %v403_v26, %v405_v27  ;;  %v4498_v36 = vsel %vm386_vm0, %v402_v29, %v403_v26  ;;  %v413_v42 = vrot.slane %v4502_v38, 1  ;;  %v415_v43 = vrot.slane %v4505_v39, 1  ;;  %v4524_v46 = vld [vmem:[%s4409_s29 + $0x98] sm:$0xff]  ;;  %v4530_v48 = vld [vmem:[%s4409_s29 + $0x90] sm:$0xff] }
  0x1b   : > { %580 = vrot.lane.b32.xlu1 %v4452_v17, %s4342_s30  ;;  %8375 = vst [vmem:[#allocation4_spill] sm:$0xff] %v4493_v33  ;;  %8376 = vst [vmem:[#allocation5_spill] sm:$0xff] %v4498_v36  ;;  %v4515_v41 = vsel %vm386_vm0, %v408_v34, %v410_v35  ;;  %v4520_v44 = vsel %vm386_vm0, %v407_v37, %v408_v34  ;;  %v412_v45 = vrot.slane %v4508_v40, 1  ;;  %v4527_v47 = vld [vmem:[%s4409_s29 + $0xa0] sm:$0x3]  ;;  %v418_v50 = vrot.slane %v4524_v46, 1 }
  0x1c   : > { %576 = vrot.lane.b32.xlu0 %v391_v20, %s4342_s30  ;;  %8377 = vst [vmem:[#allocation6_spill] sm:$0xff] %v4515_v41  ;;  %8378 = vst [vmem:[#allocation7_spill] sm:$0xff] %v4520_v44  ;;  %v4537_v49 = vsel %vm386_vm0, %v413_v42, %v415_v43  ;;  %v420_v51 = vrot.slane %v4527_v47, 1  ;;  %v417_v53 = vrot.slane %v4530_v48, 1  ;;  %v4546_v54 = vld [vmem:[%s4409_s29 + $0xb0] sm:$0xff]  ;;  %v4552_v56 = vld [vmem:[%s4409_s29 + $0xa8] sm:$0xff] }
  0x1d   : > { %8379 = vst [vmem:[#allocation8_spill] sm:$0xff] %v4537_v49  ;;  %v4542_v52 = vsel %vm386_vm0, %v412_v45, %v413_v42  ;;  %v4549_v55 = vld [vmem:[%s4409_s29 + $0xb8] sm:$0x3]  ;;  %v423_v58 = vrot.slane %v4546_v54, 1  ;;  %v422_v61 = vrot.slane %v4552_v56, 1  ;;  %v4568_v62 = vld [vmem:[%s4409_s29 + $0xc8] sm:$0xff] }
  0x1e   : > { %8380 = vst [vmem:[#allocation9_spill] sm:$0xff] %v4542_v52  ;;  %v4559_v57 = vsel %vm386_vm0, %v418_v50, %v420_v51  ;;  %v425_v59 = vrot.slane %v4549_v55, 1  ;;  %v4564_v60 = vsel %vm386_vm0, %v417_v53, %v418_v50  ;;  %v4571_v63 = vld [vmem:[%s4409_s29 + $0xd0] sm:$0x3]  ;;  %v4574_v3 = vld [vmem:[%s4409_s29 + $0xc0] sm:$0xff]  ;;  %v428_v6 = vrot.slane %v4568_v62, 1 }
  0x1f   : > { %584 = vrot.lane.b32.xlu1 %v4471_v25, %s4342_s30  ;;  %8381 = vst [vmem:[#allocation10_spill] sm:$0xff] %v4559_v57  ;;  %8382 = vst [vmem:[#allocation11_spill] sm:$0xff] %v4564_v60  ;;  %v430_v8 = vrot.slane %v4571_v63, 1  ;;  %v4586_v9 = vsel %vm386_vm0, %v422_v61, %v423_v58  ;;  %v427_v13 = vrot.slane %v4574_v3, 1  ;;  %v4590_v16 = vld [vmem:[%s4409_s29 + $0xe0] sm:$0xff]  ;;  %v4596_v19 = vld [vmem:[%s4409_s29 + $0xd8] sm:$0xff] }
  0x20   : > { %582 = vrot.lane.b32.xlu0 %v4476_v28, %s4342_s30  ;;  %v4581_v4 = vsel %vm386_vm0, %v423_v58, %v425_v59  ;;  %8384 = vst [vmem:[#allocation13_spill] sm:$0xff] %v4586_v9  ;;  %8385 = vst [vmem:[#allocation14_spill] sm:$0xff] %v4590_v16  ;;  %v4593_v18 = vld [vmem:[%s4409_s29 + $0xe8] sm:$0x3]  ;;  %v433_v21 = vrot.slane %v4590_v16, 1  ;;  %v432_v29 = vrot.slane %v4596_v19, 1 }
  0x21   : > { %8383 = vst [vmem:[#allocation12_spill] sm:$0xff] %v4581_v4  ;;  %8386 = vst [vmem:[#allocation15_spill] sm:$0xff] %v4596_v19  ;;  %v4603_v20 = vsel %vm386_vm0, %v428_v6, %v430_v8  ;;  %v435_v26 = vrot.slane %v4593_v18, 1  ;;  %v4608_v27 = vsel %vm386_vm0, %v427_v13, %v428_v6  ;;  %v4612_v34 = vld [vmem:[%s4409_s29 + $0xf8] sm:$0xff]  ;;  %v4615_v35 = vld [vmem:[%s4409_s29 + $0x100] sm:$0x3] }
  0x22   : > { %8387 = vst [vmem:[#allocation16_spill] sm:$0xff] %v4603_v20  ;;  %8388 = vst [vmem:[#allocation17_spill] sm:$0xff] %v4608_v27  ;;  %v4618_v37 = vld [vmem:[%s4409_s29 + $0xf0] sm:$0xff]  ;;  %v438_v43 = vrot.slane %v4612_v34, 1  ;;  %v440_v45 = vrot.slane %v4615_v35, 1  ;;  %v4630_v50 = vsel %vm386_vm0, %v432_v29, %v433_v21  ;;  %v4640_v59 = vld [vmem:[%s4409_s29 + $0x108] sm:$0xff] }
  0x23   : > { %588 = vrot.lane.b32.xlu1 %v4493_v33, %s4342_s30  ;;  %8389 = vst [vmem:[#allocation18_spill] sm:$0xff] %v4612_v34  ;;  %8390 = vst [vmem:[#allocation19_spill] sm:$0xff] %v4618_v37  ;;  %v4625_v42 = vsel %vm386_vm0, %v433_v21, %v435_v26  ;;  %v437_v51 = vrot.slane %v4618_v37, 1  ;;  %v4634_v53 = vld [vmem:[%s4409_s29 + $0x110] sm:$0xff]  ;;  %v4637_v58 = vld [vmem:[%s4409_s29 + $0x118] sm:$0x3] }
  0x24   : > { %586 = vrot.lane.b32.xlu0 %v4498_v36, %s4342_s30  ;;  %8391 = vst [vmem:[#allocation20_spill] sm:$0xff] %v4625_v42  ;;  %8392 = vst [vmem:[#allocation21_spill] sm:$0xff] %v4630_v50  ;;  %v4647_v61 = vsel %vm386_vm0, %v438_v43, %v440_v45  ;;  %v443_v6 = vrot.slane %v4634_v53, 1  ;;  %v445_v8 = vrot.slane %v4637_v58, 1  ;;  %v442_v21 = vrot.slane %v4640_v59, 1  ;;  %v4656_v26 = vld [vmem:[%s4409_s29 + $0x128] sm:$0xff] }
  0x25   : > { %8393 = vst [vmem:[#allocation22_spill] sm:$0xff] %v4634_v53  ;;  %8394 = vst [vmem:[#allocation23_spill] sm:$0xff] %v4640_v59  ;;  %v4652_v13 = vsel %vm386_vm0, %v437_v51, %v438_v43  ;;  %v4659_v29 = vld [vmem:[%s4409_s29 + $0x130] sm:$0x3]  ;;  %v448_v43 = vrot.slane %v4656_v26, 1 }
  0x26   : > { %8395 = vst [vmem:[#allocation24_spill] sm:$0xff] %v4647_v61  ;;  %8396 = vst [vmem:[#allocation25_spill] sm:$0xff] %v4652_v13  ;;  %v4669_v45 = vsel %vm386_vm0, %v443_v6, %v445_v8  ;;  %v450_v51 = vrot.slane %v4659_v29, 1 }
  0x27   : > { %592 = vrot.lane.b32.xlu1 %v4515_v41, %s4342_s30  ;;  %8397 = vst [vmem:[#allocation26_spill] sm:$0xff] %v4656_v26  ;;  %8399 = vst [vmem:[#allocation28_spill] sm:$0xff] %v4669_v45 }
  0x28   : > { %590 = vrot.lane.b32.xlu0 %v4520_v44, %s4342_s30  ;;  %v4691_v8 = vsel %vm386_vm0, %v448_v43, %v450_v51  ;;  %v4725_v44 = vld [vmem:[%s4409_s29 + $0x178] sm:$0x3] }
  0x29   : > { %8401 = vst [vmem:[#allocation30_spill] sm:$0xff] %v4691_v8 }
  0x2b   : > { %596 = vrot.lane.b32.xlu1 %v4537_v49, %s4342_s30  ;;  %v4722_v49 = vld [vmem:[%s4409_s29 + $0x170] sm:$0xff] }
  0x2c   : > { %594 = vrot.lane.b32.xlu0 %v4542_v52, %s4342_s30 }
  0x2f   : > { %600 = vrot.lane.b32.xlu1 %v4559_v57, %s4342_s30 }
  0x30   : > { %598 = vrot.lane.b32.xlu0 %v4564_v60, %s4342_s30  ;;  %v4700_v60 = vld [vmem:[%s4409_s29 + $0x158] sm:$0xff] }
  0x33   : > { %604 = vrot.lane.b32.xlu1 %v4581_v4, %s4342_s30 }
  0x34   : > { %602 = vrot.lane.b32.xlu0 %v4586_v9, %s4342_s30 }
  0x37   : > { %608 = vrot.lane.b32.xlu1 %v4603_v20, %s4342_s30  ;;  %v4678_v20 = vld [vmem:[%s4409_s29 + $0x140] sm:$0xff] }
  0x38   : > { %606 = vrot.lane.b32.xlu0 %v4608_v27, %s4342_s30 }
  0x3b   : > { %612 = vrot.lane.b32.xlu1 %v4625_v42, %s4342_s30  ;;  %v4674_v42 = vsel %vm386_vm0, %v442_v21, %v443_v6  ;;  %v453_v6 = vrot.slane %v4678_v20, 1 }
  0x3c   : > { %610 = vrot.lane.b32.xlu0 %v4630_v50, %s4342_s30  ;;  %v4662_v50 = vld [vmem:[%s4409_s29 + $0x120] sm:$0xff]  ;;  %8400 = vst [vmem:[#allocation29_spill] sm:$0xff] %v4674_v42 }
  0x3d   : > { %8398 = vst [vmem:[#allocation27_spill] sm:$0xff] %v4662_v50  ;;  %v447_v27 = vrot.slane %v4662_v50, 1 }
  0x3f   : > { %616 = vrot.lane.b32.xlu1 %v4647_v61, %s4342_s30  ;;  %v4681_v61 = vld [vmem:[%s4409_s29 + $0x148] sm:$0x3]  ;;  %v4696_v9 = vsel %vm386_vm0, %v447_v27, %v448_v43  ;;  %v458_v27 = vrot.slane %v4700_v60, 1 }
  0x40   : > { %614 = vrot.lane.b32.xlu0 %v4652_v13, %s4342_s30  ;;  %v4684_v13 = vld [vmem:[%s4409_s29 + $0x138] sm:$0xff]  ;;  %v455_v21 = vrot.slane %v4681_v61, 1  ;;  %8402 = vst [vmem:[#allocation31_spill] sm:$0xff] %v4696_v9 }
  0x41   : > { %v452_v4 = vrot.slane %v4684_v13, 1 }
  0x42   : > { %v4713_v51 = vsel %vm386_vm0, %v453_v6, %v455_v21 }
  0x43   : > { %620 = vrot.lane.b32.xlu1 %v4669_v45, %s4342_s30  ;;  %v4703_v45 = vld [vmem:[%s4409_s29 + $0x160] sm:$0x3]  ;;  %8403 = vst [vmem:[#allocation32_spill] sm:$0xff] %v4713_v51  ;;  %v4718_v57 = vsel %vm386_vm0, %v452_v4, %v453_v6  ;;  %v463_v4 = vrot.slane %v4722_v49, 1  ;;  %v465_v6 = vrot.slane %v4725_v44, 1 }
  0x44   : > { %618 = vrot.lane.b32.xlu0 %v4674_v42, %s4342_s30  ;;  %v4706_v42 = vld [vmem:[%s4409_s29 + $0x150] sm:$0xff]  ;;  %v460_v43 = vrot.slane %v4703_v45, 1  ;;  %8404 = vst [vmem:[#allocation33_spill] sm:$0xff] %v4718_v57 }
  0x45   : > { %v457_v52 = vrot.slane %v4706_v42, 1 }
  0x46   : > { %v4735_v21 = vsel %vm386_vm0, %v458_v27, %v460_v43  ;;  %v469_v43 = vrot.slane %v4423_v5, 2  ;;  %v476_v5 = vrot.slane %v4427_v7, 2  ;;  %v478_v7 = vrot.slane %v4445_v15, 2 }
  0x47   : > { %624 = vrot.lane.b32.xlu1 %v4691_v8, %s4342_s30  ;;  %v4728_v8 = vld [vmem:[%s4409_s29 + $0x168] sm:$0xff]  ;;  %8405 = vst [vmem:[#allocation34_spill] sm:$0xff] %v4735_v21 }
  0x48   : > { %622 = vrot.lane.b32.xlu0 %v4696_v9, %s4342_s30  ;;  %v4740_v9 = vsel %vm386_vm0, %v457_v52, %v458_v27  ;;  %v462_v41 = vrot.slane %v4728_v8, 1  ;;  %v468_v52 = vrot.slane %v4418_v2, 2 }
  0x49   : > { %8406 = vst [vmem:[#allocation35_spill] sm:$0xff] %v4740_v9 }
  0x4a   : > { %v4753_v36 = vsel %vm386_vm0, %v462_v41, %v463_v4  ;;  %v473_v41 = vrot.slane %v4412_v0, 2 }
  0x4b   : > { %628 = vrot.lane.b32.xlu1 %v4713_v51, %s4342_s30  ;;  %v471_v51 = vrot.slane %v4432_v10, 2  ;;  %8408 = vst [vmem:[#allocation37_spill] sm:$0xff] %v4753_v36  ;;  %v470_v10 = vsel %vm467_vm1, %v468_v52, %v469_v43  ;;  %v484_v52 = vrot.slane %v4459_v22, 2 }
  0x4c   : > { %626 = vrot.lane.b32.xlu0 %v4718_v57, %s4342_s30  ;;  %v4748_v57 = vsel %vm386_vm0, %v463_v4, %v465_v6  ;;  %v474_v6 = vrot.slane %v4415_v1, 2  ;;  %v479_v4 = vrot.slane %v4435_v11, 2 }
  0x4d   : > { %8407 = vst [vmem:[#allocation36_spill] sm:$0xff] %v4748_v57  ;;  %v472_v27 = vsel %vm467_vm1, %v469_v43, %v471_v51  ;;  %v481_v51 = vrot.slane %v4442_v14, 2 }
  0x4e   : > { %v4768_v2 = vsel %vm467_vm1, %v474_v6, %v476_v5  ;;  %v4786_v14 = vsel %vm467_vm1, %v478_v7, %v479_v4  ;;  %v494_v7 = vrot.slane %v4502_v38, 2 }
  0x4f   : > { %632 = vrot.lane.b32.xlu1 %v4735_v21, %s4342_s30  ;;  %v4781_v43 = vsel %vm467_vm1, %v479_v4, %v481_v51  ;;  %v488_v4 = vrot.slane %v4486_v32, 2 }
  0x50   : > { %630 = vrot.lane.b32.xlu0 %v4740_v9, %s4342_s30 }
  0x53   : > { %636 = vrot.lane.b32.xlu1 %v4748_v57, %s4342_s30 }
  0x54   : > { %634 = vrot.lane.b32.xlu0 %v4753_v36, %s4342_s30  ;;  %v4773_v36 = vsel %vm467_vm1, %v473_v41, %v474_v6  ;;  %v483_v6 = vrot.slane %v4465_v24, 2  ;;  %v491_v41 = vrot.slane %v4483_v31, 2  ;;  %s4354_s30 = smov 64  }
  0x57   : > { %672 = vrot.lane.b32.xlu1 %v472_v27, %s4343_s8  ;;  %v486_v27 = vrot.slane %v4462_v23, 2  ;;  %v4799_v23 = vsel %vm467_vm1, %v483_v6, %v484_v52 }
  0x58   : > { %670 = vrot.lane.b32.xlu0 %v470_v10, %s4343_s8  ;;  %v489_v10 = vrot.slane %v4480_v30, 2  ;;  %8409 = vst [vmem:[#allocation38_spill] sm:$0xff] %v4799_v23 }
  0x59   : > { %v4794_v5 = vsel %vm467_vm1, %v484_v52, %v486_v27  ;;  %v496_v27 = vrot.slane %v4505_v39, 2  ;;  %v493_v52 = vrot.slane %v4508_v40, 2 }
  0x5a   : > { %v4807_v51 = vsel %vm467_vm1, %v489_v10, %v491_v41  ;;  %v4812_v31 = vsel %vm467_vm1, %v488_v4, %v489_v10  ;;  %v499_v41 = vrot.slane %v4524_v46, 2  ;;  %v498_v10 = vrot.slane %v4530_v48, 2 }
  0x5b   : > { %676 = vrot.lane.b32.xlu1 %v4768_v2, %s4343_s8  ;;  %8410 = vst [vmem:[#allocation39_spill] sm:$0xff] %v4812_v31  ;;  %v4820_v6 = vsel %vm467_vm1, %v494_v7, %v496_v27  ;;  %v4825_v39 = vsel %vm467_vm1, %v493_v52, %v494_v7  ;;  %v504_v27 = vrot.slane %v4546_v54, 2  ;;  %v503_v7 = vrot.slane %v4552_v56, 2 }
  0x5c   : > { %674 = vrot.lane.b32.xlu0 %v4773_v36, %s4343_s8  ;;  %8411 = vst [vmem:[#allocation40_spill] sm:$0xff] %v4825_v39 }
  0x5f   : > { %680 = vrot.lane.b32.xlu1 %v4781_v43, %s4343_s8 }
  0x60   : > { %678 = vrot.lane.b32.xlu0 %v4786_v14, %s4343_s8 }
  0x63   : > { %684 = vrot.lane.b32.xlu1 %v4794_v5, %s4343_s8 }
  0x64   : > { %682 = vrot.lane.b32.xlu0 %v4799_v23, %s4343_s8  ;;  %v501_v23 = vrot.slane %v4527_v47, 2  ;;  %v4838_v47 = vsel %vm467_vm1, %v498_v10, %v499_v41 }
  0x65   : > { %8412 = vst [vmem:[#allocation41_spill] sm:$0xff] %v4838_v47 }
  0x66   : > { %v4833_v4 = vsel %vm467_vm1, %v499_v41, %v501_v23  ;;  %v509_v23 = vrot.slane %v4568_v62, 2  ;;  %v508_v41 = vrot.slane %v4574_v3, 2 }
  0x67   : > { %688 = vrot.lane.b32.xlu1 %v4807_v51, %s4343_s8 }
  0x68   : > { %686 = vrot.lane.b32.xlu0 %v4812_v31, %s4343_s8  ;;  %v506_v31 = vrot.slane %v4549_v55, 2  ;;  %v4851_v55 = vsel %vm467_vm1, %v503_v7, %v504_v27 }
  0x69   : > { %8413 = vst [vmem:[#allocation42_spill] sm:$0xff] %v4851_v55 }
  0x6a   : > { %v4846_v52 = vsel %vm467_vm1, %v504_v27, %v506_v31  ;;  %v514_v31 = vrot.slane %v4590_v16, 2  ;;  %v513_v27 = vrot.slane %v4596_v19, 2 }
  0x6b   : > { %692 = vrot.lane.b32.xlu1 %v4820_v6, %s4343_s8 }
  0x6c   : > { %690 = vrot.lane.b32.xlu0 %v4825_v39, %s4343_s8  ;;  %v511_v39 = vrot.slane %v4571_v63, 2  ;;  %v4864_v63 = vsel %vm467_vm1, %v508_v41, %v509_v23 }
  0x6d   : > { %8414 = vst [vmem:[#allocation43_spill] sm:$0xff] %v4864_v63 }
  0x6e   : > { %v4859_v10 = vsel %vm467_vm1, %v509_v23, %v511_v39  ;;  %v519_v39 = vrot.slane %v4612_v34, 2  ;;  %v518_v23 = vrot.slane %v4618_v37, 2 }
  0x6f   : > { %696 = vrot.lane.b32.xlu1 %v4833_v4, %s4343_s8 }
  0x70   : > { %694 = vrot.lane.b32.xlu0 %v4838_v47, %s4343_s8  ;;  %v516_v47 = vrot.slane %v4593_v18, 2  ;;  %v4877_v18 = vsel %vm467_vm1, %v513_v27, %v514_v31 }
  0x71   : > { %8416 = vst [vmem:[#allocation45_spill] sm:$0xff] %v4877_v18 }
  0x72   : > { %v4872_v7 = vsel %vm467_vm1, %v514_v31, %v516_v47  ;;  %v524_v47 = vrot.slane %v4634_v53, 2  ;;  %v523_v31 = vrot.slane %v4640_v59, 2 }
  0x73   : > { %700 = vrot.lane.b32.xlu1 %v4846_v52, %s4343_s8  ;;  %8415 = vst [vmem:[#allocation44_spill] sm:$0xff] %v4872_v7 }
  0x74   : > { %698 = vrot.lane.b32.xlu0 %v4851_v55, %s4343_s8  ;;  %v521_v55 = vrot.slane %v4615_v35, 2  ;;  %v4890_v35 = vsel %vm467_vm1, %v518_v23, %v519_v39 }
  0x75   : > { %8418 = vst [vmem:[#allocation47_spill] sm:$0xff] %v4890_v35 }
  0x76   : > { %v4885_v41 = vsel %vm467_vm1, %v519_v39, %v521_v55  ;;  %v529_v55 = vrot.slane %v4656_v26, 2  ;;  %v528_v39 = vrot.slane %v4662_v50, 2 }
  0x77   : > { %704 = vrot.lane.b32.xlu1 %v4859_v10, %s4343_s8  ;;  %8417 = vst [vmem:[#allocation46_spill] sm:$0xff] %v4885_v41 }
  0x78   : > { %702 = vrot.lane.b32.xlu0 %v4864_v63, %s4343_s8  ;;  %v526_v63 = vrot.slane %v4637_v58, 2  ;;  %v4903_v58 = vsel %vm467_vm1, %v523_v31, %v524_v47 }
  0x79   : > { %8420 = vst [vmem:[#allocation49_spill] sm:$0xff] %v4903_v58 }
  0x7a   : > { %v4898_v27 = vsel %vm467_vm1, %v524_v47, %v526_v63  ;;  %v534_v63 = vrot.slane %v4678_v20, 2  ;;  %v533_v47 = vrot.slane %v4684_v13, 2 }
  0x7b   : > { %708 = vrot.lane.b32.xlu1 %v4872_v7, %s4343_s8  ;;  %8419 = vst [vmem:[#allocation48_spill] sm:$0xff] %v4898_v27 }
  0x7c   : > { %706 = vrot.lane.b32.xlu0 %v4877_v18, %s4343_s8  ;;  %v531_v18 = vrot.slane %v4659_v29, 2  ;;  %v4916_v29 = vsel %vm467_vm1, %v528_v39, %v529_v55 }
  0x7d   : > { %8421 = vst [vmem:[#allocation50_spill] sm:$0xff] %v4916_v29 }
  0x7e   : > { %v4911_v23 = vsel %vm467_vm1, %v529_v55, %v531_v18  ;;  %v539_v18 = vrot.slane %v4700_v60, 2  ;;  %v538_v55 = vrot.slane %v4706_v42, 2 }
  0x7f   : > { %712 = vrot.lane.b32.xlu1 %v4885_v41, %s4343_s8 }
  0x80   : > { %710 = vrot.lane.b32.xlu0 %v4890_v35, %s4343_s8  ;;  %v536_v35 = vrot.slane %v4681_v61, 2  ;;  %v4931_v61 = vsel %vm467_vm1, %v533_v47, %v534_v63  ;;  %v543_v47 = vrot.slane %v4728_v8, 2 }
  0x81   : > { %8423 = vst [vmem:[#allocation52_spill] sm:$0xff] %v4931_v61 }
  0x82   : > { %v4924_v31 = vsel %vm467_vm1, %v534_v63, %v536_v35  ;;  %v4948_v63 = vsel %vm467_vm1, %v538_v55, %v539_v18 }
  0x83   : > { %716 = vrot.lane.b32.xlu1 %v4898_v27, %s4343_s8 }
  0x84   : > { %714 = vrot.lane.b32.xlu0 %v4903_v58, %s4343_s8  ;;  %v541_v58 = vrot.slane %v4703_v45, 2  ;;  %v544_v45 = vrot.slane %v4722_v49, 2 }
  0x86   : > { %v4941_v35 = vsel %vm467_vm1, %v539_v18, %v541_v58 }
  0x87   : > { %720 = vrot.lane.b32.xlu1 %v4911_v23, %s4343_s8 }
  0x88   : > { %718 = vrot.lane.b32.xlu0 %v4916_v29, %s4343_s8 }
  0x89   : > { %v4928_v27 = vpop.permute.xlu1 %578 }
  0x8a   : > { %8422 = vst [vmem:[#allocation51_spill] sm:$0xff] %v4928_v27  ;;  %v4934_v39 = vpop.permute.xlu0 %574  ;;  %v546_v27 = vrot.slane %v4725_v44, 2  ;;  %v4963_v44 = vsel %vm467_vm1, %v543_v47, %v544_v45 }
  0x8b   : > { %8424 = vst [vmem:[#allocation53_spill] sm:$0xff] %v4934_v39  ;;  %724 = vrot.lane.b32.xlu1 %v4924_v31, %s4343_s8 }
  0x8c   : > { %722 = vrot.lane.b32.xlu0 %v4931_v61, %s4343_s8  ;;  %v4958_v58 = vsel %vm467_vm1, %v544_v45, %v546_v27 }
  0x8d   : > { %v4945_v29 = vpop.permute.xlu1 %580 }
  0x8e   : > { %8425 = vst [vmem:[#allocation54_spill] sm:$0xff] %v4945_v29  ;;  %v4951_v39 = vpop.permute.xlu0 %576 }
  0x8f   : > { %8426 = vst [vmem:[#allocation55_spill] sm:$0xff] %v4951_v39  ;;  %728 = vrot.lane.b32.xlu1 %v4941_v35, %s4343_s8 }
  0x90   : > { %726 = vrot.lane.b32.xlu0 %v4948_v63, %s4343_s8 }
  0x91   : > { %v4960_v61 = vpop.permute.xlu1 %584 }
  0x92   : > { %8427 = vst [vmem:[#allocation56_spill] sm:$0xff] %v4960_v61  ;;  %v4965_v18 = vpop.permute.xlu0 %582 }
  0x93   : > { %8428 = vst [vmem:[#allocation57_spill] sm:$0xff] %v4965_v18  ;;  %732 = vrot.lane.b32.xlu1 %v4958_v58, %s4343_s8 }
  0x94   : > { %730 = vrot.lane.b32.xlu0 %v4963_v44, %s4343_s8 }
  0x95   : > { %v4971_v55 = vpop.permute.xlu1 %588 }
  0x96   : > { %8429 = vst [vmem:[#allocation58_spill] sm:$0xff] %v4971_v55  ;;  %v4973_v29 = vpop.permute.xlu0 %586 }
  0x97   : > { %8430 = vst [vmem:[#allocation59_spill] sm:$0xff] %v4973_v29  ;;  %768 = vrot.lane.b32.xlu1 %v4415_v1, %s4344_s9 }
  0x98   : > { %766 = vrot.lane.b32.xlu0 %v4412_v0, %s4344_s9 }
  0x99   : > { %v4979_v27 = vpop.permute.xlu1 %592 }
  0x9a   : > { %8431 = vst [vmem:[#allocation60_spill] sm:$0xff] %v4979_v27  ;;  %v4981_v45 = vpop.permute.xlu0 %590 }
  0x9b   : > { %8432 = vst [vmem:[#allocation61_spill] sm:$0xff] %v4981_v45  ;;  %772 = vrot.lane.b32.xlu1 %v4435_v11, %s4344_s9 }
  0x9c   : > { %770 = vrot.lane.b32.xlu0 %v4445_v15, %s4344_s9 }
  0x9d   : > { %v4987_v47 = vpop.permute.xlu1 %596 }
  0x9e   : > { %8433 = vst [vmem:[#allocation62_spill] sm:$0xff] %v4987_v47  ;;  %v4989_v55 = vpop.permute.xlu0 %594 }
  0x9f   : > { %8434 = vst [vmem:[#allocation63_spill] sm:$0xff] %v4989_v55  ;;  %776 = vrot.lane.b32.xlu1 %v4459_v22, %s4344_s9 }
  0xa0   : > { %774 = vrot.lane.b32.xlu0 %v4465_v24, %s4344_s9 }
  0xa1   : > { %v4995_v0 = vpop.permute.xlu1 %600 }
  0xa2   : > { %8435 = vst [vmem:[#allocation64_spill] sm:$0xff] %v4995_v0  ;;  %v4997_v1 = vpop.permute.xlu0 %598 }
  0xa3   : > { %8436 = vst [vmem:[#allocation65_spill] sm:$0xff] %v4997_v1  ;;  %780 = vrot.lane.b32.xlu1 %v4480_v30, %s4344_s9 }
  0xa4   : > { %778 = vrot.lane.b32.xlu0 %v4486_v32, %s4344_s9 }
  0xa5   : > { %v5003_v27 = vpop.permute.xlu1 %604 }
  0xa6   : > { %8437 = vst [vmem:[#allocation66_spill] sm:$0xff] %v5003_v27  ;;  %v5005_v47 = vpop.permute.xlu0 %602 }
  0xa7   : > { %8438 = vst [vmem:[#allocation67_spill] sm:$0xff] %v5005_v47  ;;  %784 = vrot.lane.b32.xlu1 %v4502_v38, %s4344_s9 }
  0xa8   : > { %782 = vrot.lane.b32.xlu0 %v4508_v40, %s4344_s9 }
  0xa9   : > { %v5011_v55 = vpop.permute.xlu1 %608 }
  0xaa   : > { %8439 = vst [vmem:[#allocation68_spill] sm:$0xff] %v5011_v55  ;;  %v5013_v0 = vpop.permute.xlu0 %606 }
  0xab   : > { %8440 = vst [vmem:[#allocation69_spill] sm:$0xff] %v5013_v0  ;;  %788 = vrot.lane.b32.xlu1 %v4524_v46, %s4344_s9 }
  0xac   : > { %786 = vrot.lane.b32.xlu0 %v4530_v48, %s4344_s9 }
  0xad   : > { %v5019_v1 = vpop.permute.xlu1 %612 }
  0xae   : > { %8441 = vst [vmem:[#allocation70_spill] sm:$0xff] %v5019_v1  ;;  %v5021_v27 = vpop.permute.xlu0 %610 }
  0xaf   : > { %8442 = vst [vmem:[#allocation71_spill] sm:$0xff] %v5021_v27  ;;  %792 = vrot.lane.b32.xlu1 %v4546_v54, %s4344_s9 }
  0xb0   : > { %790 = vrot.lane.b32.xlu0 %v4552_v56, %s4344_s9 }
  0xb1   : > { %v5027_v47 = vpop.permute.xlu1 %616 }
  0xb2   : > { %8443 = vst [vmem:[#allocation72_spill] sm:$0xff] %v5027_v47  ;;  %v5029_v55 = vpop.permute.xlu0 %614 }
  0xb3   : > { %8444 = vst [vmem:[#allocation73_spill] sm:$0xff] %v5029_v55  ;;  %796 = vrot.lane.b32.xlu1 %v4568_v62, %s4344_s9 }
  0xb4   : > { %794 = vrot.lane.b32.xlu0 %v4574_v3, %s4344_s9 }
  0xb5   : > { %v5035_v0 = vpop.permute.xlu1 %620 }
  0xb6   : > { %8445 = vst [vmem:[#allocation74_spill] sm:$0xff] %v5035_v0  ;;  %v5037_v1 = vpop.permute.xlu0 %618 }
  0xb7   : > { %8446 = vst [vmem:[#allocation75_spill] sm:$0xff] %v5037_v1  ;;  %800 = vrot.lane.b32.xlu1 %v4590_v16, %s4344_s9 }
  0xb8   : > { %798 = vrot.lane.b32.xlu0 %v4596_v19, %s4344_s9 }
  0xb9   : > { %v5043_v27 = vpop.permute.xlu1 %624 }
  0xba   : > { %8447 = vst [vmem:[#allocation76_spill] sm:$0xff] %v5043_v27  ;;  %v5045_v47 = vpop.permute.xlu0 %622 }
  0xbb   : > { %8448 = vst [vmem:[#allocation77_spill] sm:$0xff] %v5045_v47  ;;  %804 = vrot.lane.b32.xlu1 %v4612_v34, %s4344_s9 }
  0xbc   : > { %802 = vrot.lane.b32.xlu0 %v4618_v37, %s4344_s9  ;;  %v5212_v37 = vld [vmem:[%s4409_s29 + $0x190] sm:$0x3] }
  0xbd   : > { %v5051_v55 = vpop.permute.xlu1 %628 }
  0xbe   : > { %v5053_v0 = vpop.permute.xlu0 %626 }
  0xbf   : > { %808 = vrot.lane.b32.xlu1 %v4634_v53, %s4344_s9  ;;  %v8494_v53 = vld [vmem:[#allocation32_spill] sm:$0xff] }
  0xc0   : > { %806 = vrot.lane.b32.xlu0 %v4640_v59, %s4344_s9 }
  0xc1   : > { %v5059_v1 = vpop.permute.xlu1 %632 }
  0xc2   : > { %v5061_v47 = vpop.permute.xlu0 %630 }
  0xc3   : > { %812 = vrot.lane.b32.xlu1 %v4656_v26, %s4344_s9 }
  0xc4   : > { %810 = vrot.lane.b32.xlu0 %v4662_v50, %s4344_s9  ;;  %v5092_v50 = vld [vmem:[%s4409_s29 + $0x188] sm:$0xff] }
  0xc5   : > { %v5067_v27 = vpop.permute.xlu1 %636 }
  0xc6   : > { %v5069_v45 = vpop.permute.xlu0 %634 }
  0xc7   : > { %816 = vrot.lane.b32.xlu1 %v4678_v20, %s4344_s9 }
  0xc8   : > { %814 = vrot.lane.b32.xlu0 %v4684_v13, %s4344_s9 }
  0xc9   : > { %v5075_v61 = vpop.permute.xlu1 %672 }
  0xca   : > { %8449 = vst [vmem:[#allocation78_spill] sm:$0xff] %v5075_v61  ;;  %v5077_v29 = vpop.permute.xlu0 %670 }
  0xcb   : > { %8450 = vst [vmem:[#allocation79_spill] sm:$0xff] %v5077_v29  ;;  %820 = vrot.lane.b32.xlu1 %v4700_v60, %s4344_s9  ;;  %v5097_v29 = vld [vmem:[%s4409_s29 + $0x180] sm:$0xff] }
  0xcc   : > { %818 = vrot.lane.b32.xlu0 %v4706_v42, %s4344_s9 }
  0xcd   : > { %v5083_v18 = vpop.permute.xlu1 %676 }
  0xce   : > { %8451 = vst [vmem:[#allocation80_spill] sm:$0xff] %v5083_v18  ;;  %v5085_v39 = vpop.permute.xlu0 %674 }
  0xcf   : > { %8452 = vst [vmem:[#allocation81_spill] sm:$0xff] %v5085_v39  ;;  %824 = vrot.lane.b32.xlu1 %v4722_v49, %s4344_s9 }
  0xd0   : > { %822 = vrot.lane.b32.xlu0 %v4728_v8, %s4344_s9 }
  0xd1   : > { %v5094_v61 = vpop.permute.xlu1 %680 }
  0xd2   : > { %8453 = vst [vmem:[#allocation82_spill] sm:$0xff] %v5094_v61  ;;  %v5099_v26 = vpop.permute.xlu0 %678 }
  0xd3   : > { %8454 = vst [vmem:[#allocation83_spill] sm:$0xff] %v5099_v26  ;;  %828 = vrot.lane.b32.xlu1 %v5092_v50, %s4344_s9 }
  0xd4   : > { %826 = vrot.lane.b32.xlu0 %v5097_v29, %s4344_s9 }
  0xd5   : > { %v5105_v18 = vpop.permute.xlu1 %684 }
  0xd6   : > { %8455 = vst [vmem:[#allocation84_spill] sm:$0xff] %v5105_v18  ;;  %v5107_v39 = vpop.permute.xlu0 %682 }
  0xd7   : > { %8456 = vst [vmem:[#allocation85_spill] sm:$0xff] %v5107_v39  ;;  %864 = vrot.lane.b32.xlu1 %v4452_v17, %s4345_s10  ;;  %v8461_v17 = vld [vmem:[#allocation5_spill] sm:$0xff] }
  0xd8   : > { %862 = vrot.lane.b32.xlu0 %v4438_v12, %s4345_s10 }
  0xd9   : > { %v5113_v61 = vpop.permute.xlu1 %688 }
  0xda   : > { %8457 = vst [vmem:[#allocation86_spill] sm:$0xff] %v5113_v61  ;;  %v5115_v26 = vpop.permute.xlu0 %686 }
  0xdb   : > { %8458 = vst [vmem:[#allocation87_spill] sm:$0xff] %v5115_v26  ;;  %868 = vrot.lane.b32.xlu1 %v4471_v25, %s4345_s10  ;;  %v8464_v26 = vld [vmem:[#allocation6_spill] sm:$0xff]  ;;  %v8465_v25 = vld [vmem:[#allocation7_spill] sm:$0xff] }
  0xdc   : > { %866 = vrot.lane.b32.xlu0 %v4476_v28, %s4345_s10 }
  0xdd   : > { %v5121_v18 = vpop.permute.xlu1 %692 }
  0xde   : > { %8459 = vst [vmem:[#allocation88_spill] sm:$0xff] %v5121_v18  ;;  %v5123_v39 = vpop.permute.xlu0 %690 }
  0xdf   : > { %8460 = vst [vmem:[#allocation89_spill] sm:$0xff] %v5123_v39  ;;  %872 = vrot.lane.b32.xlu1 %v4493_v33, %s4345_s10  ;;  %v8468_v39 = vld [vmem:[#allocation8_spill] sm:$0xff]  ;;  %v8469_v33 = vld [vmem:[#allocation9_spill] sm:$0xff] }
  0xe0   : > { %870 = vrot.lane.b32.xlu0 %v8461_v17, %s4345_s10 }
  0xe1   : > { %v5129_v12 = vpop.permute.xlu1 %696 }
  0xe2   : > { %8462 = vst [vmem:[#allocation90_spill] sm:$0xff] %v5129_v12  ;;  %v5131_v61 = vpop.permute.xlu0 %694 }
  0xe3   : > { %8463 = vst [vmem:[#allocation91_spill] sm:$0xff] %v5131_v61  ;;  %876 = vrot.lane.b32.xlu1 %v8464_v26, %s4345_s10  ;;  %v8472_v61 = vld [vmem:[#allocation10_spill] sm:$0xff]  ;;  %v8473_v26 = vld [vmem:[#allocation11_spill] sm:$0xff] }
  0xe4   : > { %874 = vrot.lane.b32.xlu0 %v8465_v25, %s4345_s10 }
  0xe5   : > { %v5137_v28 = vpop.permute.xlu1 %700 }
  0xe6   : > { %8466 = vst [vmem:[#allocation92_spill] sm:$0xff] %v5137_v28  ;;  %v5139_v18 = vpop.permute.xlu0 %698 }
  0xe7   : > { %8467 = vst [vmem:[#allocation93_spill] sm:$0xff] %v5139_v18  ;;  %880 = vrot.lane.b32.xlu1 %v8468_v39, %s4345_s10  ;;  %v8476_v18 = vld [vmem:[#allocation12_spill] sm:$0xff]  ;;  %v8477_v39 = vld [vmem:[#allocation13_spill] sm:$0xff] }
  0xe8   : > { %878 = vrot.lane.b32.xlu0 %v8469_v33, %s4345_s10 }
  0xe9   : > { %v5145_v17 = vpop.permute.xlu1 %704 }
  0xea   : > { %8470 = vst [vmem:[#allocation94_spill] sm:$0xff] %v5145_v17  ;;  %v5147_v12 = vpop.permute.xlu0 %702 }
  0xeb   : > { %8471 = vst [vmem:[#allocation95_spill] sm:$0xff] %v5147_v12  ;;  %884 = vrot.lane.b32.xlu1 %v8472_v61, %s4345_s10  ;;  %v8480_v12 = vld [vmem:[#allocation16_spill] sm:$0xff]  ;;  %v8481_v61 = vld [vmem:[#allocation17_spill] sm:$0xff] }
  0xec   : > { %882 = vrot.lane.b32.xlu0 %v8473_v26, %s4345_s10 }
  0xed   : > { %v5153_v25 = vpop.permute.xlu1 %708 }
  0xee   : > { %8474 = vst [vmem:[#allocation96_spill] sm:$0xff] %v5153_v25  ;;  %v5155_v28 = vpop.permute.xlu0 %706 }
  0xef   : > { %8475 = vst [vmem:[#allocation97_spill] sm:$0xff] %v5155_v28  ;;  %888 = vrot.lane.b32.xlu1 %v8476_v18, %s4345_s10  ;;  %v8484_v28 = vld [vmem:[#allocation20_spill] sm:$0xff]  ;;  %v8485_v18 = vld [vmem:[#allocation21_spill] sm:$0xff] }
  0xf0   : > { %886 = vrot.lane.b32.xlu0 %v8477_v39, %s4345_s10 }
  0xf1   : > { %v5161_v33 = vpop.permute.xlu1 %712 }
  0xf2   : > { %8478 = vst [vmem:[#allocation98_spill] sm:$0xff] %v5161_v33  ;;  %v5163_v17 = vpop.permute.xlu0 %710 }
  0xf3   : > { %8479 = vst [vmem:[#allocation99_spill] sm:$0xff] %v5163_v17  ;;  %892 = vrot.lane.b32.xlu1 %v8480_v12, %s4345_s10  ;;  %v8488_v17 = vld [vmem:[#allocation24_spill] sm:$0xff]  ;;  %v8492_v12 = vld [vmem:[#allocation30_spill] sm:$0xff] }
  0xf4   : > { %890 = vrot.lane.b32.xlu0 %v8481_v61, %s4345_s10  ;;  %v8489_v61 = vld [vmem:[#allocation25_spill] sm:$0xff] }
  0xf5   : > { %v5169_v26 = vpop.permute.xlu1 %716 }
  0xf6   : > { %8482 = vst [vmem:[#allocation100_spill] sm:$0xff] %v5169_v26  ;;  %v5171_v25 = vpop.permute.xlu0 %714 }
  0xf7   : > { %8483 = vst [vmem:[#allocation101_spill] sm:$0xff] %v5171_v25  ;;  %896 = vrot.lane.b32.xlu1 %v8484_v28, %s4345_s10  ;;  %v8490_v28 = vld [vmem:[#allocation28_spill] sm:$0xff] }
  0xf8   : > { %894 = vrot.lane.b32.xlu0 %v8485_v18, %s4345_s10  ;;  %v8491_v18 = vld [vmem:[#allocation29_spill] sm:$0xff] }
  0xf9   : > { %v5177_v39 = vpop.permute.xlu1 %720 }
  0xfa   : > { %8486 = vst [vmem:[#allocation102_spill] sm:$0xff] %v5177_v39  ;;  %v5179_v33 = vpop.permute.xlu0 %718 }
  0xfb   : > { %8487 = vst [vmem:[#allocation103_spill] sm:$0xff] %v5179_v33  ;;  %900 = vrot.lane.b32.xlu1 %v8488_v17, %s4345_s10  ;;  %v8493_v17 = vld [vmem:[#allocation31_spill] sm:$0xff] }
  0xfc   : > { %898 = vrot.lane.b32.xlu0 %v8489_v61, %s4345_s10 }
  0xfd   : > { %v5185_v26 = vpop.permute.xlu1 %724 }
  0xfe   : > { %v5187_v25 = vpop.permute.xlu0 %722 }
  0xff   : > { %904 = vrot.lane.b32.xlu1 %v8490_v28, %s4345_s10  ;;  %v8495_v28 = vld [vmem:[#allocation33_spill] sm:$0xff] }
 0x100   : > { %902 = vrot.lane.b32.xlu0 %v8491_v18, %s4345_s10 }
 0x101   : > { %v5193_v39 = vpop.permute.xlu1 %728 }
 0x102   : > { %v5195_v33 = vpop.permute.xlu0 %726 }
 0x103   : > { %908 = vrot.lane.b32.xlu1 %v8492_v12, %s4345_s10  ;;  %v554_v12 = vrot.slane %v5212_v37, 1 }
 0x104   : > { %906 = vrot.lane.b32.xlu0 %v8493_v17, %s4345_s10  ;;  %v552_v17 = vrot.slane %v5092_v50, 1 }
 0x105   : > { %v5201_v61 = vpop.permute.xlu1 %732 }
 0x106   : > { %v5203_v59 = vpop.permute.xlu0 %730 }
 0x107   : > { %912 = vrot.lane.b32.xlu1 %v8494_v53, %s4345_s10  ;;  %v551_v53 = vrot.slane %v5097_v29, 1 }
 0x108   : > { %910 = vrot.lane.b32.xlu0 %v8495_v28, %s4345_s10 }
 0x109   : > { %v5209_v18 = vpop.permute.xlu1 %768 }
 0x10a   : > { %8496 = vst [vmem:[#allocation104_spill] sm:$0xff] %v5209_v18  ;;  %v5214_v34 = vpop.permute.xlu0 %766  ;;  %v8500_v18 = vld [vmem:[#allocation37_spill] sm:$0xff] }
 0x10b   : > { %8497 = vst [vmem:[#allocation105_spill] sm:$0xff] %v5214_v34  ;;  %916 = vrot.lane.b32.xlu1 %v4735_v21, %s4345_s10  ;;  %v5232_v34 = vsel %vm386_vm0, %v552_v17, %v554_v12 }
 0x10c   : > { %914 = vrot.lane.b32.xlu0 %v4740_v9, %s4345_s10  ;;  %8501 = vst [vmem:[#allocation108_spill] sm:$0xff] %v5232_v34  ;;  %v5237_v9 = vsel %vm386_vm0, %v551_v53, %v552_v17 }
 0x10d   : > { %v5223_v19 = vpop.permute.xlu1 %772  ;;  %8503 = vst [vmem:[#allocation110_spill] sm:$0xff] %v5237_v9 }
 0x10e   : > { %8498 = vst [vmem:[#allocation106_spill] sm:$0xff] %v5223_v19  ;;  %v5225_v28 = vpop.permute.xlu0 %770 }
 0x10f   : > { %8499 = vst [vmem:[#allocation107_spill] sm:$0xff] %v5225_v28  ;;  %920 = vrot.lane.b32.xlu1 %v4748_v57, %s4345_s10 }
 0x110   : > { %918 = vrot.lane.b32.xlu0 %v8500_v18, %s4345_s10 }
 0x111   : > { %v5234_v21 = vpop.permute.xlu1 %776 }
 0x112   : > { %8502 = vst [vmem:[#allocation109_spill] sm:$0xff] %v5234_v21  ;;  %v5239_v16 = vpop.permute.xlu0 %774 }
 0x113   : > { %8504 = vst [vmem:[#allocation111_spill] sm:$0xff] %v5239_v16  ;;  %924 = vrot.lane.b32.xlu1 %v5232_v34, %s4345_s10 }
 0x114   : > { %922 = vrot.lane.b32.xlu0 %v5237_v9, %s4345_s10 }
 0x115   : > { %v5245_v19 = vpop.permute.xlu1 %780 }
 0x116   : > { %8505 = vst [vmem:[#allocation112_spill] sm:$0xff] %v5245_v19  ;;  %v5247_v28 = vpop.permute.xlu0 %778 }
 0x117   : > { %8506 = vst [vmem:[#allocation113_spill] sm:$0xff] %v5247_v28  ;;  %960 = vrot.lane.b32.xlu1 %v4768_v2, %s4346_s11  ;;  %v8511_v2 = vld [vmem:[#allocation38_spill] sm:$0xff] }
 0x118   : > { %958 = vrot.lane.b32.xlu0 %v4773_v36, %s4346_s11 }
 0x119   : > { %v5253_v53 = vpop.permute.xlu1 %784 }
 0x11a   : > { %8507 = vst [vmem:[#allocation114_spill] sm:$0xff] %v5253_v53  ;;  %v5255_v17 = vpop.permute.xlu0 %782 }
 0x11b   : > { %8508 = vst [vmem:[#allocation115_spill] sm:$0xff] %v5255_v17  ;;  %964 = vrot.lane.b32.xlu1 %v4781_v43, %s4346_s11  ;;  %v8514_v17 = vld [vmem:[#allocation39_spill] sm:$0xff] }
 0x11c   : > { %962 = vrot.lane.b32.xlu0 %v4786_v14, %s4346_s11 }
 0x11d   : > { %v5261_v12 = vpop.permute.xlu1 %788 }
 0x11e   : > { %8509 = vst [vmem:[#allocation116_spill] sm:$0xff] %v5261_v12  ;;  %v5263_v19 = vpop.permute.xlu0 %786 }
 0x11f   : > { %8510 = vst [vmem:[#allocation117_spill] sm:$0xff] %v5263_v19  ;;  %968 = vrot.lane.b32.xlu1 %v4794_v5, %s4346_s11  ;;  %v8517_v19 = vld [vmem:[#allocation40_spill] sm:$0xff] }
 0x120   : > { %966 = vrot.lane.b32.xlu0 %v8511_v2, %s4346_s11 }
 0x121   : > { %v5269_v36 = vpop.permute.xlu1 %792 }
 0x122   : > { %8512 = vst [vmem:[#allocation38_spill] sm:$0xff] %v5269_v36  ;;  %v5271_v53 = vpop.permute.xlu0 %790 }
 0x123   : > { %8513 = vst [vmem:[#allocation118_spill] sm:$0xff] %v5271_v53  ;;  %972 = vrot.lane.b32.xlu1 %v4807_v51, %s4346_s11  ;;  %v8520_v53 = vld [vmem:[#allocation41_spill] sm:$0xff] }
 0x124   : > { %970 = vrot.lane.b32.xlu0 %v8514_v17, %s4346_s11 }
 0x125   : > { %v5277_v21 = vpop.permute.xlu1 %796 }
 0x126   : > { %8515 = vst [vmem:[#allocation39_spill] sm:$0xff] %v5277_v21  ;;  %v5279_v12 = vpop.permute.xlu0 %794 }
 0x127   : > { %8516 = vst [vmem:[#allocation119_spill] sm:$0xff] %v5279_v12  ;;  %976 = vrot.lane.b32.xlu1 %v4820_v6, %s4346_s11  ;;  %v8523_v12 = vld [vmem:[#allocation42_spill] sm:$0xff] }
 0x128   : > { %974 = vrot.lane.b32.xlu0 %v8517_v19, %s4346_s11 }
 0x129   : > { %v5285_v28 = vpop.permute.xlu1 %800 }
 0x12a   : > { %8518 = vst [vmem:[#allocation40_spill] sm:$0xff] %v5285_v28  ;;  %v5287_v36 = vpop.permute.xlu0 %798 }
 0x12b   : > { %8519 = vst [vmem:[#allocation120_spill] sm:$0xff] %v5287_v36  ;;  %980 = vrot.lane.b32.xlu1 %v4833_v4, %s4346_s11  ;;  %v8526_v36 = vld [vmem:[#allocation43_spill] sm:$0xff] }
 0x12c   : > { %978 = vrot.lane.b32.xlu0 %v8520_v53, %s4346_s11 }
 0x12d   : > { %v5293_v16 = vpop.permute.xlu1 %804 }
 0x12e   : > { %8521 = vst [vmem:[#allocation41_spill] sm:$0xff] %v5293_v16  ;;  %v5295_v21 = vpop.permute.xlu0 %802 }
 0x12f   : > { %8522 = vst [vmem:[#allocation121_spill] sm:$0xff] %v5295_v21  ;;  %984 = vrot.lane.b32.xlu1 %v4846_v52, %s4346_s11  ;;  %v8529_v21 = vld [vmem:[#allocation45_spill] sm:$0xff] }
 0x130   : > { %982 = vrot.lane.b32.xlu0 %v8523_v12, %s4346_s11 }
 0x131   : > { %v5301_v9 = vpop.permute.xlu1 %808 }
 0x132   : > { %8524 = vst [vmem:[#allocation42_spill] sm:$0xff] %v5301_v9  ;;  %v5303_v28 = vpop.permute.xlu0 %806 }
 0x133   : > { %8525 = vst [vmem:[#allocation122_spill] sm:$0xff] %v5303_v28  ;;  %988 = vrot.lane.b32.xlu1 %v4859_v10, %s4346_s11  ;;  %v1369_v28 = vsel %vm1342_vm2, %v4684_v13, %v5053_v0  ;;  %v1372_v0 = vsel %vm1342_vm2, %v4700_v60, %v5059_v1 }
 0x134   : > { %986 = vrot.lane.b32.xlu0 %v8526_v36, %s4346_s11  ;;  %v1402_v57 = vsel %vm1375_vm3, %v1369_v28, %v5187_v25  ;;  %v1371_v25 = vsel %vm1342_vm2, %v4706_v42, %v5061_v47  ;;  %v1405_v28 = vsel %vm1375_vm3, %v1372_v0, %v5193_v39  ;;  %v1374_v47 = vsel %vm1342_vm2, %v4722_v49, %v5067_v27  ;;  %v8535_v39 = vld [vmem:[#allocation50_spill] sm:$0xff] }
 0x135   : > { %v5309_v34 = vpop.permute.xlu1 %812 }
 0x136   : > { %8527 = vst [vmem:[#allocation43_spill] sm:$0xff] %v5309_v34  ;;  %v5311_v16 = vpop.permute.xlu0 %810  ;;  %v1370_v34 = vsel %vm1342_vm2, %v4678_v20, %v5051_v55 }
 0x137   : > { %8528 = vst [vmem:[#allocation123_spill] sm:$0xff] %v5311_v16  ;;  %992 = vrot.lane.b32.xlu1 %v4872_v7, %s4346_s11  ;;  %v8532_v16 = vld [vmem:[#allocation47_spill] sm:$0xff] }
 0x138   : > { %990 = vrot.lane.b32.xlu0 %v8529_v21, %s4346_s11 }
 0x139   : > { %v5317_v18 = vpop.permute.xlu1 %816 }
 0x13a   : > { %8530 = vst [vmem:[#allocation45_spill] sm:$0xff] %v5317_v18  ;;  %v5319_v9 = vpop.permute.xlu0 %814  ;;  %v1403_v18 = vsel %vm1375_vm3, %v1370_v34, %v5185_v26  ;;  %v8534_v34 = vld [vmem:[#allocation49_spill] sm:$0xff] }
 0x13b   : > { %8531 = vst [vmem:[#allocation124_spill] sm:$0xff] %v5319_v9  ;;  %996 = vrot.lane.b32.xlu1 %v4885_v41, %s4346_s11 }
 0x13c   : > { %994 = vrot.lane.b32.xlu0 %v8532_v16, %s4346_s11  ;;  %v8533_v16 = vld [vmem:[#allocation48_spill] sm:$0xff] }
 0x13d   : > { %v821_v9 = vpop.permute.xlu1 %820 }
 0x13e   : > { %v5336_v41 = vsel %vm1408_vm4, %v1403_v18, %v821_v9  ;;  %v819_v55 = vpop.permute.xlu0 %818 }
 0x13f   : > { %v5339_v7 = vsel %vm1408_vm4, %v1402_v57, %v819_v55  ;;  %1000 = vrot.lane.b32.xlu1 %v8533_v16, %s4346_s11  ;;  %v1404_v57 = vsel %vm1375_vm3, %v1371_v25, %v5195_v33  ;;  %v1373_v33 = vsel %vm1342_vm2, %v4728_v8, %v5069_v45  ;;  %v1407_v55 = vsel %vm1375_vm3, %v1374_v47, %v5201_v61 }
 0x140   : > { %998 = vrot.lane.b32.xlu0 %v8534_v34, %s4346_s11  ;;  %v1406_v25 = vsel %vm1375_vm3, %v1373_v33, %v5203_v59  ;;  %v557_v59 = vrot.slane %v5092_v50, 2  ;;  %v556_v47 = vrot.slane %v5097_v29, 2 }
 0x141   : > { %v825_v9 = vpop.permute.xlu1 %824 }
 0x142   : > { %v5356_v26 = vsel %vm1408_vm4, %v1405_v28, %v825_v9  ;;  %v823_v18 = vpop.permute.xlu0 %822 }
 0x143   : > { %v5359_v1 = vsel %vm1408_vm4, %v1404_v57, %v823_v18  ;;  %1004 = vrot.lane.b32.xlu1 %v4911_v23, %s4346_s11  ;;  %v8536_v57 = vld [vmem:[#allocation52_spill] sm:$0xff]  ;;  %v559_v18 = vrot.slane %v5212_v37, 2 }
 0x144   : > { %1002 = vrot.lane.b32.xlu0 %v8535_v39, %s4346_s11 }
 0x145   : > { %v829_v0 = vpop.permute.xlu1 %828 }
 0x146   : > { %v5376_v28 = vsel %vm1408_vm4, %v1407_v55, %v829_v0  ;;  %v827_v9 = vpop.permute.xlu0 %826  ;;  %v5405_v0 = vsel %vm467_vm1, %v557_v59, %v559_v18 }
 0x147   : > { %v5379_v27 = vsel %vm1408_vm4, %v1406_v25, %v827_v9  ;;  %1008 = vrot.lane.b32.xlu1 %v4924_v31, %s4346_s11  ;;  %v5410_v9 = vsel %vm467_vm1, %v556_v47, %v557_v59 }
 0x148   : > { %1006 = vrot.lane.b32.xlu0 %v8536_v57, %s4346_s11 }
 0x149   : > { %v5385_v45 = vpop.permute.xlu1 %864 }
 0x14a   : > { %8537 = vst [vmem:[#allocation48_spill] sm:$0xff] %v5385_v45  ;;  %v5387_v61 = vpop.permute.xlu0 %862 }
 0x14b   : > { %1012 = vrot.lane.b32.xlu1 %v4941_v35, %s4346_s11 }
 0x14c   : > { %1010 = vrot.lane.b32.xlu0 %v4948_v63, %s4346_s11 }
 0x14d   : > { %v5396_v33 = vpop.permute.xlu1 %868 }
 0x14e   : > { %8538 = vst [vmem:[#allocation49_spill] sm:$0xff] %v5396_v33  ;;  %v5398_v55 = vpop.permute.xlu0 %866 }
 0x14f   : > { %1016 = vrot.lane.b32.xlu1 %v4958_v58, %s4346_s11 }
 0x150   : > { %1014 = vrot.lane.b32.xlu0 %v4963_v44, %s4346_s11 }
 0x151   : > { %v5407_v25 = vpop.permute.xlu1 %872 }
 0x152   : > { %v5412_v37 = vpop.permute.xlu0 %870 }
 0x153   : > { %1020 = vrot.lane.b32.xlu1 %v5405_v0, %s4346_s11 }
 0x154   : > { %1018 = vrot.lane.b32.xlu0 %v5410_v9, %s4346_s11 }
 0x155   : > { %v5418_v33 = vpop.permute.xlu1 %876 }
 0x156   : > { %8539 = vst [vmem:[#allocation50_spill] sm:$0xff] %v5418_v33  ;;  %v5420_v45 = vpop.permute.xlu0 %874 }
 0x157   : > { %1056 = vrot.lane.b32.xlu1 %v4435_v11, %s4347_s12 }
 0x158   : > { %1054 = vrot.lane.b32.xlu0 %v4445_v15, %s4347_s12 }
 0x159   : > { %v5426_v59 = vpop.permute.xlu1 %880 }
 0x15a   : > { %8540 = vst [vmem:[#allocation52_spill] sm:$0xff] %v5426_v59  ;;  %v5428_v18 = vpop.permute.xlu0 %878 }
 0x15b   : > { %1060 = vrot.lane.b32.xlu1 %v4459_v22, %s4347_s12 }
 0x15c   : > { %1058 = vrot.lane.b32.xlu0 %v4465_v24, %s4347_s12 }
 0x15d   : > { %v5434_v47 = vpop.permute.xlu1 %884 }
 0x15e   : > { %8541 = vst [vmem:[#allocation125_spill] sm:$0xff] %v5434_v47  ;;  %v5436_v33 = vpop.permute.xlu0 %882  ;;  %v8570_v47 = vld [vmem:[#allocation5_spill] sm:$0xff] }
 0x15f   : > { %8542 = vst [vmem:[#allocation126_spill] sm:$0xff] %v5436_v33  ;;  %1064 = vrot.lane.b32.xlu1 %v4480_v30, %s4347_s12  ;;  %v8573_v33 = vld [vmem:[#allocation6_spill] sm:$0xff] }
 0x160   : > { %1062 = vrot.lane.b32.xlu0 %v4486_v32, %s4347_s12 }
 0x161   : > { %v5442_v11 = vpop.permute.xlu1 %888 }
 0x162   : > { %8543 = vst [vmem:[#allocation127_spill] sm:$0xff] %v5442_v11  ;;  %v5444_v15 = vpop.permute.xlu0 %886 }
 0x163   : > { %8544 = vst [vmem:[#allocation128_spill] sm:$0xff] %v5444_v15  ;;  %1068 = vrot.lane.b32.xlu1 %v4502_v38, %s4347_s12 }
 0x164   : > { %1066 = vrot.lane.b32.xlu0 %v4508_v40, %s4347_s12 }
 0x165   : > { %v5450_v22 = vpop.permute.xlu1 %892 }
 0x166   : > { %8545 = vst [vmem:[#allocation129_spill] sm:$0xff] %v5450_v22  ;;  %v5452_v24 = vpop.permute.xlu0 %890  ;;  %v8567_v22 = vld [vmem:[#allocation3_spill] sm:$0xff] }
 0x167   : > { %8546 = vst [vmem:[#allocation130_spill] sm:$0xff] %v5452_v24  ;;  %1072 = vrot.lane.b32.xlu1 %v4524_v46, %s4347_s12  ;;  %v8569_v24 = vld [vmem:[#allocation4_spill] sm:$0xff] }
 0x168   : > { %1070 = vrot.lane.b32.xlu0 %v4530_v48, %s4347_s12 }
 0x169   : > { %v5458_v30 = vpop.permute.xlu1 %896 }
 0x16a   : > { %8547 = vst [vmem:[#allocation131_spill] sm:$0xff] %v5458_v30  ;;  %v5460_v32 = vpop.permute.xlu0 %894  ;;  %v8553_v30 = vld [vmem:[#allocation14_spill] sm:$0xff] }
 0x16b   : > { %8548 = vst [vmem:[#allocation132_spill] sm:$0xff] %v5460_v32  ;;  %1076 = vrot.lane.b32.xlu1 %v4546_v54, %s4347_s12  ;;  %v8554_v54 = vld [vmem:[#allocation15_spill] sm:$0xff] }
 0x16c   : > { %1074 = vrot.lane.b32.xlu0 %v4552_v56, %s4347_s12 }
 0x16d   : > { %v5466_v38 = vpop.permute.xlu1 %900 }
 0x16e   : > { %8549 = vst [vmem:[#allocation133_spill] sm:$0xff] %v5466_v38  ;;  %v5468_v40 = vpop.permute.xlu0 %898 }
 0x16f   : > { %8550 = vst [vmem:[#allocation134_spill] sm:$0xff] %v5468_v40  ;;  %1080 = vrot.lane.b32.xlu1 %v4568_v62, %s4347_s12  ;;  %v8557_v40 = vld [vmem:[#allocation18_spill] sm:$0xff]  ;;  %v8558_v62 = vld [vmem:[#allocation19_spill] sm:$0xff] }
 0x170   : > { %1078 = vrot.lane.b32.xlu0 %v4574_v3, %s4347_s12 }
 0x171   : > { %v5474_v46 = vpop.permute.xlu1 %904 }
 0x172   : > { %8551 = vst [vmem:[#allocation135_spill] sm:$0xff] %v5474_v46  ;;  %v5476_v48 = vpop.permute.xlu0 %902 }
 0x173   : > { %8552 = vst [vmem:[#allocation136_spill] sm:$0xff] %v5476_v48  ;;  %1084 = vrot.lane.b32.xlu1 %v8553_v30, %s4347_s12  ;;  %v8561_v48 = vld [vmem:[#allocation22_spill] sm:$0xff]  ;;  %v8562_v30 = vld [vmem:[#allocation23_spill] sm:$0xff] }
 0x174   : > { %1082 = vrot.lane.b32.xlu0 %v8554_v54, %s4347_s12 }
 0x175   : > { %v5482_v56 = vpop.permute.xlu1 %908 }
 0x176   : > { %8555 = vst [vmem:[#allocation14_spill] sm:$0xff] %v5482_v56  ;;  %v5484_v38 = vpop.permute.xlu0 %906 }
 0x177   : > { %8556 = vst [vmem:[#allocation15_spill] sm:$0xff] %v5484_v38  ;;  %1088 = vrot.lane.b32.xlu1 %v8557_v40, %s4347_s12  ;;  %v8563_v38 = vld [vmem:[#allocation26_spill] sm:$0xff]  ;;  %v8564_v40 = vld [vmem:[#allocation27_spill] sm:$0xff] }
 0x178   : > { %1086 = vrot.lane.b32.xlu0 %v8558_v62, %s4347_s12 }
 0x179   : > { %v5490_v3 = vpop.permute.xlu1 %912 }
 0x17a   : > { %8559 = vst [vmem:[#allocation18_spill] sm:$0xff] %v5490_v3  ;;  %v5492_v46 = vpop.permute.xlu0 %910  ;;  %v5544_v3 = vld [vmem:[%s4409_s29 + $0x198] sm:$0xff] }
 0x17b   : > { %8560 = vst [vmem:[#allocation19_spill] sm:$0xff] %v5492_v46  ;;  %1092 = vrot.lane.b32.xlu1 %v8561_v48, %s4347_s12 }
 0x17c   : > { %1090 = vrot.lane.b32.xlu0 %v8562_v30, %s4347_s12 }
 0x17d   : > { %v5498_v54 = vpop.permute.xlu1 %916 }
 0x17e   : > { %v5500_v56 = vpop.permute.xlu0 %914 }
 0x17f   : > { %1096 = vrot.lane.b32.xlu1 %v8563_v38, %s4347_s12 }
 0x180   : > { %1094 = vrot.lane.b32.xlu0 %v8564_v40, %s4347_s12 }
 0x181   : > { %v5506_v62 = vpop.permute.xlu1 %920 }
 0x182   : > { %v5508_v46 = vpop.permute.xlu0 %918 }
 0x183   : > { %1100 = vrot.lane.b32.xlu1 %v4678_v20, %s4347_s12 }
 0x184   : > { %1098 = vrot.lane.b32.xlu0 %v4684_v13, %s4347_s12 }
 0x185   : > { %v5514_v48 = vpop.permute.xlu1 %924 }
 0x186   : > { %v5516_v30 = vpop.permute.xlu0 %922 }
 0x187   : > { %1104 = vrot.lane.b32.xlu1 %v4700_v60, %s4347_s12  ;;  %v5539_v60 = vld [vmem:[%s4409_s29 + $0x1a0] sm:$0xff] }
 0x188   : > { %1102 = vrot.lane.b32.xlu0 %v4706_v42, %s4347_s12 }
 0x189   : > { %v5522_v38 = vpop.permute.xlu1 %960 }
 0x18a   : > { %v5524_v40 = vpop.permute.xlu0 %958 }
 0x18b   : > { %1108 = vrot.lane.b32.xlu1 %v4722_v49, %s4347_s12 }
 0x18c   : > { %1106 = vrot.lane.b32.xlu0 %v4728_v8, %s4347_s12 }
 0x18d   : > { %v5530_v20 = vpop.permute.xlu1 %964 }
 0x18e   : > { %v5532_v13 = vpop.permute.xlu0 %962 }
 0x18f   : > { %1112 = vrot.lane.b32.xlu1 %v5092_v50, %s4347_s12 }
 0x190   : > { %1110 = vrot.lane.b32.xlu0 %v5097_v29, %s4347_s12  ;;  %v8566_v29 = vld [vmem:[#allocation2_spill] sm:$0xff] }
 0x191   : > { %v5541_v42 = vpop.permute.xlu1 %968 }
 0x192   : > { %v5546_v49 = vpop.permute.xlu0 %966 }
 0x193   : > { %1116 = vrot.lane.b32.xlu1 %v5539_v60, %s4347_s12 }
 0x194   : > { %1114 = vrot.lane.b32.xlu0 %v5544_v3, %s4347_s12 }
 0x195   : > { %v5552_v8 = vpop.permute.xlu1 %972 }
 0x196   : > { %8565 = vst [vmem:[#allocation22_spill] sm:$0xff] %v5552_v8  ;;  %v5554_v50 = vpop.permute.xlu0 %970  ;;  %v8577_v8 = vld [vmem:[#allocation8_spill] sm:$0xff] }
 0x197   : > { %1152 = vrot.lane.b32.xlu1 %v8566_v29, %s4348_s13  ;;  %v8574_v29 = vld [vmem:[#allocation7_spill] sm:$0xff] }
 0x198   : > { %1150 = vrot.lane.b32.xlu0 %v8567_v22, %s4348_s13 }
 0x199   : > { %v5560_v32 = vpop.permute.xlu1 %976 }
 0x19a   : > { %8568 = vst [vmem:[#allocation23_spill] sm:$0xff] %v5560_v32  ;;  %v5562_v11 = vpop.permute.xlu0 %974 }
 0x19b   : > { %1156 = vrot.lane.b32.xlu1 %v8569_v24, %s4348_s13  ;;  %v8578_v24 = vld [vmem:[#allocation9_spill] sm:$0xff] }
 0x19c   : > { %1154 = vrot.lane.b32.xlu0 %v8570_v47, %s4348_s13 }
 0x19d   : > { %v5568_v15 = vpop.permute.xlu1 %980 }
 0x19e   : > { %8571 = vst [vmem:[#allocation26_spill] sm:$0xff] %v5568_v15  ;;  %v5570_v59 = vpop.permute.xlu0 %978 }
 0x19f   : > { %8572 = vst [vmem:[#allocation27_spill] sm:$0xff] %v5570_v59  ;;  %1160 = vrot.lane.b32.xlu1 %v8573_v33, %s4348_s13  ;;  %v8581_v59 = vld [vmem:[#allocation10_spill] sm:$0xff]  ;;  %v8582_v33 = vld [vmem:[#allocation11_spill] sm:$0xff] }
 0x1a0   : > { %1158 = vrot.lane.b32.xlu0 %v8574_v29, %s4348_s13 }
 0x1a1   : > { %v5576_v22 = vpop.permute.xlu1 %984 }
 0x1a2   : > { %8575 = vst [vmem:[#allocation2_spill] sm:$0xff] %v5576_v22  ;;  %v5578_v32 = vpop.permute.xlu0 %982 }
 0x1a3   : > { %8576 = vst [vmem:[#allocation3_spill] sm:$0xff] %v5578_v32  ;;  %1164 = vrot.lane.b32.xlu1 %v8577_v8, %s4348_s13  ;;  %v8585_v32 = vld [vmem:[#allocation12_spill] sm:$0xff]  ;;  %v8586_v8 = vld [vmem:[#allocation13_spill] sm:$0xff] }
 0x1a4   : > { %1162 = vrot.lane.b32.xlu0 %v8578_v24, %s4348_s13 }
 0x1a5   : > { %v5584_v47 = vpop.permute.xlu1 %988 }
 0x1a6   : > { %8579 = vst [vmem:[#allocation4_spill] sm:$0xff] %v5584_v47  ;;  %v5586_v15 = vpop.permute.xlu0 %986 }
 0x1a7   : > { %8580 = vst [vmem:[#allocation5_spill] sm:$0xff] %v5586_v15  ;;  %1168 = vrot.lane.b32.xlu1 %v8581_v59, %s4348_s13  ;;  %v8589_v15 = vld [vmem:[#allocation16_spill] sm:$0xff]  ;;  %v333_v59 = vld [vmem:[%s8161_s1] sm:$0xff] }
 0x1a8   : > { %1166 = vrot.lane.b32.xlu0 %v8582_v33, %s4348_s13  ;;  %v334_v33 = vld [vmem:[%s8161_s1 + $0x8] sm:$0xff] }
 0x1a9   : > { %v5592_v29 = vpop.permute.xlu1 %992 }
 0x1aa   : > { %8583 = vst [vmem:[#allocation6_spill] sm:$0xff] %v5592_v29  ;;  %v5594_v22 = vpop.permute.xlu0 %990  ;;  %v4227_v29 = vpack.c.bf16 %v334_v33, %v333_v59 }
 0x1ab   : > { %8584 = vst [vmem:[#allocation7_spill] sm:$0xff] %v5594_v22  ;;  %1172 = vrot.lane.b32.xlu1 %v8585_v32, %s4348_s13  ;;  %v8590_v32 = vld [vmem:[#allocation17_spill] sm:$0xff] }
 0x1ac   : > { %1170 = vrot.lane.b32.xlu0 %v8586_v8, %s4348_s13  ;;  %4228 = vmatprep.subr.bf16.mxu0 %v4227_v29  ;;  %v336_v22 = vld [vmem:[%s8161_s1 + $0x18] sm:$0xff] }
 0x1ad   : > { %v5600_v24 = vpop.permute.xlu1 %996  ;;  %4230 = vmatpush3.bf16.msra.mxu0 %v4227_v29  ;;  %v337_v29 = vld [vmem:[%s8161_s1 + $0x20] sm:$0xf] }
 0x1ae   : > { %8587 = vst [vmem:[#allocation8_spill] sm:$0xff] %v5600_v24  ;;  %v5602_v47 = vpop.permute.xlu0 %994 }
 0x1af   : > { %8588 = vst [vmem:[#allocation9_spill] sm:$0xff] %v5602_v47  ;;  %1176 = vrot.lane.b32.xlu1 %v8589_v15, %s4348_s13  ;;  %v8593_v47 = vld [vmem:[#allocation20_spill] sm:$0xff] }
 0x1b0   : > { %1174 = vrot.lane.b32.xlu0 %v8590_v32, %s4348_s13  ;;  %v335_v15 = vld [vmem:[%s8161_s1 + $0x10] sm:$0xff]  ;;  %v8594_v32 = vld [vmem:[#allocation21_spill] sm:$0xff] }
 0x1b1   : > { %v5614_v8 = vpop.permute.xlu1 %1000  ;;  %v4231_v59 = vpack.c.bf16 %v336_v22, %v335_v15  ;;  %v8601_v15 = vld [vmem:[#allocation28_spill] sm:$0xff] }
 0x1b2   : > { %8591 = vst [vmem:[#allocation10_spill] sm:$0xff] %v5614_v8  ;;  %v5616_v24 = vpop.permute.xlu0 %998 }
 0x1b3   : > { %8592 = vst [vmem:[#allocation11_spill] sm:$0xff] %v5616_v24  ;;  %1180 = vrot.lane.b32.xlu1 %v8593_v47, %s4348_s13  ;;  %4232 = vmatprep.subr.bf16.mxu0 %v4231_v59  ;;  %v8597_v47 = vld [vmem:[#allocation24_spill] sm:$0xff]  ;;  %v8598_v24 = vld [vmem:[#allocation25_spill] sm:$0xff] }
 0x1b4   : > { %1178 = vrot.lane.b32.xlu0 %v8594_v32, %s4348_s13  ;;  %4234 = vmatpush3.bf16.msra.mxu0 %v4231_v59  ;;  %v8602_v59 = vld [vmem:[#allocation29_spill] sm:$0xff] }
 0x1b5   : > { %v5628_v33 = vpop.permute.xlu1 %1004  ;;  %4111 = vmatprep.subr.msk.mxu0 %vm1710_vm5, %v337_v29 }
 0x1b6   : > { %8595 = vst [vmem:[#allocation12_spill] sm:$0xff] %v5628_v33  ;;  %v5630_v8 = vpop.permute.xlu0 %1002 }
 0x1b7   : > { %8596 = vst [vmem:[#allocation13_spill] sm:$0xff] %v5630_v8  ;;  %1184 = vrot.lane.b32.xlu1 %v8597_v47, %s4348_s13  ;;  %v1469_v47 = vsel %vm1441_vm6, %v5336_v41, %v5498_v54  ;;  %v1471_v41 = vsel %vm1441_vm6, %v5356_v26, %v5506_v62  ;;  %v1473_v26 = vsel %vm1441_vm6, %v5376_v28, %v5514_v48 }
 0x1b8   : > { %1182 = vrot.lane.b32.xlu0 %v8598_v24, %s4348_s13  ;;  %4112 = vmatpush3.msk.msra.mxu0 %vm1710_vm5, %v337_v29  ;;  %v1468_v24 = vsel %vm1441_vm6, %v5339_v7, %v5500_v56  ;;  %v1470_v7 = vsel %vm1441_vm6, %v5359_v1, %v5508_v46  ;;  %v1472_v1 = vsel %vm1441_vm6, %v5379_v27, %v5516_v30  ;;  %v8612_v30 = vld [vmem:[#allocation47_spill] sm:$0xff] }
 0x1b9   : > { %v5639_v32 = vpop.permute.xlu1 %1008 }
 0x1ba   : > { %8599 = vst [vmem:[#allocation16_spill] sm:$0xff] %v5639_v32  ;;  %v5641_v22 = vpop.permute.xlu0 %1006 }
 0x1bb   : > { %8600 = vst [vmem:[#allocation17_spill] sm:$0xff] %v5641_v22  ;;  %1188 = vrot.lane.b32.xlu1 %v8601_v15, %s4348_s13  ;;  %v8605_v15 = vld [vmem:[#allocation30_spill] sm:$0xff] }
 0x1bc   : > { %1186 = vrot.lane.b32.xlu0 %v8602_v59, %s4348_s13  ;;  %v8606_v59 = vld [vmem:[#allocation31_spill] sm:$0xff] }
 0x1bd   : > { %v1013_v8 = vpop.permute.xlu1 %1012 }
 0x1be   : > { %v5654_v22 = vsel %vm1474_vm7, %v1469_v47, %v1013_v8  ;;  %v1011_v32 = vpop.permute.xlu0 %1010  ;;  %v8609_v47 = vld [vmem:[#allocation33_spill] sm:$0xff] }
 0x1bf   : > { %8603 = vst [vmem:[#allocation20_spill] sm:$0xff] %v5654_v22  ;;  %v5657_v29 = vsel %vm1474_vm7, %v1468_v24, %v1011_v32  ;;  %1192 = vrot.lane.b32.xlu1 %v8605_v15, %s4348_s13  ;;  %v8637_v22 = vld [vmem:[#allocation53_spill] sm:$0xff] }
 0x1c0   : > { %8604 = vst [vmem:[#allocation21_spill] sm:$0xff] %v5657_v29  ;;  %1190 = vrot.lane.b32.xlu0 %v8606_v59, %s4348_s13 }
 0x1c1   : > { %v1017_v54 = vpop.permute.xlu1 %1016 }
 0x1c2   : > { %v5670_v56 = vsel %vm1474_vm7, %v1471_v41, %v1017_v54  ;;  %v1015_v8 = vpop.permute.xlu0 %1014 }
 0x1c3   : > { %8607 = vst [vmem:[#allocation24_spill] sm:$0xff] %v5670_v56  ;;  %v5673_v32 = vsel %vm1474_vm7, %v1470_v7, %v1015_v8  ;;  %1246 = vrot.lane.b32.xlu1 %v4786_v14, %s4349_s26  ;;  %v8616_v8 = vld [vmem:[#allocation32_spill] sm:$0xff] }
 0x1c4   : > { %8608 = vst [vmem:[#allocation25_spill] sm:$0xff] %v5673_v32  ;;  %1194 = vrot.lane.b32.xlu0 %v8609_v47, %s4348_s13 }
 0x1c5   : > { %v1021_v62 = vpop.permute.xlu1 %1020 }
 0x1c6   : > { %v5686_v46 = vsel %vm1474_vm7, %v1473_v26, %v1021_v62  ;;  %v1019_v24 = vpop.permute.xlu0 %1018  ;;  %v8621_v26 = vld [vmem:[#allocation34_spill] sm:$0xff] }
 0x1c7   : > { %8610 = vst [vmem:[#allocation28_spill] sm:$0xff] %v5686_v46  ;;  %v5689_v15 = vsel %vm1474_vm7, %v1472_v1, %v1019_v24  ;;  %1250 = vrot.lane.b32.xlu1 %v8511_v2, %s4349_s26  ;;  %v8627_v24 = vld [vmem:[#allocation36_spill] sm:$0xff] }
 0x1c8   : > { %8611 = vst [vmem:[#allocation29_spill] sm:$0xff] %v5689_v15  ;;  %1248 = vrot.lane.b32.xlu0 %v4781_v43, %s4349_s26  ;;  %v564_v15 = vrot.slane %v5544_v3, 1 }
 0x1c9   : > { %v5695_v14 = vpop.permute.xlu1 %1056 }
 0x1ca   : > { %v5697_v28 = vpop.permute.xlu0 %1054 }
 0x1cb   : > { %1254 = vrot.lane.b32.xlu1 %v8514_v17, %s4349_s26 }
 0x1cc   : > { %1252 = vrot.lane.b32.xlu0 %v4794_v5, %s4349_s26 }
 0x1cd   : > { %v5703_v27 = vpop.permute.xlu1 %1060 }
 0x1ce   : > { %v5705_v48 = vpop.permute.xlu0 %1058 }
 0x1cf   : > { %1258 = vrot.lane.b32.xlu1 %v8517_v19, %s4349_s26 }
 0x1d0   : > { %1256 = vrot.lane.b32.xlu0 %v4807_v51, %s4349_s26 }
 0x1d1   : > { %v5711_v43 = vpop.permute.xlu1 %1064 }
 0x1d2   : > { %v5713_v2 = vpop.permute.xlu0 %1062 }
 0x1d3   : > { %1262 = vrot.lane.b32.xlu1 %v8520_v53, %s4349_s26 }
 0x1d4   : > { %1260 = vrot.lane.b32.xlu0 %v4820_v6, %s4349_s26 }
 0x1d5   : > { %v5719_v5 = vpop.permute.xlu1 %1068 }
 0x1d6   : > { %v5721_v17 = vpop.permute.xlu0 %1066 }
 0x1d7   : > { %1266 = vrot.lane.b32.xlu1 %v8523_v12, %s4349_s26 }
 0x1d8   : > { %1264 = vrot.lane.b32.xlu0 %v4833_v4, %s4349_s26 }
 0x1d9   : > { %v5727_v19 = vpop.permute.xlu1 %1072 }
 0x1da   : > { %v5729_v51 = vpop.permute.xlu0 %1070 }
 0x1db   : > { %1270 = vrot.lane.b32.xlu1 %v8526_v36, %s4349_s26  ;;  %v8613_v36 = vld [vmem:[#allocation44_spill] sm:$0xff] }
 0x1dc   : > { %1268 = vrot.lane.b32.xlu0 %v4846_v52, %s4349_s26 }
 0x1dd   : > { %v5735_v6 = vpop.permute.xlu1 %1076 }
 0x1de   : > { %v5737_v53 = vpop.permute.xlu0 %1074 }
 0x1df   : > { %1274 = vrot.lane.b32.xlu1 %v8529_v21, %s4349_s26  ;;  %v8614_v21 = vld [vmem:[#allocation46_spill] sm:$0xff] }
 0x1e0   : > { %1272 = vrot.lane.b32.xlu0 %v4859_v10, %s4349_s26 }
 0x1e1   : > { %v5743_v4 = vpop.permute.xlu1 %1080 }
 0x1e2   : > { %v5745_v12 = vpop.permute.xlu0 %1078 }
 0x1e3   : > { %1278 = vrot.lane.b32.xlu1 %v8612_v30, %s4349_s26  ;;  %v8628_v30 = vld [vmem:[#allocation37_spill] sm:$0xff] }
 0x1e4   : > { %1276 = vrot.lane.b32.xlu0 %v8613_v36, %s4349_s26 }
 0x1e5   : > { %v5751_v52 = vpop.permute.xlu1 %1084 }
 0x1e6   : > { %v5753_v59 = vpop.permute.xlu0 %1082 }
 0x1e7   : > { %1282 = vrot.lane.b32.xlu1 %v8534_v34, %s4349_s26 }
 0x1e8   : > { %1280 = vrot.lane.b32.xlu0 %v8614_v21, %s4349_s26 }
 0x1e9   : > { %v5759_v10 = vpop.permute.xlu1 %1088 }
 0x1ea   : > { %v5761_v41 = vpop.permute.xlu0 %1086 }
 0x1eb   : > { %1286 = vrot.lane.b32.xlu1 %v8535_v39, %s4349_s26 }
 0x1ec   : > { %1284 = vrot.lane.b32.xlu0 %v8533_v16, %s4349_s26 }
 0x1ed   : > { %v5767_v54 = vpop.permute.xlu1 %1092 }
 0x1ee   : > { %8615 = vst [vmem:[#allocation30_spill] sm:$0xff] %v5767_v54  ;;  %v5769_v7 = vpop.permute.xlu0 %1090  ;;  %v4309_v54 = vld [vmem:[%s4409_s29 + $0x18] sm:$0xff] }
 0x1ef   : > { %1196 = vrot.lane.b32.xlu1 %v8616_v8, %s4348_s13 }
 0x1f0   : > { %1288 = vrot.lane.b32.xlu0 %v4911_v23, %s4349_s26  ;;  %v8622_v23 = vld [vmem:[#allocation35_spill] sm:$0xff] }
 0x1f1   : > { %v5775_v34 = vpop.permute.xlu1 %1096 }
 0x1f2   : > { %8617 = vst [vmem:[#allocation31_spill] sm:$0xff] %v5775_v34  ;;  %v5777_v47 = vpop.permute.xlu0 %1094 }
 0x1f3   : > { %8618 = vst [vmem:[#allocation33_spill] sm:$0xff] %v5777_v47  ;;  %1292 = vrot.lane.b32.xlu1 %v4924_v31, %s4349_s26  ;;  %v8642_v47 = vld [vmem:[#allocation51_spill] sm:$0xff] }
 0x1f4   : > { %1290 = vrot.lane.b32.xlu0 %v8536_v57, %s4349_s26 }
 0x1f5   : > { %v5783_v16 = vpop.permute.xlu1 %1100 }
 0x1f6   : > { %8619 = vst [vmem:[#allocation47_spill] sm:$0xff] %v5783_v16  ;;  %v5785_v39 = vpop.permute.xlu0 %1098 }
 0x1f7   : > { %8620 = vst [vmem:[#allocation44_spill] sm:$0xff] %v5785_v39  ;;  %1200 = vrot.lane.b32.xlu1 %v8621_v26, %s4348_s13  ;;  %v8633_v26 = vld [vmem:[#allocation108_spill] sm:$0xff]  ;;  %v8639_v39 = vld [vmem:[#allocation105_spill] sm:$0xff] }
 0x1f8   : > { %1198 = vrot.lane.b32.xlu0 %v8622_v23, %s4348_s13  ;;  %v565_v23 = vrot.slane %v5539_v60, 1 }
 0x1f9   : > { %v5791_v62 = vpop.permute.xlu1 %1104 }
 0x1fa   : > { %8623 = vst [vmem:[#allocation46_spill] sm:$0xff] %v5791_v62  ;;  %v5793_v1 = vpop.permute.xlu0 %1102  ;;  %v566_v32 = vsel %vm386_vm0, %v564_v15, %v565_v23 }
 0x1fb   : > { %8624 = vst [vmem:[#allocation32_spill] sm:$0xff] %v5793_v1  ;;  %1296 = vrot.lane.b32.xlu1 %v4941_v35, %s4349_s26  ;;  %v8638_v1 = vld [vmem:[#allocation79_spill] sm:$0xff] }
 0x1fc   : > { %1294 = vrot.lane.b32.xlu0 %v4948_v63, %s4349_s26  ;;  %v332_v63 = vld [vmem:[%s4409_s29 + $0x1a8] sm:$0x3] }
 0x1fd   : > { %v5799_v31 = vpop.permute.xlu1 %1108 }
 0x1fe   : > { %8625 = vst [vmem:[#allocation34_spill] sm:$0xff] %v5799_v31  ;;  %v5801_v57 = vpop.permute.xlu0 %1106 }
 0x1ff   : > { %8626 = vst [vmem:[#allocation35_spill] sm:$0xff] %v5801_v57  ;;  %1204 = vrot.lane.b32.xlu1 %v8627_v24, %s4348_s13  ;;  %v8634_v24 = vld [vmem:[#allocation110_spill] sm:$0xff] }
 0x200   : > { %1202 = vrot.lane.b32.xlu0 %v8628_v30, %s4348_s13  ;;  %v567_v30 = vrot.slane %v332_v63, 1  ;;  %v4308_v57 = vld [vmem:[%s4409_s29] sm:$0xff] }
 0x201   : > { %v5807_v36 = vpop.permute.xlu1 %1112  ;;  %v1343_v31 = vsel %vm1342_vm2, %v4308_v57, %v8637_v22 }
 0x202   : > { %8629 = vst [vmem:[#allocation36_spill] sm:$0xff] %v5807_v36  ;;  %v5809_v21 = vpop.permute.xlu0 %1110  ;;  %v1376_v62 = vsel %vm1375_vm3, %v1343_v31, %v8638_v1  ;;  %v4310_v1 = vld [vmem:[%s4409_s29 + $0x8] sm:$0xff]  ;;  %v8644_v31 = vld [vmem:[#allocation81_spill] sm:$0xff] }
 0x203   : > { %8630 = vst [vmem:[#allocation37_spill] sm:$0xff] %v5809_v21  ;;  %1300 = vrot.lane.b32.xlu1 %v4958_v58, %s4349_s26  ;;  %v1409_v16 = vsel %vm1408_vm4, %v1376_v62, %v8639_v39  ;;  %v8643_v39 = vld [vmem:[#allocation55_spill] sm:$0xff] }
 0x204   : > { %1298 = vrot.lane.b32.xlu0 %v4963_v44, %s4349_s26  ;;  %v570_v44 = vrot.slane %v5539_v60, 2  ;;  %v1442_v34 = vsel %vm1441_vm6, %v1409_v16, %v5387_v61  ;;  %v1344_v62 = vsel %vm1342_vm2, %v4310_v1, %v8643_v39  ;;  %v8645_v16 = vld [vmem:[#allocation78_spill] sm:$0xff] }
 0x205   : > { %v5815_v35 = vpop.permute.xlu1 %1116  ;;  %v1475_v22 = vsel %vm1474_vm7, %v1442_v34, %v5524_v40 }
 0x206   : > { %8631 = vst [vmem:[#allocation137_spill] sm:$0xff] %v5815_v35  ;;  %v5818_v8 = vpop.permute.xlu0 %1114  ;;  %v569_v35 = vrot.slane %v5544_v3, 2  ;;  %v1508_v61 = vsel %vm1507_vm8, %v1475_v22, %v5697_v28  ;;  %v4311_v22 = vld [vmem:[%s4409_s29 + $0x30] sm:$0xff] }
 0x207   : > { %8632 = vst [vmem:[#allocation138_spill] sm:$0xff] %v5818_v8  ;;  %1208 = vrot.lane.b32.xlu1 %v8633_v26, %s4348_s13  ;;  %v568_v26 = vsel %vm386_vm0, %v565_v23, %v567_v30  ;;  %v572_v8 = vrot.slane %v332_v63, 2 }
 0x208   : > { %1206 = vrot.lane.b32.xlu0 %v8634_v24, %s4348_s13 }
 0x209   : > { %v5826_v58 = vpop.permute.xlu1 %1152 }
 0x20a   : > { %v1151_v46 = vpop.permute.xlu0 %1150 }
 0x20b   : > { %1304 = vrot.lane.b32.xlu1 %v5405_v0, %s4349_s26  ;;  %v573_v0 = vsel %vm467_vm1, %v570_v44, %v572_v8  ;;  %v1541_v40 = vsel %vm1540_vm9, %v1508_v61, %v1151_v46  ;;  %v8650_v61 = vld [vmem:[#allocation54_spill] sm:$0xff] }
 0x20c   : > { %1302 = vrot.lane.b32.xlu0 %v5410_v9, %s4349_s26  ;;  %v571_v9 = vsel %vm467_vm1, %v569_v35, %v570_v44 }
 0x20d   : > { %v5835_v24 = vpop.permute.xlu1 %1156 }
 0x20e   : > { %v5838_v21 = vpop.permute.xlu0 %1154 }
 0x20f   : > { %1212 = vrot.lane.b32.xlu1 %v568_v26, %s4348_s13 }
 0x210   : > { %1210 = vrot.lane.b32.xlu0 %v566_v32, %s4348_s13  ;;  %s4024_s13 = sshll.u32 %s9049_s25, 6 }
 0x211   : > { %v5843_v60 = vpop.permute.xlu1 %1160  ;;  %s278_s16 = scalar_lea.vmem %s8167_s7, %s4024_s13 }
 0x212   : > { %v5846_v30 = vpop.permute.xlu0 %1158 }
 0x213   : > { %1308 = vrot.lane.b32.xlu1 %v573_v0, %s4349_s26 }
 0x214   : > { %1306 = vrot.lane.b32.xlu0 %v571_v9, %s4349_s26 }
 0x215   : > { %v5850_v3 = vpop.permute.xlu1 %1164 }
 0x216   : > { %v5852_v15 = vpop.permute.xlu0 %1162 }
 0x219   : > { %v5854_v63 = vpop.permute.xlu1 %1168 }
 0x21a   : > { %v5856_v32 = vpop.permute.xlu0 %1166 }
 0x21d   : > { %v5858_v8 = vpop.permute.xlu1 %1172 }
 0x21e   : > { %v5860_v23 = vpop.permute.xlu0 %1170 }
 0x221   : > { %v5862_v35 = vpop.permute.xlu1 %1176 }
 0x222   : > { %v5864_v44 = vpop.permute.xlu0 %1174 }
 0x225   : > { %v5866_v26 = vpop.permute.xlu1 %1180 }
 0x226   : > { %v5868_v0 = vpop.permute.xlu0 %1178 }
 0x229   : > { %v5870_v9 = vpop.permute.xlu1 %1184 }
 0x22a   : > { %8635 = vst [vmem:[#allocation108_spill] sm:$0xff] %v5870_v9  ;;  %v5872_v56 = vpop.permute.xlu0 %1182  ;;  %v1345_v9 = vsel %vm1342_vm2, %v4309_v54, %v8642_v47  ;;  %v1377_v54 = vsel %vm1375_vm3, %v1344_v62, %v8645_v16  ;;  %v8646_v47 = vld [vmem:[#allocation107_spill] sm:$0xff]  ;;  %v8649_v16 = vld [vmem:[#allocation48_spill] sm:$0xff] }
 0x22b   : > { %v1378_v57 = vsel %vm1375_vm3, %v1345_v9, %v8644_v31  ;;  %v8648_v31 = vld [vmem:[#allocation57_spill] sm:$0xff] }
 0x22c   : > { %v1347_v62 = vsel %vm1342_vm2, %v4311_v22, %v8648_v31 }
 0x22d   : > { %v5874_v36 = vpop.permute.xlu1 %1188 }
 0x22e   : > { %8636 = vst [vmem:[#allocation110_spill] sm:$0xff] %v5874_v36  ;;  %v5876_v29 = vpop.permute.xlu0 %1186 }
 0x231   : > { %v5885_v33 = vpop.permute.xlu1 %1192 }
 0x232   : > { %8640 = vst [vmem:[#allocation53_spill] sm:$0xff] %v5885_v33  ;;  %v5889_v36 = vpop.permute.xlu0 %1190  ;;  %v1411_v33 = vsel %vm1408_vm4, %v1378_v57, %v8646_v47 }
 0x233   : > { %8641 = vst [vmem:[#allocation79_spill] sm:$0xff] %v5889_v36  ;;  %v8647_v36 = vld [vmem:[#allocation104_spill] sm:$0xff]  ;;  %v1444_v9 = vsel %vm1441_vm6, %v1411_v33, %v5398_v55  ;;  %v8651_v33 = vld [vmem:[#allocation83_spill] sm:$0xff] }
 0x234   : > { %v1410_v1 = vsel %vm1408_vm4, %v1377_v54, %v8647_v36  ;;  %v1477_v46 = vsel %vm1474_vm7, %v1444_v9, %v5532_v13  ;;  %v4312_v36 = vld [vmem:[%s4409_s29 + $0x20] sm:$0xff]  ;;  %v1380_v54 = vsel %vm1375_vm3, %v1347_v62, %v8651_v33 }
 0x235   : > { %v1247_v34 = vpop.permute.xlu1 %1246  ;;  %v1443_v57 = vsel %vm1441_vm6, %v1410_v1, %v8649_v16  ;;  %v1346_v55 = vsel %vm1342_vm2, %v4312_v36, %v8650_v61  ;;  %v8653_v1 = vld [vmem:[#allocation111_spill] sm:$0xff]  ;;  %v8654_v62 = vld [vmem:[#allocation106_spill] sm:$0xff] }
 0x236   : > { %v5912_v39 = vpop.permute.xlu0 %1194  ;;  %v1574_v28 = vsel %vm1573_vm10, %v1541_v40, %v1247_v34  ;;  %v1476_v47 = vsel %vm1474_vm7, %v1443_v57, %v5522_v38  ;;  %v1510_v40 = vsel %vm1507_vm8, %v1477_v46, %v5705_v48  ;;  %v8652_v34 = vld [vmem:[#allocation80_spill] sm:$0xff]  ;;  %v1413_v9 = vsel %vm1408_vm4, %v1380_v54, %v8653_v1  ;;  %v4313_v36 = vld [vmem:[%s4409_s29 + $0x48] sm:$0xff] }
 0x237   : > { %4113 = vmatprep.mubr.msk.f32.mxu0 %vm1613_vm11, %v1574_v28  ;;  %v1379_v13 = vsel %vm1375_vm3, %v1346_v55, %v8652_v34  ;;  %v1509_v28 = vsel %vm1507_vm8, %v1476_v47, %v5695_v14  ;;  %v1543_v22 = vsel %vm1540_vm9, %v1510_v40, %v5838_v21  ;;  %v1446_v48 = vsel %vm1441_vm6, %v1413_v9, %v5412_v37  ;;  %v8655_v61 = vld [vmem:[#allocation59_spill] sm:$0xff]  ;;  %v8656_v55 = vld [vmem:[#allocation49_spill] sm:$0xff]  ;;  %v8657_v37 = vld [vmem:[#allocation56_spill] sm:$0xff] }
 0x238   : > { %v1412_v38 = vsel %vm1408_vm4, %v1379_v13, %v8654_v62  ;;  %v1542_v16 = vsel %vm1540_vm9, %v1509_v28, %v5826_v58  ;;  %v1349_v14 = vsel %vm1342_vm2, %v4313_v36, %v8655_v61  ;;  %v1479_v33 = vsel %vm1474_vm7, %v1446_v48, %v5546_v49  ;;  %v4314_v47 = vld [vmem:[%s4409_s29 + $0x38] sm:$0xff]  ;;  %v8659_v9 = vld [vmem:[#allocation82_spill] sm:$0xff] }
 0x239   : > { %v1251_v31 = vpop.permute.xlu1 %1250  ;;  %v1445_v21 = vsel %vm1441_vm6, %v1412_v38, %v8656_v55  ;;  %v1348_v40 = vsel %vm1342_vm2, %v4314_v47, %v8657_v37  ;;  %v8658_v58 = vld [vmem:[#allocation85_spill] sm:$0xff]  ;;  %v1512_v1 = vsel %vm1507_vm8, %v1479_v33, %v5713_v2  ;;  %v4315_v61 = vld [vmem:[%s4409_s29 + $0x60] sm:$0xff] }
 0x23a   : > { %v1576_v57 = vsel %vm1573_vm10, %v1543_v22, %v1251_v31  ;;  %v1249_v46 = vpop.permute.xlu0 %1248  ;;  %v1382_v34 = vsel %vm1375_vm3, %v1349_v14, %v8658_v58  ;;  %v1478_v13 = vsel %vm1474_vm7, %v1445_v21, %v5530_v20  ;;  %v1381_v49 = vsel %vm1375_vm3, %v1348_v40, %v8659_v9  ;;  %v8660_v28 = vld [vmem:[#allocation113_spill] sm:$0xff]  ;;  %v4316_v21 = vld [vmem:[%s4409_s29 + $0x50] sm:$0xff]  ;;  %v8666_v40 = vld [vmem:[#allocation115_spill] sm:$0xff] }
 0x23b   : > { %v1575_v54 = vsel %vm1573_vm10, %v1542_v16, %v1249_v46  ;;  %v1415_v22 = vsel %vm1408_vm4, %v1382_v34, %v8660_v28  ;;  %v1511_v31 = vsel %vm1507_vm8, %v1478_v13, %v5703_v27  ;;  %v1545_v62 = vsel %vm1540_vm9, %v1512_v1, %v5846_v30  ;;  %v8661_v38 = vld [vmem:[#allocation109_spill] sm:$0xff]  ;;  %v8667_v1 = vld [vmem:[#allocation112_spill] sm:$0xff] }
 0x23c   : > { %4114 = vmatmul.mubr.msk.f32.vlgmr.msra.gmra.mrb[0].mxu0 %vm1613_vm11, %v1575_v54  ;;  %v1414_v2 = vsel %vm1408_vm4, %v1381_v49, %v8661_v38  ;;  %v1448_v48 = vsel %vm1441_vm6, %v1415_v22, %v5420_v45  ;;  %v1544_v16 = vsel %vm1540_vm9, %v1511_v31, %v5835_v24  ;;  %v8662_v27 = vld [vmem:[#allocation61_spill] sm:$0xff]  ;;  %v8663_v45 = vld [vmem:[#allocation58_spill] sm:$0xff]  ;;  %v8664_v24 = vld [vmem:[#allocation87_spill] sm:$0xff] }
 0x23d   : > { %4116 = vmatprep.mubr.msk.f32.mxu0 %vm1613_vm11, %v1576_v57  ;;  %v1255_v20 = vpop.permute.xlu1 %1254  ;;  %v1351_v14 = vsel %vm1342_vm2, %v4315_v61, %v8662_v27  ;;  %v1447_v30 = vsel %vm1441_vm6, %v1414_v2, %v5407_v25  ;;  %v1481_v57 = vsel %vm1474_vm7, %v1448_v48, %v5554_v50  ;;  %v1350_v33 = vsel %vm1342_vm2, %v4316_v21, %v8663_v45  ;;  %v8665_v25 = vld [vmem:[#allocation84_spill] sm:$0xff]  ;;  %v4317_v31 = vld [vmem:[%s4409_s29 + $0x78] sm:$0xff]  ;;  %v4318_v48 = vld [vmem:[%s4409_s29 + $0x68] sm:$0xff] }
 0x23e   : > { %v1578_v46 = vsel %vm1573_vm10, %v1545_v62, %v1255_v20  ;;  %v1253_v36 = vpop.permute.xlu0 %1252  ;;  %v1384_v54 = vsel %vm1375_vm3, %v1351_v14, %v8664_v24  ;;  %v1480_v47 = vsel %vm1474_vm7, %v1447_v30, %v5541_v42  ;;  %v1514_v37 = vsel %vm1507_vm8, %v1481_v57, %v5721_v17  ;;  %v8673_v14 = vld [vmem:[#allocation86_spill] sm:$0xff]  ;;  %v8674_v30 = vld [vmem:[#allocation117_spill] sm:$0xff] }
 0x23f   : > { %v1577_v55 = vsel %vm1573_vm10, %v1544_v16, %v1253_v36  ;;  %v1383_v50 = vsel %vm1375_vm3, %v1350_v33, %v8665_v25  ;;  %v1417_v58 = vsel %vm1408_vm4, %v1384_v54, %v8666_v40  ;;  %v1513_v34 = vsel %vm1507_vm8, %v1480_v47, %v5711_v43  ;;  %v8668_v43 = vld [vmem:[#allocation63_spill] sm:$0xff]  ;;  %v8672_v36 = vld [vmem:[#allocation22_spill] sm:$0xff] }
 0x240   : > { %4117 = vmatmul.mubr.msk.f32.gmra.mrb[2].mxu0 %vm1613_vm11, %v1577_v55  ;;  %v1547_v13 = vsel %vm1540_vm9, %v1514_v37, %v5852_v15  ;;  %v1416_v17 = vsel %vm1408_vm4, %v1383_v50, %v8667_v1  ;;  %v1450_v9 = vsel %vm1441_vm6, %v1417_v58, %v5428_v18  ;;  %v1546_v49 = vsel %vm1540_vm9, %v1513_v34, %v5843_v60  ;;  %v8669_v15 = vld [vmem:[#allocation50_spill] sm:$0xff]  ;;  %v8670_v18 = vld [vmem:[#allocation60_spill] sm:$0xff]  ;;  %v8671_v60 = vld [vmem:[#allocation89_spill] sm:$0xff] }
 0x241   : > { %4119 = vmatprep.mubr.msk.f32.mxu0 %vm1613_vm11, %v1578_v46  ;;  %v1259_v42 = vpop.permute.xlu1 %1258  ;;  %v1353_v62 = vsel %vm1342_vm2, %v4317_v31, %v8668_v43  ;;  %v1449_v20 = vsel %vm1441_vm6, %v1416_v17, %v8669_v15  ;;  %v1483_v38 = vsel %vm1474_vm7, %v1450_v9, %v5562_v11  ;;  %v1352_v16 = vsel %vm1342_vm2, %v4318_v48, %v8670_v18  ;;  %v8675_v33 = vld [vmem:[#allocation114_spill] sm:$0xff]  ;;  %v4319_v50 = vld [vmem:[%s4409_s29 + $0x90] sm:$0xff]  ;;  %v8679_v34 = vld [vmem:[#allocation27_spill] sm:$0xff] }
 0x242   : > { %v1580_v28 = vsel %vm1573_vm10, %v1547_v13, %v1259_v42  ;;  %v1257_v22 = vpop.permute.xlu0 %1256  ;;  %v1386_v46 = vsel %vm1375_vm3, %v1353_v62, %v8671_v60  ;;  %v1482_v61 = vsel %vm1474_vm7, %v1449_v20, %v8672_v36  ;;  %v1516_v27 = vsel %vm1507_vm8, %v1483_v38, %v5729_v51  ;;  %v8676_v24 = vld [vmem:[#allocation126_spill] sm:$0xff]  ;;  %v8683_v43 = vld [vmem:[#allocation88_spill] sm:$0xff] }
 0x243   : > { %v1579_v2 = vsel %vm1573_vm10, %v1546_v49, %v1257_v22  ;;  %v1385_v11 = vsel %vm1375_vm3, %v1352_v16, %v8673_v14  ;;  %v1419_v57 = vsel %vm1408_vm4, %v1386_v46, %v8674_v30  ;;  %v1515_v55 = vsel %vm1507_vm8, %v1482_v61, %v5719_v5  ;;  %v8677_v5 = vld [vmem:[#allocation65_spill] sm:$0xff]  ;;  %v4320_v1 = vld [vmem:[%s4409_s29 + $0x80] sm:$0xff]  ;;  %v8685_v18 = vld [vmem:[#allocation116_spill] sm:$0xff] }
 0x244   : > { %4120 = vmatmul.mubr.msk.f32.gmra.mrb[4].mxu0 %vm1613_vm11, %v1579_v2  ;;  %v1549_v21 = vsel %vm1540_vm9, %v1516_v27, %v5856_v32  ;;  %v1418_v51 = vsel %vm1408_vm4, %v1385_v11, %v8675_v33  ;;  %v1452_v54 = vsel %vm1441_vm6, %v1419_v57, %v8676_v24  ;;  %v1548_v47 = vsel %vm1540_vm9, %v1515_v55, %v5850_v3  ;;  %v8678_v32 = vld [vmem:[#allocation52_spill] sm:$0xff]  ;;  %v8680_v17 = vld [vmem:[#allocation62_spill] sm:$0xff]  ;;  %v8681_v3 = vld [vmem:[#allocation91_spill] sm:$0xff] }
 0x245   : > { %4122 = vmatprep.mubr.msk.f32.mxu0 %vm1613_vm11, %v1580_v28  ;;  %v1263_v45 = vpop.permute.xlu1 %1262  ;;  %v1355_v40 = vsel %vm1342_vm2, %v4319_v50, %v8677_v5  ;;  %v1451_v58 = vsel %vm1441_vm6, %v1418_v51, %v8678_v32  ;;  %v1485_v13 = vsel %vm1474_vm7, %v1452_v54, %v8679_v34  ;;  %v1354_v9 = vsel %vm1342_vm2, %v4320_v1, %v8680_v17  ;;  %v8682_v28 = vld [vmem:[#allocation23_spill] sm:$0xff]  ;;  %v8684_v15 = vld [vmem:[#allocation118_spill] sm:$0xff]  ;;  %v8686_v16 = vld [vmem:[#allocation128_spill] sm:$0xff] }
 0x246   : > { %v1582_v37 = vsel %vm1573_vm10, %v1549_v21, %v1263_v45  ;;  %v1261_v25 = vpop.permute.xlu0 %1260  ;;  %v1388_v49 = vsel %vm1375_vm3, %v1355_v40, %v8681_v3  ;;  %v1484_v22 = vsel %vm1474_vm7, %v1451_v58, %v8682_v28  ;;  %v1518_v31 = vsel %vm1507_vm8, %v1485_v13, %v5737_v53  ;;  %v4321_v27 = vld [vmem:[%s4409_s29 + $0xa8] sm:$0xff]  ;;  %v4322_v21 = vld [vmem:[%s4409_s29 + $0x98] sm:$0xff]  ;;  %v8690_v45 = vld [vmem:[#allocation64_spill] sm:$0xff] }
 0x247   : > { %v1581_v42 = vsel %vm1573_vm10, %v1548_v47, %v1261_v25  ;;  %v1387_v62 = vsel %vm1375_vm3, %v1354_v9, %v8683_v43  ;;  %v1421_v20 = vsel %vm1408_vm4, %v1388_v49, %v8684_v15  ;;  %v1517_v38 = vsel %vm1507_vm8, %v1484_v22, %v5727_v19  ;;  %v8687_v19 = vld [vmem:[#allocation67_spill] sm:$0xff]  ;;  %v8692_v24 = vld [vmem:[#allocation26_spill] sm:$0xff]  ;;  %v8699_v22 = vld [vmem:[#allocation5_spill] sm:$0xff] }
 0x248   : > { %4123 = vmatmul.mubr.msk.f32.gmra.mrb[6].mxu0 %vm1613_vm11, %v1581_v42  ;;  %v1551_v2 = vsel %vm1540_vm9, %v1518_v31, %v5860_v23  ;;  %v1420_v53 = vsel %vm1408_vm4, %v1387_v62, %v8685_v18  ;;  %v1454_v60 = vsel %vm1441_vm6, %v1421_v20, %v8686_v16  ;;  %v1550_v46 = vsel %vm1540_vm9, %v1517_v38, %v5854_v63  ;;  %v8688_v23 = vld [vmem:[#allocation125_spill] sm:$0xff]  ;;  %v8689_v30 = vld [vmem:[#allocation3_spill] sm:$0xff]  ;;  %v8695_v34 = vld [vmem:[#allocation38_spill] sm:$0xff] }
 0x249   : > { %4125 = vmatprep.mubr.msk.f32.mxu0 %vm1613_vm11, %v1582_v37  ;;  %v1267_v48 = vpop.permute.xlu1 %1266  ;;  %v1357_v14 = vsel %vm1342_vm2, %v4321_v27, %v8687_v19  ;;  %v1453_v11 = vsel %vm1441_vm6, %v1420_v53, %v8688_v23  ;;  %v1487_v57 = vsel %vm1474_vm7, %v1454_v60, %v8689_v30  ;;  %v1356_v33 = vsel %vm1342_vm2, %v4322_v21, %v8690_v45  ;;  %v8691_v63 = vld [vmem:[#allocation93_spill] sm:$0xff]  ;;  %v8693_v37 = vld [vmem:[#allocation90_spill] sm:$0xff]  ;;  %v8694_v50 = vld [vmem:[#allocation119_spill] sm:$0xff] }
 0x24a   : > { %v1584_v36 = vsel %vm1573_vm10, %v1551_v2, %v1267_v48  ;;  %v1265_v61 = vpop.permute.xlu0 %1264  ;;  %v1390_v51 = vsel %vm1375_vm3, %v1357_v14, %v8691_v63  ;;  %v1486_v54 = vsel %vm1474_vm7, %v1453_v11, %v8692_v24  ;;  %v1520_v47 = vsel %vm1507_vm8, %v1487_v57, %v5745_v12  ;;  %v8696_v13 = vld [vmem:[#allocation130_spill] sm:$0xff]  ;;  %v4324_v62 = vld [vmem:[%s4409_s29 + $0xb0] sm:$0xff]  ;;  %v8705_v19 = vld [vmem:[#allocation39_spill] sm:$0xff] }
 0x24b   : > { %v1583_v55 = vsel %vm1573_vm10, %v1550_v46, %v1265_v61  ;;  %v1389_v25 = vsel %vm1375_vm3, %v1356_v33, %v8693_v37  ;;  %v1423_v5 = vsel %vm1408_vm4, %v1390_v51, %v8694_v50  ;;  %v1519_v40 = vsel %vm1507_vm8, %v1486_v54, %v5735_v6  ;;  %v4323_v3 = vld [vmem:[%s4409_s29 + $0xc0] sm:$0xff]  ;;  %v8697_v6 = vld [vmem:[#allocation69_spill] sm:$0xff]  ;;  %v8703_v53 = vld [vmem:[#allocation92_spill] sm:$0xff] }
 0x24c   : > { %4126 = vmatmul.mubr.msk.f32.gmra.mrb[8].mxu0 %vm1613_vm11, %v1583_v55  ;;  %v1553_v32 = vsel %vm1540_vm9, %v1520_v47, %v5864_v44  ;;  %v1422_v12 = vsel %vm1408_vm4, %v1389_v25, %v8695_v34  ;;  %v1456_v42 = vsel %vm1441_vm6, %v1423_v5, %v8696_v13  ;;  %v1552_v1 = vsel %vm1540_vm9, %v1519_v40, %v5858_v8  ;;  %v8698_v44 = vld [vmem:[#allocation127_spill] sm:$0xff]  ;;  %v8700_v15 = vld [vmem:[#allocation66_spill] sm:$0xff]  ;;  %v8704_v60 = vld [vmem:[#allocation120_spill] sm:$0xff] }
 0x24d   : > { %4128 = vmatprep.mubr.msk.f32.mxu0 %vm1613_vm11, %v1584_v36  ;;  %v1271_v58 = vpop.permute.xlu1 %1270  ;;  %v1359_v49 = vsel %vm1342_vm2, %v4323_v3, %v8697_v6  ;;  %v1455_v28 = vsel %vm1441_vm6, %v1422_v12, %v8698_v44  ;;  %v1489_v31 = vsel %vm1474_vm7, %v1456_v42, %v8699_v22  ;;  %v1358_v20 = vsel %vm1342_vm2, %v4324_v62, %v8700_v15  ;;  %v8701_v8 = vld [vmem:[#allocation95_spill] sm:$0xff]  ;;  %v8702_v2 = vld [vmem:[#allocation2_spill] sm:$0xff]  ;;  %v8706_v14 = vld [vmem:[#allocation132_spill] sm:$0xff] }
 0x24e   : > { %v1586_v17 = vsel %vm1573_vm10, %v1553_v32, %v1271_v58  ;;  %v1269_v9 = vpop.permute.xlu0 %1268  ;;  %v1392_v38 = vsel %vm1375_vm3, %v1359_v49, %v8701_v8  ;;  %v1488_v48 = vsel %vm1474_vm7, %v1455_v28, %v8702_v2  ;;  %v1522_v18 = vsel %vm1507_vm8, %v1489_v31, %v5753_v59  ;;  %v4325_v55 = vld [vmem:[%s4409_s29 + $0xd8] sm:$0xff]  ;;  %v8709_v33 = vld [vmem:[#allocation7_spill] sm:$0xff]  ;;  %v8710_v54 = vld [vmem:[#allocation68_spill] sm:$0xff] }
 0x24f   : > { %v1585_v43 = vsel %vm1573_vm10, %v1552_v1, %v1269_v9  ;;  %v1391_v16 = vsel %vm1375_vm3, %v1358_v20, %v8703_v53  ;;  %v1425_v46 = vsel %vm1408_vm4, %v1392_v38, %v8704_v60  ;;  %v1521_v36 = vsel %vm1507_vm8, %v1488_v48, %v5743_v4  ;;  %v8707_v4 = vld [vmem:[#allocation71_spill] sm:$0xff]  ;;  %v8712_v25 = vld [vmem:[#allocation4_spill] sm:$0xff]  ;;  %v8713_v40 = vld [vmem:[#allocation94_spill] sm:$0xff] }
 0x250   : > { %4129 = vmatmul.mubr.msk.f32.gmra.mrb[10].mxu0 %vm1613_vm11, %v1585_v43  ;;  %v1555_v61 = vsel %vm1540_vm9, %v1522_v18, %v5868_v0  ;;  %v1424_v59 = vsel %vm1408_vm4, %v1391_v16, %v8705_v19  ;;  %v1458_v23 = vsel %vm1441_vm6, %v1425_v46, %v8706_v14  ;;  %v1554_v11 = vsel %vm1540_vm9, %v1521_v36, %v5862_v35  ;;  %v8708_v0 = vld [vmem:[#allocation129_spill] sm:$0xff]  ;;  %v4326_v24 = vld [vmem:[%s4409_s29 + $0xc8] sm:$0xff]  ;;  %v8715_v1 = vld [vmem:[#allocation40_spill] sm:$0xff] }
 0x251   : > { %4131 = vmatprep.mubr.msk.f32.mxu0 %vm1613_vm11, %v1586_v17  ;;  %v1275_v27 = vpop.permute.xlu1 %1274  ;;  %v1361_v21 = vsel %vm1342_vm2, %v4325_v55, %v8707_v4  ;;  %v1457_v45 = vsel %vm1441_vm6, %v1424_v59, %v8708_v0  ;;  %v1491_v63 = vsel %vm1474_vm7, %v1458_v23, %v8709_v33  ;;  %v1360_v47 = vsel %vm1342_vm2, %v4326_v24, %v8710_v54  ;;  %v8711_v35 = vld [vmem:[#allocation97_spill] sm:$0xff]  ;;  %v8716_v17 = vld [vmem:[#allocation134_spill] sm:$0xff]  ;;  %v4327_v44 = vld [vmem:[%s4409_s29 + $0xf0] sm:$0xff] }
 0x252   : > { %v1588_v30 = vsel %vm1573_vm10, %v1555_v61, %v1275_v27  ;;  %v1273_v57 = vpop.permute.xlu0 %1272  ;;  %v1394_v37 = vsel %vm1375_vm3, %v1361_v21, %v8711_v35  ;;  %v1490_v50 = vsel %vm1474_vm7, %v1457_v45, %v8712_v25  ;;  %v1524_v5 = vsel %vm1507_vm8, %v1491_v63, %v5761_v41  ;;  %v8714_v58 = vld [vmem:[#allocation121_spill] sm:$0xff]  ;;  %v4328_v15 = vld [vmem:[%s4409_s29 + $0xe0] sm:$0xff]  ;;  %v8723_v53 = vld [vmem:[#allocation96_spill] sm:$0xff] }
 0x253   : > { %v1587_v51 = vsel %vm1573_vm10, %v1554_v11, %v1273_v57  ;;  %v1393_v32 = vsel %vm1375_vm3, %v1360_v47, %v8713_v40  ;;  %v1427_v34 = vsel %vm1408_vm4, %v1394_v37, %v8714_v58  ;;  %v1523_v12 = vsel %vm1507_vm8, %v1490_v50, %v5751_v52  ;;  %v8717_v52 = vld [vmem:[#allocation73_spill] sm:$0xff]  ;;  %v8720_v20 = vld [vmem:[#allocation70_spill] sm:$0xff]  ;;  %v8726_v59 = vld [vmem:[#allocation136_spill] sm:$0xff] }
 0x254   : > { %4132 = vmatmul.mubr.msk.f32.gmra.mrb[12].mxu0 %vm1613_vm11, %v1587_v51  ;;  %v1557_v13 = vsel %vm1540_vm9, %v1524_v5, %v5872_v56  ;;  %v1426_v41 = vsel %vm1408_vm4, %v1393_v32, %v8715_v1  ;;  %v1460_v9 = vsel %vm1441_vm6, %v1427_v34, %v8716_v17  ;;  %v1556_v3 = vsel %vm1540_vm9, %v1523_v12, %v5866_v26  ;;  %v8718_v56 = vld [vmem:[#allocation131_spill] sm:$0xff]  ;;  %v8719_v31 = vld [vmem:[#allocation9_spill] sm:$0xff]  ;;  %v8722_v2 = vld [vmem:[#allocation6_spill] sm:$0xff] }
 0x255   : > { %4134 = vmatprep.mubr.msk.f32.mxu0 %vm1613_vm11, %v1588_v30  ;;  %v1279_v42 = vpop.permute.xlu1 %1278  ;;  %v1363_v28 = vsel %vm1342_vm2, %v4327_v44, %v8717_v52  ;;  %v1459_v22 = vsel %vm1441_vm6, %v1426_v41, %v8718_v56  ;;  %v1493_v43 = vsel %vm1474_vm7, %v1460_v9, %v8719_v31  ;;  %v1362_v8 = vsel %vm1342_vm2, %v4328_v15, %v8720_v20  ;;  %v8721_v26 = vld [vmem:[#allocation99_spill] sm:$0xff]  ;;  %v8724_v60 = vld [vmem:[#allocation122_spill] sm:$0xff]  ;;  %v8725_v19 = vld [vmem:[#allocation41_spill] sm:$0xff] }
 0x256   : > { %v1590_v6 = vsel %vm1573_vm10, %v1557_v13, %v1279_v42  ;;  %v1277_v49 = vpop.permute.xlu0 %1276  ;;  %v1396_v38 = vsel %vm1375_vm3, %v1363_v28, %v8721_v26  ;;  %v1492_v48 = vsel %vm1474_vm7, %v1459_v22, %v8722_v2  ;;  %v1526_v18 = vsel %vm1507_vm8, %v1493_v43, %v5769_v7  ;;  %v8727_v23 = vld [vmem:[#allocation108_spill] sm:$0xff]  ;;  %v8728_v55 = vld [vmem:[#allocation133_spill] sm:$0xff]  ;;  %v8729_v4 = vld [vmem:[#allocation11_spill] sm:$0xff] }
 0x257   : > { %v1589_v62 = vsel %vm1573_vm10, %v1556_v3, %v1277_v49  ;;  %v1395_v16 = vsel %vm1375_vm3, %v1362_v8, %v8723_v53  ;;  %v1429_v46 = vsel %vm1408_vm4, %v1396_v38, %v8724_v60  ;;  %v1525_v36 = vsel %vm1507_vm8, %v1492_v48, %v5759_v10  ;;  %v4329_v0 = vld [vmem:[%s4409_s29 + $0xf8] sm:$0xff]  ;;  %v8730_v45 = vld [vmem:[#allocation72_spill] sm:$0xff]  ;;  %v8733_v47 = vld [vmem:[#allocation98_spill] sm:$0xff] }
 0x258   : > { %4135 = vmatmul.mubr.msk.f32.gmra.mrb[14].mxu0 %vm1613_vm11, %v1589_v62  ;;  %v1559_v61 = vsel %vm1540_vm9, %v1526_v18, %v5876_v29  ;;  %v1428_v7 = vsel %vm1408_vm4, %v1395_v16, %v8725_v19  ;;  %v1462_v14 = vsel %vm1441_vm6, %v1429_v46, %v8726_v59  ;;  %v1558_v11 = vsel %vm1540_vm9, %v1525_v36, %v8727_v23  ;;  %v8731_v63 = vld [vmem:[#allocation8_spill] sm:$0xff]  ;;  %v8732_v24 = vld [vmem:[#allocation33_spill] sm:$0xff]  ;;  %v8734_v37 = vld [vmem:[#allocation30_spill] sm:$0xff] }
 0x259   : > { %4137 = vmatprep.mubr.msk.f32.mxu0 %vm1613_vm11, %v1590_v6  ;;  %v1283_v27 = vpop.permute.xlu1 %1282  ;;  %v1461_v10 = vsel %vm1441_vm6, %v1428_v7, %v8728_v55  ;;  %v1495_v29 = vsel %vm1474_vm7, %v1462_v14, %v8729_v4  ;;  %v1364_v33 = vsel %vm1342_vm2, %v4329_v0, %v8730_v45  ;;  %v8735_v50 = vld [vmem:[#allocation79_spill] sm:$0xff]  ;;  %v8736_v32 = vld [vmem:[#allocation42_spill] sm:$0xff]  ;;  %v4330_v1 = vld [vmem:[%s4409_s29 + $0x110] sm:$0xff] }
 0x25a   : > { %v1592_v30 = vsel %vm1573_vm10, %v1559_v61, %v1283_v27  ;;  %v1281_v57 = vpop.permute.xlu0 %1280  ;;  %v1494_v51 = vsel %vm1474_vm7, %v1461_v10, %v8731_v63  ;;  %v1528_v54 = vsel %vm1507_vm8, %v1495_v29, %v8732_v24  ;;  %v1397_v35 = vsel %vm1375_vm3, %v1364_v33, %v8733_v47  ;;  %v8737_v34 = vld [vmem:[#allocation110_spill] sm:$0xff]  ;;  %v8739_v9 = vld [vmem:[#allocation135_spill] sm:$0xff]  ;;  %v8741_v28 = vld [vmem:[#allocation100_spill] sm:$0xff] }
 0x25b   : > { %v1591_v21 = vsel %vm1573_vm10, %v1558_v11, %v1281_v57  ;;  %v1527_v25 = vsel %vm1507_vm8, %v1494_v51, %v8734_v37  ;;  %v1561_v5 = vsel %vm1540_vm9, %v1528_v54, %v8735_v50  ;;  %v1430_v58 = vsel %vm1408_vm4, %v1397_v35, %v8736_v32  ;;  %v8738_v41 = vld [vmem:[#allocation74_spill] sm:$0xff]  ;;  %v4331_v49 = vld [vmem:[%s4409_s29 + $0x108] sm:$0xff]  ;;  %v8743_v43 = vld [vmem:[#allocation101_spill] sm:$0xff] }
 0x25c   : > { %4138 = vmatmul.mubr.msk.f32.gmra.mrb[16].mxu0 %vm1613_vm11, %v1591_v21  ;;  %v1560_v12 = vsel %vm1540_vm9, %v1527_v25, %v8737_v34  ;;  %v1366_v17 = vsel %vm1342_vm2, %v4330_v1, %v8738_v41  ;;  %v1463_v3 = vsel %vm1441_vm6, %v1430_v58, %v8739_v9  ;;  %v8740_v44 = vld [vmem:[#allocation75_spill] sm:$0xff]  ;;  %v8742_v22 = vld [vmem:[#allocation10_spill] sm:$0xff]  ;;  %v8748_v16 = vld [vmem:[#allocation53_spill] sm:$0xff] }
 0x25d   : > { %4140 = vmatprep.mubr.msk.f32.mxu0 %vm1613_vm11, %v1592_v30  ;;  %v1287_v40 = vpop.permute.xlu1 %1286  ;;  %v1365_v52 = vsel %vm1342_vm2, %v4331_v49, %v8740_v44  ;;  %v1399_v56 = vsel %vm1375_vm3, %v1366_v17, %v8741_v28  ;;  %v1496_v31 = vsel %vm1474_vm7, %v1463_v3, %v8742_v22  ;;  %v8744_v15 = vld [vmem:[#allocation43_spill] sm:$0xff]  ;;  %v8747_v18 = vld [vmem:[#allocation14_spill] sm:$0xff]  ;;  %v8750_v27 = vld [vmem:[#allocation12_spill] sm:$0xff] }
 0x25e   : > { %v1594_v13 = vsel %vm1573_vm10, %v1561_v5, %v1287_v40  ;;  %v1285_v42 = vpop.permute.xlu0 %1284  ;;  %v1398_v62 = vsel %vm1375_vm3, %v1365_v52, %v8743_v43  ;;  %v1432_v20 = vsel %vm1408_vm4, %v1399_v56, %v8744_v15  ;;  %v8745_v8 = vld [vmem:[#allocation31_spill] sm:$0xff]  ;;  %v8751_v59 = vld [vmem:[#allocation13_spill] sm:$0xff]  ;;  %v8753_v30 = vld [vmem:[#allocation44_spill] sm:$0xff] }
 0x25f   : > { %v1593_v6 = vsel %vm1573_vm10, %v1560_v12, %v1285_v42  ;;  %v1529_v26 = vsel %vm1507_vm8, %v1496_v31, %v8745_v8  ;;  %v8746_v2 = vld [vmem:[#allocation123_spill] sm:$0xff]  ;;  %v1465_v53 = vsel %vm1441_vm6, %v1432_v20, %v8747_v18  ;;  %v8754_v45 = vld [vmem:[#allocation76_spill] sm:$0xff]  ;;  %v4333_v51 = vld [vmem:[%s4409_s29 + $0x120] sm:$0xff] }
 0x260   : > { %4141 = vmatmul.mubr.msk.f32.gmra.mrb[18].mxu0 %vm1613_vm11, %v1593_v6  ;;  %v1431_v48 = vsel %vm1408_vm4, %v1398_v62, %v8746_v2  ;;  %v1562_v60 = vsel %vm1540_vm9, %v1529_v26, %v8748_v16  ;;  %v8749_v36 = vld [vmem:[#allocation15_spill] sm:$0xff]  ;;  %v1498_v19 = vsel %vm1474_vm7, %v1465_v53, %v8750_v27  ;;  %v8755_v24 = vld [vmem:[#allocation77_spill] sm:$0xff]  ;;  %v8756_v47 = vld [vmem:[#allocation102_spill] sm:$0xff] }
 0x261   : > { %4143 = vmatprep.mubr.msk.f32.mxu0 %vm1613_vm11, %v1594_v13  ;;  %v1197_v38 = vpop.permute.xlu1 %1196  ;;  %v1464_v61 = vsel %vm1441_vm6, %v1431_v48, %v8749_v36  ;;  %v8752_v23 = vld [vmem:[#allocation47_spill] sm:$0xff]  ;;  %v1367_v54 = vsel %vm1342_vm2, %v4333_v51, %v8755_v24  ;;  %v8758_v25 = vld [vmem:[#allocation45_spill] sm:$0xff]  ;;  %v8759_v40 = vld [vmem:[#allocation124_spill] sm:$0xff] }
 0x262   : > { %v1289_v46 = vpop.permute.xlu0 %1288  ;;  %v1497_v14 = vsel %vm1474_vm7, %v1464_v61, %v8751_v59  ;;  %v1531_v11 = vsel %vm1507_vm8, %v1498_v19, %v8752_v23  ;;  %v4332_v0 = vld [vmem:[%s4409_s29 + $0x128] sm:$0xff]  ;;  %v8760_v58 = vld [vmem:[#allocation18_spill] sm:$0xff]  ;;  %v8762_v1 = vld [vmem:[#allocation16_spill] sm:$0xff]  ;;  %s4353_s29 = smov 56  }
 0x263   : > { %v1595_v7 = vsel %vm1573_vm10, %v1562_v60, %v1289_v46  ;;  %v1530_v57 = vsel %vm1507_vm8, %v1497_v14, %v8753_v30  ;;  %v1564_v55 = vsel %vm1540_vm9, %v1531_v11, %v1197_v38  ;;  %v1368_v33 = vsel %vm1342_vm2, %v4332_v0, %v8754_v45  ;;  %v8757_v37 = vld [vmem:[#allocation103_spill] sm:$0xff]  ;;  %v8763_v17 = vld [vmem:[#allocation17_spill] sm:$0xff]  ;;  %v8764_v3 = vld [vmem:[#allocation46_spill] sm:$0xff] }
 0x264   : > { %4144 = vmatmul.mubr.msk.f32.gmra.mrb[20].mxu0 %vm1613_vm11, %v1595_v7  ;;  %v1563_v4 = vsel %vm1540_vm9, %v1530_v57, %v5912_v39  ;;  %v1401_v35 = vsel %vm1375_vm3, %v1368_v33, %v8756_v47  ;;  %v1400_v39 = vsel %vm1375_vm3, %v1367_v54, %v8757_v37  ;;  %v8761_v13 = vld [vmem:[#allocation19_spill] sm:$0xff]  ;;  %v8765_v49 = vld [vmem:[#allocation32_spill] sm:$0xff]  ;;  %v8766_v20 = vld [vmem:[#allocation34_spill] sm:$0xff]  ;;  %vm3346_vm2 = vcmask 523264  }
 0x265   : > { %v1293_v10 = vpop.permute.xlu1 %1292  ;;  %v1434_v50 = vsel %vm1408_vm4, %v1401_v35, %v8758_v25  ;;  %v1433_v32 = vsel %vm1408_vm4, %v1400_v39, %v8759_v40  ;;  %v8767_v8 = vld [vmem:[#allocation20_spill] sm:$0xff]  ;;  %v8768_v38 = vld [vmem:[#allocation35_spill] sm:$0xff]  ;;  %v8769_v2 = vld [vmem:[#allocation21_spill] sm:$0xff]  ;;  %vm3386_vm4 = vcmask 588800  }
 0x266   : > { %v1597_v29 = vsel %vm1573_vm10, %v1564_v55, %v1293_v10  ;;  %v1291_v21 = vpop.permute.xlu0 %1290  ;;  %v1467_v34 = vsel %vm1441_vm6, %v1434_v50, %v8760_v58  ;;  %v1466_v42 = vsel %vm1441_vm6, %v1433_v32, %v8761_v13  ;;  %v1535_v26 = vsel %vm1507_vm8, %v8767_v8, %v8766_v20  ;;  %v8770_v19 = vld [vmem:[#allocation36_spill] sm:$0xff]  ;;  %v8772_v14 = vld [vmem:[#allocation37_spill] sm:$0xff]  ;;  %v8776_v51 = vld [vmem:[#allocation138_spill] sm:$0xff] }
 0x267   : > { %v1596_v63 = vsel %vm1573_vm10, %v1563_v4, %v1291_v21  ;;  %v1500_v41 = vsel %vm1474_vm7, %v1467_v34, %v8762_v1  ;;  %v1499_v9 = vsel %vm1474_vm7, %v1466_v42, %v8763_v17  ;;  %v1534_v48 = vsel %vm1507_vm8, %v8769_v2, %v8768_v38  ;;  %v8771_v7 = vld [vmem:[#allocation24_spill] sm:$0xff]  ;;  %v8773_v23 = vld [vmem:[#allocation25_spill] sm:$0xff]  ;;  %v6380_v17 = vld [vmem:[%s8162_s2] ss:$0 sm:$0xff] }
 0x268   : > { %4146 = vmatprep.mubr.msk.f32.mxu0 %vm1613_vm11, %v1596_v63  ;;  %v1533_v6 = vsel %vm1507_vm8, %v1500_v41, %v8764_v3  ;;  %v1532_v44 = vsel %vm1507_vm8, %v1499_v9, %v8765_v49  ;;  %v1537_v59 = vsel %vm1507_vm8, %v8771_v7, %v8770_v19  ;;  %v1536_v11 = vsel %vm1507_vm8, %v8773_v23, %v8772_v14  ;;  %v8774_v45 = vld [vmem:[#allocation137_spill] sm:$0xff]  ;;  %v8775_v33 = vld [vmem:[#allocation28_spill] sm:$0xff] }
 0x269   : > { %4147 = vmatmul.mubr.msk.f32.gmra.mrb[22].mxu0 %vm1613_vm11, %v1597_v29  ;;  %v1201_v5 = vpop.permute.xlu1 %1200  ;;  %v1539_v63 = vsel %vm1507_vm8, %v8775_v33, %v8774_v45  ;;  %v8777_v24 = vld [vmem:[#allocation29_spill] sm:$0xff] }
 0x26a   : > { %v1199_v12 = vpop.permute.xlu0 %1198  ;;  %v1566_v52 = vsel %vm1540_vm9, %v1533_v6, %v1201_v5  ;;  %v1538_v54 = vsel %vm1507_vm8, %v8777_v24, %v8776_v51  ;;  %v4350_v5 = vmov 0.0  }
 0x26b   : > { %v1565_v56 = vsel %vm1540_vm9, %v1532_v44, %v1199_v12  ;;  %v6358_v40 = vrot.slane %v4350_v5, 7 }
 0x26d   : > { %v1297_v28 = vpop.permute.xlu1 %1296  ;;  %8778 = vst [vmem:[#allocation105_spill] sm:$0xff] %v6358_v40  ;;  %v6362_v32 = vsel %vm2004_vm12, 0.0, %v6358_v40  ;;  %v6366_v58 = vsel %vm2004_vm12, %v6358_v40, 0.0  ;;  %v2180_v12 = vrot.slane %v6358_v40, 1 }
 0x26e   : > { %v1599_v22 = vsel %vm1573_vm10, %v1566_v52, %v1297_v28  ;;  %v1295_v31 = vpop.permute.xlu0 %1294  ;;  %8779 = vst [vmem:[#allocation51_spill] sm:$0xff] %v6362_v32  ;;  %v2179_v34 = vrot.slane %v6362_v32, 1  ;;  %v2182_v13 = vrot.slane %v6366_v58, 1 }
 0x26f   : > { %v1598_v43 = vsel %vm1573_vm10, %v1565_v56, %v1295_v31 }
 0x270   : > { %4149 = vmatprep.mubr.msk.f32.mxu0 %vm1613_vm11, %v1598_v43  ;;  %v2181_v42 = vsel %vm386_vm0, %v2179_v34, %v2180_v12  ;;  %v2183_v1 = vsel %vm386_vm0, %v2180_v12, %v2182_v13 }
 0x271   : > { %4150 = vmatmul.mubr.msk.f32.gmra.mrb[24].mxu0 %vm1613_vm11, %v1599_v22  ;;  %v1205_v62 = vpop.permute.xlu1 %1204  ;;  %v6373_v41 = vpack.i.bf16 %v2183_v1, %v2181_v42 }
 0x272   : > { %v1203_v15 = vpop.permute.xlu0 %1202  ;;  %v1568_v18 = vsel %vm1540_vm9, %v1535_v26, %v1205_v62 }
 0x273   : > { %v1567_v16 = vsel %vm1540_vm9, %v1534_v48, %v1203_v15  ;;  %8780 = vst [vmem:[#allocation55_spill] sm:$0xff] %v6373_v41  ;;  %4284 = vrot.lane.b32.xlu0 %v6373_v41, %s4343_s8 }
 0x275   : > { %v1301_v53 = vpop.permute.xlu1 %1300 }
 0x276   : > { %v1601_v60 = vsel %vm1573_vm10, %v1568_v18, %v1301_v53  ;;  %v1299_v46 = vpop.permute.xlu0 %1298 }
 0x277   : > { %v1600_v36 = vsel %vm1573_vm10, %v1567_v16, %v1299_v46 }
 0x278   : > { %4152 = vmatprep.mubr.msk.f32.mxu0 %vm1613_vm11, %v1600_v36 }
 0x279   : > { %4153 = vmatmul.mubr.msk.f32.gmra.mrb[26].mxu0 %vm1613_vm11, %v1601_v60  ;;  %v1209_v61 = vpop.permute.xlu1 %1208 }
 0x27a   : > { %v1207_v27 = vpop.permute.xlu0 %1206  ;;  %v1570_v30 = vsel %vm1540_vm9, %v1537_v59, %v1209_v61 }
 0x27b   : > { %v1569_v55 = vsel %vm1540_vm9, %v1536_v11, %v1207_v27 }
 0x27d   : > { %v1305_v57 = vpop.permute.xlu1 %1304 }
 0x27e   : > { %v1603_v10 = vsel %vm1573_vm10, %v1570_v30, %v1305_v57  ;;  %v1303_v4 = vpop.permute.xlu0 %1302 }
 0x27f   : > { %v1602_v29 = vsel %vm1573_vm10, %v1569_v55, %v1303_v4 }
 0x280   : > { %4155 = vmatprep.mubr.msk.f32.mxu0 %vm1613_vm11, %v1602_v29 }
 0x281   : > { %4156 = vmatmul.mubr.msk.f32.gmra.mrb[28].mxu0 %vm1613_vm11, %v1603_v10  ;;  %v1213_v21 = vpop.permute.xlu1 %1212 }
 0x282   : > { %v1211_v0 = vpop.permute.xlu0 %1210  ;;  %v1572_v47 = vsel %vm1540_vm9, %v1539_v63, %v1213_v21 }
 0x283   : > { %v1571_v37 = vsel %vm1540_vm9, %v1538_v54, %v1211_v0 }
 0x285   : > { %v1309_v35 = vpop.permute.xlu1 %1308 }
 0x286   : > { %v1605_v39 = vsel %vm1573_vm10, %v1572_v47, %v1309_v35  ;;  %v1307_v25 = vpop.permute.xlu0 %1306 }
 0x287   : > { %v1604_v50 = vsel %vm1573_vm10, %v1571_v37, %v1307_v25 }
 0x288   : > { %4158 = vmatprep.mubr.msk.f32.mxu0 %vm1613_vm11, %v1604_v50 }
 0x289   : > { %4159 = vmatmul.mubr.msk.f32.gmra.mrb[30].mxu0 %vm1613_vm11, %v1605_v39 }
 0x30f   : > { %v4115_v9 = vpop.f32.mrb[0].mxu0 }
 0x310   : > { %v1786_v3 = vadd.f32 %v4115_v9, %v6380_v17  ;;  %v1780_v6 = vpop.f32.mrb[1].mxu0 }
 0x311   : > { %v1781_v49 = vadd.f32 %v6380_v17, %v1780_v6 }
 0x312   : > { %v1940_v44 = vmax.f32 %v1786_v3, 0.0 }
 0x313   : > { %v1939_v52 = vmax.f32 %v1781_v49, 0.0  ;;  %v4118_v28 = vpop.f32.mrb[2].mxu0 }
 0x314   : > { %v2008_v56 = vrot.slane %v1940_v44, 7  ;;  %v1796_v22 = vadd.f32 %v4118_v28, %v6380_v17  ;;  %v1790_v31 = vpop.f32.mrb[3].mxu0 }
 0x315   : > { %v2007_v43 = vrot.slane %v1939_v52, 7  ;;  %v1791_v62 = vadd.f32 %v6380_v17, %v1790_v31 }
 0x316   : > { %v6387_v15 = vsel %vm2004_vm12, %v2008_v56, 0.0  ;;  %v1942_v20 = vmax.f32 %v1796_v22, 0.0 }
 0x317   : > { %v6390_v8 = vsel %vm2004_vm12, %v2007_v43, %v2008_v56  ;;  %v6393_v26 = vsel %vm2004_vm12, 0.0, %v2007_v43  ;;  %v4121_v38 = vpop.f32.mrb[4].mxu0  ;;  %v2187_v2 = vrot.slane %v6387_v15, 1  ;;  %v1941_v53 = vmax.f32 %v1791_v62, 0.0 }
 0x318   : > { %v2184_v48 = vrot.slane %v6393_v26, 1  ;;  %v2011_v18 = vrot.slane %v1942_v20, 7  ;;  %v1800_v16 = vpop.f32.mrb[5].mxu0  ;;  %v1806_v60 = vadd.f32 %v4121_v38, %v6380_v17  ;;  %v2185_v36 = vrot.slane %v6390_v8, 1 }
 0x319   : > { %v1801_v46 = vadd.f32 %v6380_v17, %v1800_v16  ;;  %v2010_v27 = vrot.slane %v1941_v53, 7 }
 0x31a   : > { %v6401_v61 = vsel %vm2004_vm12, %v2011_v18, 0.0  ;;  %v1944_v7 = vmax.f32 %v1806_v60, 0.0  ;;  %v6411_v30 = vsel %vm386_vm0, %v2185_v36, %v2187_v2  ;;  %v6414_v57 = vsel %vm386_vm0, %v2184_v48, %v2185_v36 }
 0x31b   : > { %v2192_v19 = vrot.slane %v6401_v61, 1  ;;  %v1943_v59 = vmax.f32 %v1801_v46, 0.0  ;;  %v4124_v14 = vpop.f32.mrb[6].mxu0  ;;  %v6405_v23 = vsel %vm2004_vm12, %v2010_v27, %v2011_v18  ;;  %v6408_v11 = vsel %vm2004_vm12, 0.0, %v2010_v27  ;;  %8781 = vst [vmem:[#allocation81_spill] sm:$0xff] %v6411_v30  ;;  %2357 = vrot.lane.b32.xlu0 %v6411_v30, %s4343_s8  ;;  %2355 = vrot.lane.b32.xlu1 %v6414_v57, %s4343_s8 }
 0x31c   : > { %v1810_v55 = vpop.f32.mrb[7].mxu0  ;;  %v2014_v10 = vrot.slane %v1944_v7, 7  ;;  %v1816_v29 = vadd.f32 %v4124_v14, %v6380_v17  ;;  %v2190_v0 = vrot.slane %v6405_v23, 1  ;;  %v2189_v45 = vrot.slane %v6408_v11, 1 }
 0x31d   : > { %v2013_v4 = vrot.slane %v1943_v59, 7  ;;  %v1811_v21 = vadd.f32 %v6380_v17, %v1810_v55 }
 0x31e   : > { %v6425_v33 = vsel %vm2004_vm12, %v2014_v10, 0.0  ;;  %v1946_v24 = vmax.f32 %v1816_v29, 0.0  ;;  %v6435_v37 = vsel %vm386_vm0, %v2190_v0, %v2192_v19  ;;  %v6440_v50 = vsel %vm386_vm0, %v2189_v45, %v2190_v0 }
 0x31f   : > { %v6428_v63 = vsel %vm2004_vm12, %v2013_v4, %v2014_v10  ;;  %v6431_v51 = vsel %vm2004_vm12, 0.0, %v2013_v4  ;;  %v4127_v54 = vpop.f32.mrb[8].mxu0  ;;  %v2197_v47 = vrot.slane %v6425_v33, 1  ;;  %v1945_v35 = vmax.f32 %v1811_v21, 0.0  ;;  %8782 = vst [vmem:[#allocation78_spill] sm:$0xff] %v6435_v37  ;;  %2361 = vrot.lane.b32.xlu0 %v6435_v37, %s4343_s8  ;;  %2359 = vrot.lane.b32.xlu1 %v6440_v50, %s4343_s8 }
 0x320   : > { %v1820_v39 = vpop.f32.mrb[9].mxu0  ;;  %v2017_v25 = vrot.slane %v1946_v24, 7  ;;  %v1826_v5 = vadd.f32 %v4127_v54, %v6380_v17  ;;  %v2195_v13 = vrot.slane %v6428_v63, 1  ;;  %v2194_v42 = vrot.slane %v6431_v51, 1 }
 0x321   : > { %v1821_v34 = vadd.f32 %v6380_v17, %v1820_v39  ;;  %v2016_v12 = vrot.slane %v1945_v35, 7 }
 0x322   : > { %v6449_v1 = vsel %vm2004_vm12, %v2017_v25, 0.0  ;;  %v1948_v9 = vmax.f32 %v1826_v5, 0.0  ;;  %v6459_v31 = vsel %vm386_vm0, %v2195_v13, %v2197_v47  ;;  %v6462_v43 = vsel %vm386_vm0, %v2194_v42, %v2195_v13 }
 0x323   : > { %v1947_v3 = vmax.f32 %v1821_v34, 0.0  ;;  %v4130_v6 = vpop.f32.mrb[10].mxu0  ;;  %v2202_v49 = vrot.slane %v6449_v1, 1  ;;  %v6453_v44 = vsel %vm2004_vm12, %v2016_v12, %v2017_v25  ;;  %v6456_v52 = vsel %vm2004_vm12, 0.0, %v2016_v12  ;;  %8783 = vst [vmem:[#allocation107_spill] sm:$0xff] %v6459_v31  ;;  %8784 = vst [vmem:[#allocation104_spill] sm:$0xff] %v6462_v43  ;;  %2365 = vrot.lane.b32.xlu0 %v6459_v31, %s4343_s8  ;;  %2363 = vrot.lane.b32.xlu1 %v6462_v43, %s4343_s8 }
 0x324   : > { %v1830_v28 = vpop.f32.mrb[11].mxu0  ;;  %v2020_v56 = vrot.slane %v1948_v9, 7  ;;  %v1836_v62 = vadd.f32 %v4130_v6, %v6380_v17  ;;  %v2200_v38 = vrot.slane %v6453_v44, 1  ;;  %v2199_v2 = vrot.slane %v6456_v52, 1 }
 0x325   : > { %v2019_v22 = vrot.slane %v1947_v3, 7  ;;  %v1831_v20 = vadd.f32 %v6380_v17, %v1830_v28  ;;  %v2264_v43 = vrot.slane %v6393_v26, 2 }
 0x326   : > { %v6473_v48 = vsel %vm2004_vm12, %v2020_v56, 0.0  ;;  %v1950_v46 = vmax.f32 %v1836_v62, 0.0  ;;  %v6483_v19 = vsel %vm386_vm0, %v2200_v38, %v2202_v49  ;;  %v6486_v7 = vsel %vm386_vm0, %v2199_v2, %v2200_v38 }
 0x327   : > { %v6476_v18 = vsel %vm2004_vm12, %v2019_v22, %v2020_v56  ;;  %v6479_v53 = vsel %vm2004_vm12, 0.0, %v2019_v22  ;;  %v4133_v16 = vpop.f32.mrb[12].mxu0  ;;  %v2207_v60 = vrot.slane %v6473_v48, 1  ;;  %v1949_v36 = vmax.f32 %v1831_v20, 0.0  ;;  %8785 = vst [vmem:[#allocation57_spill] sm:$0xff] %v6483_v19  ;;  %8786 = vst [vmem:[#allocation48_spill] sm:$0xff] %v6486_v7  ;;  %2369 = vrot.lane.b32.xlu0 %v6483_v19, %s4343_s8  ;;  %2367 = vrot.lane.b32.xlu1 %v6486_v7, %s4343_s8 }
 0x328   : > { %v1840_v27 = vpop.f32.mrb[13].mxu0  ;;  %v1846_v59 = vadd.f32 %v4133_v16, %v6380_v17  ;;  %v2023_v55 = vrot.slane %v1950_v46, 7  ;;  %v2205_v4 = vrot.slane %v6476_v18, 1  ;;  %v2204_v29 = vrot.slane %v6479_v53, 1 }
 0x329   : > { %v1841_v14 = vadd.f32 %v6380_v17, %v1840_v27  ;;  %v2022_v10 = vrot.slane %v1949_v36, 7 }
 0x32a   : > { %v1952_v21 = vmax.f32 %v1846_v59, 0.0  ;;  %v6497_v24 = vsel %vm2004_vm12, %v2023_v55, 0.0  ;;  %v6506_v35 = vsel %vm386_vm0, %v2205_v4, %v2207_v60  ;;  %v6512_v12 = vsel %vm386_vm0, %v2204_v29, %v2205_v4 }
 0x32b   : > { %v1951_v0 = vmax.f32 %v1841_v14, 0.0  ;;  %v4136_v45 = vpop.f32.mrb[14].mxu0  ;;  %v6500_v54 = vsel %vm2004_vm12, %v2022_v10, %v2023_v55  ;;  %v6503_v47 = vsel %vm2004_vm12, 0.0, %v2022_v10  ;;  %8789 = vst [vmem:[#allocation80_spill] sm:$0xff] %v6506_v35  ;;  %v2212_v25 = vrot.slane %v6497_v24, 1  ;;  %2373 = vrot.lane.b32.xlu0 %v6506_v35, %s4343_s8  ;;  %8790 = vst [vmem:[#allocation111_spill] sm:$0xff] %v6512_v12  ;;  %2371 = vrot.lane.b32.xlu1 %v6512_v12, %s4343_s8 }
 0x32c   : > { %8787 = vst [vmem:[#allocation54_spill] sm:$0xff] %v6500_v54  ;;  %8788 = vst [vmem:[#allocation83_spill] sm:$0xff] %v6503_v47  ;;  %v1850_v39 = vpop.f32.mrb[15].mxu0  ;;  %v2026_v5 = vrot.slane %v1952_v21, 7  ;;  %v1856_v13 = vadd.f32 %v4136_v45, %v6380_v17  ;;  %v2210_v9 = vrot.slane %v6500_v54, 1  ;;  %v2209_v28 = vrot.slane %v6503_v47, 1 }
 0x32d   : > { %v2025_v34 = vrot.slane %v1951_v0, 7  ;;  %v1851_v42 = vadd.f32 %v6380_v17, %v1850_v39 }
 0x32e   : > { %v6518_v3 = vsel %vm2004_vm12, %v2026_v5, 0.0  ;;  %v1954_v62 = vmax.f32 %v1856_v13, 0.0  ;;  %v6531_v2 = vsel %vm386_vm0, %v2210_v9, %v2212_v25  ;;  %v6534_v16 = vsel %vm386_vm0, %v2209_v28, %v2210_v9 }
 0x32f   : > { %v6521_v6 = vsel %vm2004_vm12, %v2025_v34, %v2026_v5  ;;  %v6524_v49 = vsel %vm2004_vm12, 0.0, %v2025_v34  ;;  %v4139_v56 = vpop.f32.mrb[16].mxu0  ;;  %v2217_v22 = vrot.slane %v6518_v3, 1  ;;  %v1953_v20 = vmax.f32 %v1851_v42, 0.0  ;;  %8792 = vst [vmem:[#allocation59_spill] sm:$0xff] %v6531_v2  ;;  %8793 = vst [vmem:[#allocation49_spill] sm:$0xff] %v6534_v16  ;;  %2377 = vrot.lane.b32.xlu0 %v6531_v2, %s4343_s8  ;;  %2375 = vrot.lane.b32.xlu1 %v6534_v16, %s4343_s8 }
 0x330   : > { %8791 = vst [vmem:[#allocation106_spill] sm:$0xff] %v6521_v6  ;;  %v1860_v38 = vpop.f32.mrb[17].mxu0  ;;  %v1866_v60 = vadd.f32 %v4139_v56, %v6380_v17  ;;  %v2029_v36 = vrot.slane %v1954_v62, 7  ;;  %v2215_v59 = vrot.slane %v6521_v6, 1  ;;  %v2214_v14 = vrot.slane %v6524_v49, 1 }
 0x331   : > { %v1861_v46 = vadd.f32 %v6380_v17, %v1860_v38  ;;  %v2028_v27 = vrot.slane %v1953_v20, 7 }
 0x332   : > { %v1956_v55 = vmax.f32 %v1866_v60, 0.0  ;;  %v6545_v29 = vsel %vm2004_vm12, %v2029_v36, 0.0  ;;  %v6554_v45 = vsel %vm386_vm0, %v2215_v59, %v2217_v22  ;;  %v6560_v13 = vsel %vm386_vm0, %v2214_v14, %v2215_v59 }
 0x333   : > { %v1955_v10 = vmax.f32 %v1861_v46, 0.0  ;;  %v4142_v4 = vpop.f32.mrb[18].mxu0  ;;  %v6548_v21 = vsel %vm2004_vm12, %v2028_v27, %v2029_v36  ;;  %v6551_v0 = vsel %vm2004_vm12, 0.0, %v2028_v27  ;;  %8796 = vst [vmem:[#allocation82_spill] sm:$0xff] %v6554_v45  ;;  %v2222_v25 = vrot.slane %v6545_v29, 1  ;;  %2381 = vrot.lane.b32.xlu0 %v6554_v45, %s4343_s8  ;;  %8797 = vst [vmem:[#allocation113_spill] sm:$0xff] %v6560_v13  ;;  %2379 = vrot.lane.b32.xlu1 %v6560_v13, %s4343_s8 }
 0x334   : > { %8794 = vst [vmem:[#allocation56_spill] sm:$0xff] %v6548_v21  ;;  %8795 = vst [vmem:[#allocation85_spill] sm:$0xff] %v6551_v0  ;;  %v1870_v39 = vpop.f32.mrb[19].mxu0  ;;  %v2032_v5 = vrot.slane %v1956_v55, 7  ;;  %v1876_v42 = vadd.f32 %v4142_v4, %v6380_v17  ;;  %v2220_v28 = vrot.slane %v6548_v21, 1  ;;  %v2219_v20 = vrot.slane %v6551_v0, 1 }
 0x335   : > { %v2031_v34 = vrot.slane %v1955_v10, 7  ;;  %v1871_v9 = vadd.f32 %v6380_v17, %v1870_v39 }
 0x336   : > { %v6566_v56 = vsel %vm2004_vm12, %v2032_v5, 0.0  ;;  %v1958_v46 = vmax.f32 %v1876_v42, 0.0  ;;  %v6579_v59 = vsel %vm386_vm0, %v2220_v28, %v2222_v25  ;;  %v6582_v14 = vsel %vm386_vm0, %v2219_v20, %v2220_v28 }
 0x337   : > { %v6569_v22 = vsel %vm2004_vm12, %v2031_v34, %v2032_v5  ;;  %v6572_v62 = vsel %vm2004_vm12, 0.0, %v2031_v34  ;;  %v4145_v38 = vpop.f32.mrb[20].mxu0  ;;  %v2227_v60 = vrot.slane %v6566_v56, 1  ;;  %v1957_v36 = vmax.f32 %v1871_v9, 0.0  ;;  %8800 = vst [vmem:[#allocation58_spill] sm:$0xff] %v6579_v59  ;;  %8801 = vst [vmem:[#allocation87_spill] sm:$0xff] %v6582_v14  ;;  %2385 = vrot.lane.b32.xlu0 %v6579_v59, %s4343_s8  ;;  %2383 = vrot.lane.b32.xlu1 %v6582_v14, %s4343_s8 }
 0x338   : > { %8798 = vst [vmem:[#allocation109_spill] sm:$0xff] %v6569_v22  ;;  %8799 = vst [vmem:[#allocation61_spill] sm:$0xff] %v6572_v62  ;;  %v1880_v27 = vpop.f32.mrb[21].mxu0  ;;  %v1886_v55 = vadd.f32 %v4145_v38, %v6380_v17  ;;  %v2035_v4 = vrot.slane %v1958_v46, 7  ;;  %v2225_v5 = vrot.slane %v6569_v22, 1  ;;  %v2224_v34 = vrot.slane %v6572_v62, 1 }
 0x339   : > { %v1881_v10 = vadd.f32 %v6380_v17, %v1880_v27  ;;  %v2034_v39 = vrot.slane %v1957_v36, 7 }
 0x33a   : > { %v1960_v25 = vmax.f32 %v1886_v55, 0.0  ;;  %v6593_v9 = vsel %vm2004_vm12, %v2035_v4, 0.0  ;;  %v6602_v38 = vsel %vm386_vm0, %v2225_v5, %v2227_v60  ;;  %v6608_v55 = vsel %vm386_vm0, %v2224_v34, %v2225_v5 }
 0x33b   : > { %v1959_v42 = vmax.f32 %v1881_v10, 0.0  ;;  %v6596_v28 = vsel %vm2004_vm12, %v2034_v39, %v2035_v4  ;;  %v6599_v20 = vsel %vm2004_vm12, 0.0, %v2034_v39  ;;  %8802 = vst [vmem:[#allocation84_spill] sm:$0xff] %v6602_v38  ;;  %v2232_v36 = vrot.slane %v6593_v9, 1  ;;  %2389 = vrot.lane.b32.xlu0 %v6602_v38, %s4343_s8  ;;  %8803 = vst [vmem:[#allocation115_spill] sm:$0xff] %v6608_v55  ;;  %2387 = vrot.lane.b32.xlu1 %v6608_v55, %s4343_s8 }
 0x33c   : > { %v4148_v46 = vpop.f32.mrb[22].mxu0  ;;  %v2038_v27 = vrot.slane %v1960_v25, 7  ;;  %v2230_v39 = vrot.slane %v6596_v28, 1  ;;  %v2229_v5 = vrot.slane %v6599_v20, 1 }
 0x33d   : > { %v2037_v41 = vrot.slane %v1959_v42, 7  ;;  %v1890_v59 = vpop.f32.mrb[23].mxu0  ;;  %v1896_v10 = vadd.f32 %v4148_v46, %v6380_v17 }
 0x33e   : > { %v1891_v4 = vadd.f32 %v6380_v17, %v1890_v59  ;;  %v6614_v60 = vsel %vm2004_vm12, %v2038_v27, 0.0  ;;  %v6627_v46 = vsel %vm386_vm0, %v2230_v39, %v2232_v36  ;;  %v6630_v38 = vsel %vm386_vm0, %v2229_v5, %v2230_v39 }
 0x33f   : > { %v6617_v14 = vsel %vm2004_vm12, %v2037_v41, %v2038_v27  ;;  %v6620_v25 = vsel %vm2004_vm12, 0.0, %v2037_v41  ;;  %v2237_v34 = vrot.slane %v6614_v60, 1  ;;  %v1962_v42 = vmax.f32 %v1896_v10, 0.0  ;;  %8804 = vst [vmem:[#allocation112_spill] sm:$0xff] %v6627_v46  ;;  %8805 = vst [vmem:[#allocation63_spill] sm:$0xff] %v6630_v38  ;;  %2393 = vrot.lane.b32.xlu0 %v6627_v46, %s4343_s8  ;;  %2391 = vrot.lane.b32.xlu1 %v6630_v38, %s4343_s8 }
 0x340   : > { %v1961_v59 = vmax.f32 %v1891_v4, 0.0  ;;  %v2235_v27 = vrot.slane %v6617_v14, 1  ;;  %v2234_v41 = vrot.slane %v6620_v25, 1 }
 0x341   : > { %v2041_v45 = vrot.slane %v1962_v42, 7 }
 0x342   : > { %v2040_v13 = vrot.slane %v1961_v59, 7  ;;  %v6639_v10 = vsel %vm386_vm0, %v2235_v27, %v2237_v34  ;;  %v6651_v5 = vsel %vm386_vm0, %v2234_v41, %v2235_v27 }
 0x343   : > { %8806 = vst [vmem:[#allocation50_spill] sm:$0xff] %v6639_v10  ;;  %v6642_v36 = vsel %vm2004_vm12, %v2041_v45, 0.0  ;;  %8807 = vst [vmem:[#allocation60_spill] sm:$0xff] %v6651_v5  ;;  %2397 = vrot.lane.b32.xlu0 %v6639_v10, %s4343_s8  ;;  %2395 = vrot.lane.b32.xlu1 %v6651_v5, %s4343_s8 }
 0x344   : > { %v6645_v4 = vsel %vm2004_vm12, %v2040_v13, %v2041_v45  ;;  %v6648_v39 = vsel %vm2004_vm12, 0.0, %v2040_v13  ;;  %v4151_v42 = vpop.f32.mrb[24].mxu0  ;;  %v2242_v59 = vrot.slane %v6642_v36, 1 }
 0x345   : > { %v1906_v46 = vadd.f32 %v4151_v42, %v6380_v17  ;;  %v1900_v38 = vpop.f32.mrb[25].mxu0  ;;  %v2240_v34 = vrot.slane %v6645_v4, 1  ;;  %v2239_v55 = vrot.slane %v6648_v39, 1 }
 0x346   : > { %v1901_v45 = vadd.f32 %v6380_v17, %v1900_v38 }
 0x347   : > { %v1964_v13 = vmax.f32 %v1906_v46, 0.0  ;;  %v6663_v27 = vsel %vm386_vm0, %v2240_v34, %v2242_v59  ;;  %v6666_v42 = vsel %vm386_vm0, %v2239_v55, %v2240_v34 }
 0x348   : > { %8808 = vst [vmem:[#allocation89_spill] sm:$0xff] %v6663_v27  ;;  %v1963_v41 = vmax.f32 %v1901_v45, 0.0  ;;  %8809 = vst [vmem:[#allocation22_spill] sm:$0xff] %v6666_v42  ;;  %2401 = vrot.lane.b32.xlu0 %v6663_v27, %s4343_s8  ;;  %2399 = vrot.lane.b32.xlu1 %v6666_v42, %s4343_s8 }
 0x349   : > { %v2044_v2 = vrot.slane %v1964_v13, 7 }
 0x34a   : > { %v2043_v16 = vrot.slane %v1963_v41, 7 }
 0x34b   : > { %v6671_v38 = vsel %vm2004_vm12, %v2044_v2, 0.0 }
 0x34c   : > { %v2247_v46 = vrot.slane %v6671_v38, 1  ;;  %v6677_v59 = vsel %vm2004_vm12, %v2043_v16, %v2044_v2  ;;  %v6680_v45 = vsel %vm2004_vm12, 0.0, %v2043_v16  ;;  %v4154_v55 = vpop.f32.mrb[26].mxu0 }
 0x34d   : > { %8810 = vst [vmem:[#allocation86_spill] sm:$0xff] %v6677_v59  ;;  %8811 = vst [vmem:[#allocation117_spill] sm:$0xff] %v6680_v45  ;;  %v1916_v34 = vadd.f32 %v4154_v55, %v6380_v17  ;;  %v1910_v13 = vpop.f32.mrb[27].mxu0  ;;  %v2245_v41 = vrot.slane %v6677_v59, 1  ;;  %v2244_v27 = vrot.slane %v6680_v45, 1 }
 0x34e   : > { %v1911_v10 = vadd.f32 %v6380_v17, %v1910_v13 }
 0x34f   : > { %v1966_v5 = vmax.f32 %v1916_v34, 0.0  ;;  %v6687_v42 = vsel %vm386_vm0, %v2245_v41, %v2247_v46  ;;  %v6690_v2 = vsel %vm386_vm0, %v2244_v27, %v2245_v41 }
 0x350   : > { %8812 = vst [vmem:[#allocation114_spill] sm:$0xff] %v6687_v42  ;;  %8813 = vst [vmem:[#allocation126_spill] sm:$0xff] %v6690_v2  ;;  %v1965_v35 = vmax.f32 %v1911_v10, 0.0  ;;  %2405 = vrot.lane.b32.xlu0 %v6687_v42, %s4343_s8  ;;  %2403 = vrot.lane.b32.xlu1 %v6690_v2, %s4343_s8 }
 0x351   : > { %v2047_v16 = vrot.slane %v1966_v5, 7 }
 0x352   : > { %v2046_v55 = vrot.slane %v1965_v35, 7 }
 0x353   : > { %v6697_v12 = vsel %vm2004_vm12, %v2047_v16, 0.0 }
 0x354   : > { %v2252_v34 = vrot.slane %v6697_v12, 1  ;;  %v6701_v46 = vsel %vm2004_vm12, %v2046_v55, %v2047_v16  ;;  %v6704_v27 = vsel %vm2004_vm12, 0.0, %v2046_v55  ;;  %v4157_v10 = vpop.f32.mrb[28].mxu0  ;;  %v2259_v55 = vrot.slane %v6362_v32, 2 }
 0x355   : > { %8814 = vst [vmem:[#allocation65_spill] sm:$0xff] %v6701_v46  ;;  %8815 = vst [vmem:[#allocation52_spill] sm:$0xff] %v6704_v27  ;;  %v1926_v13 = vadd.f32 %v4157_v10, %v6380_v17  ;;  %v1920_v41 = vpop.f32.mrb[29].mxu0  ;;  %v2250_v42 = vrot.slane %v6701_v46, 1  ;;  %v2249_v5 = vrot.slane %v6704_v27, 1  ;;  %v2260_v10 = vrot.slane %v6358_v40, 2 }
 0x356   : > { %v1921_v35 = vadd.f32 %v6380_v17, %v1920_v41 }
 0x357   : > { %v1968_v2 = vmax.f32 %v1926_v13, 0.0  ;;  %v6711_v19 = vsel %vm386_vm0, %v2250_v42, %v2252_v34  ;;  %v6714_v16 = vsel %vm386_vm0, %v2249_v5, %v2250_v42  ;;  %v2262_v13 = vrot.slane %v6366_v58, 2 }
 0x358   : > { %8816 = vst [vmem:[#allocation27_spill] sm:$0xff] %v6711_v19  ;;  %8817 = vst [vmem:[#allocation62_spill] sm:$0xff] %v6714_v16  ;;  %v1967_v7 = vmax.f32 %v1921_v35, 0.0  ;;  %2409 = vrot.lane.b32.xlu0 %v6711_v19, %s4343_s8  ;;  %2407 = vrot.lane.b32.xlu1 %v6714_v16, %s4343_s8  ;;  %v2261_v32 = vsel %vm467_vm1, %v2259_v55, %v2260_v10 }
 0x359   : > { %v2050_v31 = vrot.slane %v1968_v2, 7  ;;  %v2263_v16 = vsel %vm467_vm1, %v2260_v10, %v2262_v13 }
 0x35a   : > { %v2049_v41 = vrot.slane %v1967_v7, 7  ;;  %v6751_v10 = vpack.i.bf16 %v2263_v16, %v2261_v32  ;;  %v2274_v16 = vrot.slane %v6431_v51, 2 }
 0x35b   : > { %v6724_v34 = vsel %vm2004_vm12, %v2050_v31, 0.0 }
 0x35c   : > { %v2257_v42 = vrot.slane %v6724_v34, 1  ;;  %v6728_v5 = vsel %vm2004_vm12, %v2049_v41, %v2050_v31  ;;  %v6731_v35 = vsel %vm2004_vm12, 0.0, %v2049_v41  ;;  %v4160_v19 = vpop.f32.mrb[30].mxu0  ;;  %8822 = vst [vmem:[#allocation116_spill] sm:$0xff] %v6751_v10 }
 0x35d   : > { %8818 = vst [vmem:[#allocation91_spill] sm:$0xff] %v6728_v5  ;;  %8819 = vst [vmem:[#allocation23_spill] sm:$0xff] %v6731_v35  ;;  %v1936_v40 = vadd.f32 %v4160_v19, %v6380_v17  ;;  %v1930_v2 = vpop.f32.mrb[31].mxu0  ;;  %v2255_v58 = vrot.slane %v6728_v5, 1  ;;  %v2254_v7 = vrot.slane %v6731_v35, 1  ;;  %v2265_v19 = vrot.slane %v6390_v8, 2 }
 0x35e   : > { %v1931_v31 = vadd.f32 %v6380_v17, %v1930_v2  ;;  %v2267_v17 = vrot.slane %v6387_v15, 2  ;;  %v2269_v2 = vrot.slane %v6408_v11, 2  ;;  %v2272_v15 = vrot.slane %v6401_v61, 2 }
 0x35f   : > { %v1970_v37 = vmax.f32 %v1936_v40, 0.0  ;;  %v6741_v41 = vsel %vm386_vm0, %v2255_v58, %v2257_v42  ;;  %v6744_v30 = vsel %vm386_vm0, %v2254_v7, %v2255_v58  ;;  %v6759_v42 = vsel %vm467_vm1, %v2264_v43, %v2265_v19 }
 0x360   : > { %8820 = vst [vmem:[#allocation88_spill] sm:$0xff] %v6741_v41  ;;  %8821 = vst [vmem:[#allocation118_spill] sm:$0xff] %v6744_v30  ;;  %v1969_v55 = vmax.f32 %v1931_v31, 0.0  ;;  %2413 = vrot.lane.b32.xlu0 %v6741_v41, %s4343_s8  ;;  %2411 = vrot.lane.b32.xlu1 %v6744_v30, %s4343_s8  ;;  %v2270_v58 = vrot.slane %v6405_v23, 2  ;;  %v6777_v43 = vsel %vm467_vm1, %v2265_v19, %v2267_v17  ;;  %v2275_v7 = vrot.slane %v6428_v63, 2 }
 0x361   : > { %v6753_v13 = vrot.slane %v1970_v37, 7  ;;  %8824 = vst [vmem:[#allocation67_spill] sm:$0xff] %v6759_v42  ;;  %8826 = vst [vmem:[#allocation3_spill] sm:$0xff] %v6777_v43  ;;  %v2277_v31 = vrot.slane %v6425_v33, 2  ;;  %v2279_v19 = vrot.slane %v6456_v52, 2  ;;  %v2280_v17 = vrot.slane %v6453_v44, 2 }
 0x362   : > { %v6755_v40 = vrot.slane %v1969_v55, 7  ;;  %v6774_v37 = vsel %vm467_vm1, %v2269_v2, %v2270_v58  ;;  %v6787_v61 = vsel %vm467_vm1, %v2274_v16, %v2275_v7  ;;  %v6790_v55 = vsel %vm467_vm1, %v2270_v58, %v2272_v15 }
 0x363   : > { %8823 = vst [vmem:[#allocation128_spill] sm:$0xff] %v6753_v13  ;;  %v2282_v2 = vrot.slane %v6449_v1, 2  ;;  %v6800_v33 = vsel %vm467_vm1, %v2279_v19, %v2280_v17  ;;  %v6803_v16 = vsel %vm467_vm1, %v2275_v7, %v2277_v31  ;;  %v2284_v58 = vrot.slane %v6479_v53, 2 }
 0x364   : > { %2451 = vrot.lane.b32.xlu0 %v6759_v42, %s4345_s10  ;;  %4289 = vrot.lane.b32.xlu1 %v6751_v10, %s4345_s10  ;;  %v6770_v32 = vsel %vm2004_vm12, %v6755_v40, %v6753_v13  ;;  %v2285_v15 = vrot.slane %v6476_v18, 2  ;;  %v2287_v10 = vrot.slane %v6473_v48, 2  ;;  %v2289_v7 = vrot.slane %v6503_v47, 2 }
 0x365   : > { %8825 = vst [vmem:[#allocation125_spill] sm:$0xff] %v6770_v32  ;;  %v6816_v19 = vsel %vm467_vm1, %v2280_v17, %v2282_v2  ;;  %v2290_v31 = vrot.slane %v6500_v54, 2  ;;  %v2292_v13 = vrot.slane %v6497_v24, 2  ;;  %v2294_v17 = vrot.slane %v6524_v49, 2 }
 0x366   : > { %v6813_v1 = vsel %vm467_vm1, %v2284_v58, %v2285_v15  ;;  %v6829_v58 = vsel %vm467_vm1, %v2285_v15, %v2287_v10  ;;  %v2295_v2 = vrot.slane %v6521_v6, 2  ;;  %v2297_v41 = vrot.slane %v6518_v3, 2 }
 0x367   : > { %v6826_v48 = vsel %vm467_vm1, %v2289_v7, %v2290_v31  ;;  %v6842_v7 = vsel %vm467_vm1, %v2290_v31, %v2292_v13  ;;  %v2299_v10 = vrot.slane %v6551_v0, 2  ;;  %v2300_v15 = vrot.slane %v6548_v21, 2 }
 0x368   : > { %2455 = vrot.lane.b32.xlu0 %v6774_v37, %s4345_s10  ;;  %2453 = vrot.lane.b32.xlu1 %v6777_v43, %s4345_s10  ;;  %v6839_v24 = vsel %vm467_vm1, %v2294_v17, %v2295_v2  ;;  %v2302_v30 = vrot.slane %v6545_v29, 2  ;;  %v6855_v17 = vsel %vm467_vm1, %v2295_v2, %v2297_v41  ;;  %v2304_v13 = vrot.slane %v6572_v62, 2 }
 0x369   : > { %v6852_v3 = vsel %vm467_vm1, %v2299_v10, %v2300_v15  ;;  %v2305_v31 = vrot.slane %v6569_v22, 2  ;;  %v2307_v43 = vrot.slane %v6566_v56, 2  ;;  %v2309_v41 = vrot.slane %v6599_v20, 2 }
 0x36a   : > { %v6868_v10 = vsel %vm467_vm1, %v2300_v15, %v2302_v30  ;;  %v2310_v2 = vrot.slane %v6596_v28, 2  ;;  %v2312_v42 = vrot.slane %v6593_v9, 2  ;;  %v2314_v30 = vrot.slane %v6620_v25, 2 }
 0x36b   : > { %v6865_v29 = vsel %vm467_vm1, %v2304_v13, %v2305_v31  ;;  %8828 = vst [vmem:[#allocation93_spill] sm:$0xff] %v6868_v10  ;;  %v6881_v13 = vsel %vm467_vm1, %v2305_v31, %v2307_v43  ;;  %v2315_v15 = vrot.slane %v6617_v14, 2  ;;  %v2317_v9 = vrot.slane %v6614_v60, 2 }
 0x36c   : > { %2459 = vrot.lane.b32.xlu0 %v6787_v61, %s4345_s10  ;;  %2457 = vrot.lane.b32.xlu1 %v6790_v55, %s4345_s10  ;;  %8827 = vst [vmem:[#allocation64_spill] sm:$0xff] %v6865_v29  ;;  %v6878_v56 = vsel %vm467_vm1, %v2309_v41, %v2310_v2  ;;  %8830 = vst [vmem:[#allocation90_spill] sm:$0xff] %v6881_v13  ;;  %v6896_v43 = vsel %vm467_vm1, %v2310_v2, %v2312_v42  ;;  %v2319_v31 = vrot.slane %v6648_v39, 2 }
 0x36d   : > { %8829 = vst [vmem:[#allocation26_spill] sm:$0xff] %v6878_v56  ;;  %v6893_v41 = vsel %vm467_vm1, %v2314_v30, %v2315_v15  ;;  %8833 = vst [vmem:[#allocation130_spill] sm:$0xff] %v6896_v43  ;;  %v6913_v42 = vsel %vm467_vm1, %v2315_v15, %v2317_v9  ;;  %v2324_v2 = vrot.slane %v6680_v45, 2  ;;  %v2329_v9 = vrot.slane %v6704_v27, 2 }
 0x36e   : > { %8832 = vst [vmem:[#allocation38_spill] sm:$0xff] %v6893_v41  ;;  %8836 = vst [vmem:[#allocation5_spill] sm:$0xff] %v6913_v42 }
 0x370   : > { %2463 = vrot.lane.b32.xlu0 %v6800_v33, %s4345_s10  ;;  %2461 = vrot.lane.b32.xlu1 %v6803_v16, %s4345_s10 }
 0x374   : > { %2467 = vrot.lane.b32.xlu0 %v6813_v1, %s4345_s10  ;;  %2465 = vrot.lane.b32.xlu1 %v6816_v19, %s4345_s10 }
 0x378   : > { %2471 = vrot.lane.b32.xlu0 %v6826_v48, %s4345_s10  ;;  %2469 = vrot.lane.b32.xlu1 %v6829_v58, %s4345_s10 }
 0x37c   : > { %2475 = vrot.lane.b32.xlu0 %v6839_v24, %s4345_s10  ;;  %2473 = vrot.lane.b32.xlu1 %v6842_v7, %s4345_s10 }
 0x380   : > { %2479 = vrot.lane.b32.xlu0 %v6852_v3, %s4345_s10  ;;  %2477 = vrot.lane.b32.xlu1 %v6855_v17, %s4345_s10 }
 0x384   : > { %2483 = vrot.lane.b32.xlu0 %v6865_v29, %s4345_s10  ;;  %2481 = vrot.lane.b32.xlu1 %v6868_v10, %s4345_s10  ;;  %v6889_v29 = vpop.permute.xlu0 %4284  ;;  %v2320_v10 = vrot.slane %v6645_v4, 2 }
 0x385   : > { %8831 = vst [vmem:[#allocation119_spill] sm:$0xff] %v6889_v29  ;;  %v2322_v29 = vrot.slane %v6642_v36, 2  ;;  %v2327_v36 = vrot.slane %v6671_v38, 2  ;;  %v2332_v38 = vrot.slane %v6697_v12, 2  ;;  %v2337_v12 = vrot.slane %v6724_v34, 2 }
 0x386   : > { %v6910_v30 = vsel %vm467_vm1, %v2319_v31, %v2320_v10 }
 0x387   : > { %8835 = vst [vmem:[#allocation127_spill] sm:$0xff] %v6910_v30  ;;  %v6928_v15 = vsel %vm467_vm1, %v2320_v10, %v2322_v29  ;;  %v2334_v10 = vrot.slane %v6731_v35, 2 }
 0x388   : > { %2487 = vrot.lane.b32.xlu0 %v6878_v56, %s4345_s10  ;;  %2485 = vrot.lane.b32.xlu1 %v6881_v13, %s4345_s10  ;;  %v2325_v13 = vrot.slane %v6677_v59, 2  ;;  %8839 = vst [vmem:[#allocation2_spill] sm:$0xff] %v6928_v15 }
 0x38a   : > { %v6925_v31 = vsel %vm467_vm1, %v2324_v2, %v2325_v13  ;;  %v6943_v29 = vsel %vm467_vm1, %v2325_v13, %v2327_v36 }
 0x38b   : > { %8838 = vst [vmem:[#allocation95_spill] sm:$0xff] %v6925_v31  ;;  %8841 = vst [vmem:[#allocation120_spill] sm:$0xff] %v6943_v29 }
 0x38c   : > { %2491 = vrot.lane.b32.xlu0 %v6893_v41, %s4345_s10  ;;  %2489 = vrot.lane.b32.xlu1 %v6896_v43, %s4345_s10  ;;  %v2330_v43 = vrot.slane %v6701_v46, 2 }
 0x38d   : > { %v6905_v56 = vpop.permute.xlu1 %2355  ;;  %v6907_v60 = vpop.permute.xlu0 %2357 }
 0x38e   : > { %8834 = vst [vmem:[#allocation69_spill] sm:$0xff] %v6907_v60  ;;  %v6940_v2 = vsel %vm467_vm1, %v2329_v9, %v2330_v43  ;;  %v6960_v13 = vsel %vm467_vm1, %v2330_v43, %v2332_v38 }
 0x38f   : > { %8840 = vst [vmem:[#allocation92_spill] sm:$0xff] %v6940_v2  ;;  %8843 = vst [vmem:[#allocation132_spill] sm:$0xff] %v6960_v13 }
 0x390   : > { %2495 = vrot.lane.b32.xlu0 %v6910_v30, %s4345_s10  ;;  %2493 = vrot.lane.b32.xlu1 %v6913_v42, %s4345_s10  ;;  %v2335_v30 = vrot.slane %v6728_v5, 2 }
 0x391   : > { %v6922_v41 = vpop.permute.xlu0 %2361  ;;  %v6932_v60 = vpop.permute.xlu1 %2359 }
 0x392   : > { %8837 = vst [vmem:[#allocation66_spill] sm:$0xff] %v6922_v41  ;;  %v6957_v9 = vsel %vm467_vm1, %v2334_v10, %v2335_v30 }
 0x393   : > { %8842 = vst [vmem:[#allocation39_spill] sm:$0xff] %v6957_v9 }
 0x394   : > { %2499 = vrot.lane.b32.xlu0 %v6925_v31, %s4345_s10  ;;  %2497 = vrot.lane.b32.xlu1 %v6928_v15, %s4345_s10  ;;  %v8874_v15 = vld [vmem:[#allocation107_spill] sm:$0xff] }
 0x395   : > { %v6947_v42 = vpop.permute.xlu1 %2363  ;;  %v6949_v41 = vpop.permute.xlu0 %2365 }
 0x398   : > { %2503 = vrot.lane.b32.xlu0 %v6940_v2, %s4345_s10  ;;  %2501 = vrot.lane.b32.xlu1 %v6943_v29, %s4345_s10  ;;  %v6971_v2 = vsel %vm467_vm1, %v2335_v30, %v2337_v12 }
 0x399   : > { %v6962_v36 = vpop.permute.xlu1 %2367  ;;  %v6964_v31 = vpop.permute.xlu0 %2369  ;;  %8844 = vst [vmem:[#allocation71_spill] sm:$0xff] %v6971_v2 }
 0x39c   : > { %2507 = vrot.lane.b32.xlu0 %v6957_v9, %s4345_s10  ;;  %2505 = vrot.lane.b32.xlu1 %v6960_v13, %s4345_s10 }
 0x39d   : > { %v6973_v34 = vpop.permute.xlu0 %2373  ;;  %v6979_v43 = vpop.permute.xlu1 %2371 }
 0x39e   : > { %8845 = vst [vmem:[#allocation129_spill] sm:$0xff] %v6973_v34  ;;  %v8875_v34 = vld [vmem:[#allocation48_spill] sm:$0xff] }
 0x3a0   : > { %2543 = vrot.lane.b32.xlu0 %v6393_v26, %s4347_s12  ;;  %2509 = vrot.lane.b32.xlu1 %v6971_v2, %s4345_s10 }
 0x3a1   : > { %v6981_v38 = vpop.permute.xlu0 %2377  ;;  %v6987_v30 = vpop.permute.xlu1 %2375 }
 0x3a2   : > { %8846 = vst [vmem:[#allocation7_spill] sm:$0xff] %v6981_v38  ;;  %8847 = vst [vmem:[#allocation68_spill] sm:$0xff] %v6987_v30  ;;  %v2142_v30 = vld [vmem:[%s8163_s3 + $0x20] sm:$0xff] }
 0x3a4   : > { %2547 = vrot.lane.b32.xlu0 %v6408_v11, %s4347_s12  ;;  %2545 = vrot.lane.b32.xlu1 %v6390_v8, %s4347_s12 }
 0x3a5   : > { %v6989_v10 = vpop.permute.xlu0 %2381  ;;  %v6995_v12 = vpop.permute.xlu1 %2379 }
 0x3a6   : > { %8848 = vst [vmem:[#allocation97_spill] sm:$0xff] %v6989_v10  ;;  %8849 = vst [vmem:[#allocation4_spill] sm:$0xff] %v6995_v12 }
 0x3a8   : > { %2551 = vrot.lane.b32.xlu0 %v6431_v51, %s4347_s12  ;;  %2549 = vrot.lane.b32.xlu1 %v6405_v23, %s4347_s12 }
 0x3a9   : > { %v7001_v2 = vpop.permute.xlu1 %2383  ;;  %v7003_v9 = vpop.permute.xlu0 %2385 }
 0x3aa   : > { %8850 = vst [vmem:[#allocation94_spill] sm:$0xff] %v7001_v2  ;;  %8851 = vst [vmem:[#allocation121_spill] sm:$0xff] %v7003_v9 }
 0x3ac   : > { %2555 = vrot.lane.b32.xlu0 %v6456_v52, %s4347_s12  ;;  %2553 = vrot.lane.b32.xlu1 %v6428_v63, %s4347_s12 }
 0x3ad   : > { %v7009_v13 = vpop.permute.xlu1 %2387  ;;  %v7011_v10 = vpop.permute.xlu0 %2389 }
 0x3ae   : > { %8852 = vst [vmem:[#allocation40_spill] sm:$0xff] %v7009_v13  ;;  %8853 = vst [vmem:[#allocation134_spill] sm:$0xff] %v7011_v10 }
 0x3b0   : > { %2559 = vrot.lane.b32.xlu0 %v6479_v53, %s4347_s12  ;;  %2557 = vrot.lane.b32.xlu1 %v6453_v44, %s4347_s12 }
 0x3b1   : > { %v7021_v9 = vpop.permute.xlu1 %2391  ;;  %v7023_v2 = vpop.permute.xlu0 %2393 }
 0x3b2   : > { %8854 = vst [vmem:[#allocation73_spill] sm:$0xff] %v7021_v9  ;;  %8855 = vst [vmem:[#allocation131_spill] sm:$0xff] %v7023_v2 }
 0x3b4   : > { %2563 = vrot.lane.b32.xlu0 %v6503_v47, %s4347_s12  ;;  %2561 = vrot.lane.b32.xlu1 %v6476_v18, %s4347_s12 }
 0x3b5   : > { %v7029_v10 = vpop.permute.xlu1 %2395  ;;  %v7031_v13 = vpop.permute.xlu0 %2397 }
 0x3b6   : > { %8856 = vst [vmem:[#allocation9_spill] sm:$0xff] %v7029_v10  ;;  %8857 = vst [vmem:[#allocation70_spill] sm:$0xff] %v7031_v13 }
 0x3b8   : > { %2567 = vrot.lane.b32.xlu0 %v6524_v49, %s4347_s12  ;;  %2565 = vrot.lane.b32.xlu1 %v6500_v54, %s4347_s12 }
 0x3ba   : > { %v7041_v2 = vpop.permute.xlu1 %2399  ;;  %v7043_v9 = vpop.permute.xlu0 %2401 }
 0x3bb   : > { %8858 = vst [vmem:[#allocation99_spill] sm:$0xff] %v7041_v2  ;;  %8859 = vst [vmem:[#allocation6_spill] sm:$0xff] %v7043_v9 }
 0x3bc   : > { %2571 = vrot.lane.b32.xlu0 %v6551_v0, %s4347_s12  ;;  %2569 = vrot.lane.b32.xlu1 %v6521_v6, %s4347_s12 }
 0x3c0   : > { %2575 = vrot.lane.b32.xlu0 %v6572_v62, %s4347_s12  ;;  %2573 = vrot.lane.b32.xlu1 %v6548_v21, %s4347_s12 }
 0x3c2   : > { %v7049_v13 = vpop.permute.xlu1 %2403  ;;  %v7051_v10 = vpop.permute.xlu0 %2405 }
 0x3c3   : > { %8860 = vst [vmem:[#allocation96_spill] sm:$0xff] %v7049_v13  ;;  %8861 = vst [vmem:[#allocation122_spill] sm:$0xff] %v7051_v10 }
 0x3c4   : > { %2579 = vrot.lane.b32.xlu0 %v6599_v20, %s4347_s12  ;;  %2577 = vrot.lane.b32.xlu1 %v6569_v22, %s4347_s12 }
 0x3c8   : > { %2583 = vrot.lane.b32.xlu0 %v6620_v25, %s4347_s12  ;;  %2581 = vrot.lane.b32.xlu1 %v6596_v28, %s4347_s12 }
 0x3ca   : > { %v7057_v12 = vpop.permute.xlu1 %2407  ;;  %v7059_v2 = vpop.permute.xlu0 %2409 }
 0x3cb   : > { %8862 = vst [vmem:[#allocation41_spill] sm:$0xff] %v7057_v12  ;;  %8863 = vst [vmem:[#allocation136_spill] sm:$0xff] %v7059_v2 }
 0x3cc   : > { %2587 = vrot.lane.b32.xlu0 %v6648_v39, %s4347_s12  ;;  %2585 = vrot.lane.b32.xlu1 %v6617_v14, %s4347_s12 }
 0x3d0   : > { %2591 = vrot.lane.b32.xlu0 %v6680_v45, %s4347_s12  ;;  %2589 = vrot.lane.b32.xlu1 %v6645_v4, %s4347_s12 }
 0x3d2   : > { %v7065_v9 = vpop.permute.xlu1 %2411  ;;  %v7067_v13 = vpop.permute.xlu0 %2413 }
 0x3d3   : > { %8864 = vst [vmem:[#allocation108_spill] sm:$0xff] %v7065_v9  ;;  %8865 = vst [vmem:[#allocation133_spill] sm:$0xff] %v7067_v13  ;;  %v7087_v13 = vsel %vm2004_vm12, 0.0, %v6755_v40  ;;  %v2138_v40 = vld [vmem:[%s8163_s3] sm:$0xff] }
 0x3d4   : > { %2595 = vrot.lane.b32.xlu0 %v6704_v27, %s4347_s12  ;;  %2593 = vrot.lane.b32.xlu1 %v6677_v59, %s4347_s12  ;;  %8867 = vst [vmem:[#allocation72_spill] sm:$0xff] %v7087_v13  ;;  %v8870_v59 = vld [vmem:[#allocation78_spill] sm:$0xff] }
 0x3d6   : > { %v7073_v10 = vpop.permute.xlu1 %4289  ;;  %v7075_v12 = vpop.permute.xlu0 %2451 }
 0x3d7   : > { %8866 = vst [vmem:[#allocation11_spill] sm:$0xff] %v7073_v10 }
 0x3d8   : > { %2599 = vrot.lane.b32.xlu0 %v6731_v35, %s4347_s12  ;;  %2597 = vrot.lane.b32.xlu1 %v6701_v46, %s4347_s12 }
 0x3da   : > { %v7081_v2 = vpop.permute.xlu1 %2453  ;;  %v7083_v9 = vpop.permute.xlu0 %2455 }
 0x3dc   : > { %2601 = vrot.lane.b32.xlu1 %v6728_v5, %s4347_s12  ;;  %2603 = vrot.lane.b32.xlu0 %v7087_v13, %s4347_s12  ;;  %v2139_v5 = vld [vmem:[%s8163_s3 + $0x8] sm:$0xff] }
 0x3dd   : > { %v4235_v46 = vpack.c.bf16 %v2139_v5, %v2138_v40  ;;  %v2141_v5 = vld [vmem:[%s8163_s3 + $0x18] sm:$0xff] }
 0x3de   : > { %v7093_v10 = vpop.permute.xlu1 %2457  ;;  %v7095_v35 = vpop.permute.xlu0 %2459 }
 0x3df   : > { %4251 = vmatprep.subr.bf16.mxu1 %v4235_v46  ;;  %4236 = vmatprep.subr.bf16.mxu0 %v4235_v46 }
 0x3e0   : > { %2639 = vrot.lane.b32.xlu0 %v6414_v57, %s4349_s26  ;;  %2605 = vrot.lane.b32.xlu1 %v6770_v32, %s4347_s12  ;;  %v8868_v57 = vld [vmem:[#allocation81_spill] sm:$0xff]  ;;  %v2140_v32 = vld [vmem:[%s8163_s3 + $0x10] sm:$0xff] }
 0x3e1   : > { %4256 = vmatpush3.bf16.msra.mxu1 %v4235_v46  ;;  %v4239_v40 = vpack.c.bf16 %v2141_v5, %v2140_v32  ;;  %4238 = vmatpush3.bf16.msra.mxu0 %v4235_v46  ;;  %v2143_v46 = vld [vmem:[%s8163_s3 + $0x28] sm:$0xff] }
 0x3e2   : > { %v7107_v13 = vpop.permute.xlu1 %2461  ;;  %v7109_v27 = vpop.permute.xlu0 %2463  ;;  %v4243_v32 = vpack.c.bf16 %v2143_v46, %v2142_v30  ;;  %v2145_v30 = vld [vmem:[%s8163_s3 + $0x38] sm:$0xff] }
 0x3e3   : > { %4252 = vmatprep.subr.bf16.mxu1 %v4239_v40  ;;  %4240 = vmatprep.subr.bf16.mxu0 %v4239_v40 }
 0x3e4   : > { %2643 = vrot.lane.b32.xlu0 %v6440_v50, %s4349_s26  ;;  %2641 = vrot.lane.b32.xlu1 %v8868_v57, %s4349_s26  ;;  %v8871_v57 = vld [vmem:[#allocation104_spill] sm:$0xff] }
 0x3e5   : > { %4257 = vmatpush3.bf16.msra.mxu1 %v4239_v40  ;;  %4242 = vmatpush3.bf16.msra.mxu0 %v4239_v40 }
 0x3e6   : > { %v7121_v29 = vpop.permute.xlu1 %2465  ;;  %v7123_v38 = vpop.permute.xlu0 %2467  ;;  %4253 = vmatprep.subr.bf16.mxu1 %v4243_v32  ;;  %4244 = vmatprep.subr.bf16.mxu0 %v4243_v32 }
 0x3e7   : > { %8869 = vst [vmem:[#allocation8_spill] sm:$0xff] %v7123_v38  ;;  %v2144_v38 = vld [vmem:[%s8163_s3 + $0x30] sm:$0xff] }
 0x3e8   : > { %2645 = vrot.lane.b32.xlu1 %v8870_v59, %s4349_s26  ;;  %2647 = vrot.lane.b32.xlu0 %v8871_v57, %s4349_s26  ;;  %v4247_v40 = vpack.c.bf16 %v2145_v30, %v2144_v38 }
 0x3e9   : > { %4258 = vmatpush3.bf16.msra.mxu1 %v4243_v32  ;;  %4246 = vmatpush3.bf16.msra.mxu0 %v4243_v32 }
 0x3ea   : > { %v7135_v5 = vpop.permute.xlu1 %2469  ;;  %v7137_v45 = vpop.permute.xlu0 %2471  ;;  %4254 = vmatprep.subr.bf16.mxu1 %v4247_v40  ;;  %4248 = vmatprep.subr.bf16.mxu0 %v4247_v40 }
 0x3eb   : > { %8872 = vst [vmem:[#allocation33_spill] sm:$0xff] %v7135_v5  ;;  %8873 = vst [vmem:[#allocation98_spill] sm:$0xff] %v7137_v45  ;;  %v2146_v5 = vld [vmem:[%s8163_s3 + $0x40] sm:$0xff] }
 0x3ec   : > { %2649 = vrot.lane.b32.xlu1 %v8874_v15, %s4349_s26  ;;  %2651 = vrot.lane.b32.xlu0 %v8875_v34, %s4349_s26 }
 0x3ed   : > { %4259 = vmatpush3.bf16.msra.mxu1 %v4247_v40  ;;  %4250 = vmatpush3.bf16.msra.mxu0 %v4247_v40 }
 0x3ee   : > { %v7149_v46 = vpop.permute.xlu1 %2473  ;;  %v7151_v45 = vpop.permute.xlu0 %2475  ;;  %4255 = vmatprep.subr.mxu1 %v2146_v5  ;;  %4177 = vmatprep.subr.mxu0 %v2146_v5 }
 0x3ef   : > { %8876 = vst [vmem:[#allocation30_spill] sm:$0xff] %v7149_v46  ;;  %8877 = vst [vmem:[#allocation79_spill] sm:$0xff] %v7151_v45 }
 0x3f0   : > { %2739 = vrot.lane.b32.xlu1 %v6774_v37, %s4351_s22  ;;  %2741 = vrot.lane.b32.xlu0 %v6790_v55, %s4351_s22 }
 0x3f1   : > { %4260 = vmatpush3.msra.mxu1 %v2146_v5  ;;  %4178 = vmatpush3.msra.mxu0 %v2146_v5 }
 0x3f2   : > { %v7160_v38 = vpop.permute.xlu1 %2477  ;;  %v7162_v32 = vpop.permute.xlu0 %2479 }
 0x3f3   : > { %8878 = vst [vmem:[#allocation42_spill] sm:$0xff] %v7160_v38  ;;  %8879 = vst [vmem:[#allocation110_spill] sm:$0xff] %v7162_v32 }
 0x3f4   : > { %2835 = vrot.lane.b32.xlu1 %v6431_v51, %s4352_s28  ;;  %2837 = vrot.lane.b32.xlu0 %v6428_v63, %s4352_s28 }
 0x3f6   : > { %v7168_v30 = vpop.permute.xlu1 %2481  ;;  %v7170_v45 = vpop.permute.xlu0 %2483 }
 0x3f7   : > { %8880 = vst [vmem:[#allocation74_spill] sm:$0xff] %v7168_v30  ;;  %8881 = vst [vmem:[#allocation135_spill] sm:$0xff] %v7170_v45 }
 0x3f8   : > { %2931 = vrot.lane.b32.xlu1 %v8871_v57, %s4353_s29  ;;  %2933 = vrot.lane.b32.xlu0 %v8874_v15, %s4353_s29 }
 0x3fa   : > { %v7176_v40 = vpop.permute.xlu1 %2485  ;;  %v7178_v32 = vpop.permute.xlu0 %2487 }
 0x3fb   : > { %8882 = vst [vmem:[#allocation75_spill] sm:$0xff] %v7176_v40  ;;  %8883 = vst [vmem:[#allocation100_spill] sm:$0xff] %v7178_v32 }
 0x3fc   : > { %3027 = vrot.lane.b32.xlu1 %v6787_v61, %s4354_s30  ;;  %2743 = vrot.lane.b32.xlu0 %v6787_v61, %s4351_s22 }
 0x3fe   : > { %v7184_v5 = vpop.permute.xlu1 %2489  ;;  %v7186_v45 = vpop.permute.xlu0 %2491 }
 0x3ff   : > { %8884 = vst [vmem:[#allocation10_spill] sm:$0xff] %v7184_v5  ;;  %8885 = vst [vmem:[#allocation101_spill] sm:$0xff] %v7186_v45  ;;  %v8890_v45 = vld [vmem:[#allocation57_spill] sm:$0xff] }
 0x400   : > { %3029 = vrot.lane.b32.xlu1 %v6803_v16, %s4354_s30  ;;  %2745 = vrot.lane.b32.xlu0 %v6803_v16, %s4351_s22 }
 0x402   : > { %v7192_v15 = vpop.permute.xlu1 %2493  ;;  %v7194_v57 = vpop.permute.xlu0 %2495 }
 0x403   : > { %8886 = vst [vmem:[#allocation43_spill] sm:$0xff] %v7192_v15  ;;  %8887 = vst [vmem:[#allocation31_spill] sm:$0xff] %v7194_v57 }
 0x404   : > { %2839 = vrot.lane.b32.xlu1 %v6456_v52, %s4352_s28  ;;  %2841 = vrot.lane.b32.xlu0 %v6453_v44, %s4352_s28 }
 0x406   : > { %v7200_v61 = vpop.permute.xlu1 %2497  ;;  %v7202_v5 = vpop.permute.xlu0 %2499 }
 0x407   : > { %8888 = vst [vmem:[#allocation123_spill] sm:$0xff] %v7200_v61  ;;  %8889 = vst [vmem:[#allocation14_spill] sm:$0xff] %v7202_v5 }
 0x408   : > { %2935 = vrot.lane.b32.xlu1 %v8875_v34, %s4353_s29  ;;  %2937 = vrot.lane.b32.xlu0 %v8890_v45, %s4353_s29 }
 0x40a   : > { %v7208_v16 = vpop.permute.xlu1 %2501  ;;  %v7210_v15 = vpop.permute.xlu0 %2503 }
 0x40b   : > { %8891 = vst [vmem:[#allocation53_spill] sm:$0xff] %v7208_v16  ;;  %8892 = vst [vmem:[#allocation15_spill] sm:$0xff] %v7210_v15 }
 0x40c   : > { %3031 = vrot.lane.b32.xlu1 %v6800_v33, %s4354_s30  ;;  %2653 = vrot.lane.b32.xlu0 %v8890_v45, %s4349_s26 }
 0x40e   : > { %v7216_v57 = vpop.permute.xlu1 %2505  ;;  %v7218_v61 = vpop.permute.xlu0 %2507 }
 0x40f   : > { %8893 = vst [vmem:[#allocation12_spill] sm:$0xff] %v7216_v57  ;;  %8894 = vst [vmem:[#allocation13_spill] sm:$0xff] %v7218_v61 }
 0x410   : > { %2747 = vrot.lane.b32.xlu1 %v6800_v33, %s4351_s22  ;;  %3033 = vrot.lane.b32.xlu0 %v6816_v19, %s4354_s30  ;;  %v8898_v33 = vld [vmem:[#allocation111_spill] sm:$0xff] }
 0x412   : > { %v7224_v34 = vpop.permute.xlu1 %2509  ;;  %v7226_v16 = vpop.permute.xlu0 %2543 }
 0x413   : > { %8895 = vst [vmem:[#allocation47_spill] sm:$0xff] %v7224_v34  ;;  %8896 = vst [vmem:[#allocation44_spill] sm:$0xff] %v7226_v16 }
 0x414   : > { %2749 = vrot.lane.b32.xlu1 %v6816_v19, %s4351_s22  ;;  %2843 = vrot.lane.b32.xlu0 %v6479_v53, %s4352_s28  ;;  %v8899_v19 = vld [vmem:[#allocation80_spill] sm:$0xff] }
 0x416   : > { %v7232_v45 = vpop.permute.xlu1 %2545  ;;  %v7234_v57 = vpop.permute.xlu0 %2547 }
 0x417   : > { %8897 = vst [vmem:[#allocation76_spill] sm:$0xff] %v7232_v45 }
 0x418   : > { %2845 = vrot.lane.b32.xlu1 %v6476_v18, %s4352_s28  ;;  %2939 = vrot.lane.b32.xlu0 %v8898_v33, %s4353_s29 }
 0x41a   : > { %v7240_v61 = vpop.permute.xlu1 %2549  ;;  %v7242_v34 = vpop.permute.xlu0 %2551 }
 0x41c   : > { %2655 = vrot.lane.b32.xlu1 %v8898_v33, %s4349_s26  ;;  %2941 = vrot.lane.b32.xlu0 %v8899_v19, %s4353_s29 }
 0x41e   : > { %v7248_v15 = vpop.permute.xlu1 %2553  ;;  %v7250_v5 = vpop.permute.xlu0 %2555 }
 0x420   : > { %3035 = vrot.lane.b32.xlu1 %v6813_v1, %s4354_s30  ;;  %2657 = vrot.lane.b32.xlu0 %v8899_v19, %s4349_s26 }
 0x422   : > { %v7256_v32 = vpop.permute.xlu1 %2557  ;;  %v7258_v40 = vpop.permute.xlu0 %2559 }
 0x424   : > { %2751 = vrot.lane.b32.xlu1 %v6813_v1, %s4351_s22  ;;  %3037 = vrot.lane.b32.xlu0 %v6829_v58, %s4354_s30  ;;  %v8900_v1 = vld [vmem:[#allocation49_spill] sm:$0xff] }
 0x426   : > { %v7264_v33 = vpop.permute.xlu1 %2561  ;;  %v7266_v45 = vpop.permute.xlu0 %2563 }
 0x428   : > { %2753 = vrot.lane.b32.xlu1 %v6829_v58, %s4351_s22  ;;  %2847 = vrot.lane.b32.xlu0 %v6503_v47, %s4352_s28  ;;  %v8903_v58 = vld [vmem:[#allocation59_spill] sm:$0xff] }
 0x42a   : > { %v7272_v19 = vpop.permute.xlu1 %2565  ;;  %v7274_v30 = vpop.permute.xlu0 %2567 }
 0x42c   : > { %2849 = vrot.lane.b32.xlu1 %v6500_v54, %s4352_s28  ;;  %2943 = vrot.lane.b32.xlu0 %v8900_v1, %s4353_s29 }
 0x42e   : > { %v7280_v16 = vpop.permute.xlu1 %2569  ;;  %v7282_v38 = vpop.permute.xlu0 %2571 }
 0x42f   : > { %8901 = vst [vmem:[#allocation77_spill] sm:$0xff] %v7280_v16  ;;  %8902 = vst [vmem:[#allocation102_spill] sm:$0xff] %v7282_v38 }
 0x430   : > { %2659 = vrot.lane.b32.xlu1 %v8900_v1, %s4349_s26  ;;  %2945 = vrot.lane.b32.xlu0 %v8903_v58, %s4353_s29 }
 0x432   : > { %v7288_v46 = vpop.permute.xlu1 %2573  ;;  %v7290_v47 = vpop.permute.xlu0 %2575 }
 0x433   : > { %8904 = vst [vmem:[#allocation103_spill] sm:$0xff] %v7288_v46  ;;  %8905 = vst [vmem:[#allocation45_spill] sm:$0xff] %v7290_v47  ;;  %v3121_v47 = vsel %vm1375_vm3, %v6393_v26, %v6905_v56  ;;  %v8929_v26 = vld [vmem:[#allocation69_spill] sm:$0xff] }
 0x434   : > { %3039 = vrot.lane.b32.xlu1 %v6826_v48, %s4354_s30  ;;  %2661 = vrot.lane.b32.xlu0 %v8903_v58, %s4349_s26  ;;  %v3122_v56 = vsel %vm1375_vm3, %v6390_v8, %v8929_v26  ;;  %v8931_v26 = vld [vmem:[#allocation64_spill] sm:$0xff] }
 0x436   : > { %v7296_v54 = vpop.permute.xlu1 %2577  ;;  %v7298_v16 = vpop.permute.xlu0 %2579 }
 0x437   : > { %8906 = vst [vmem:[#allocation124_spill] sm:$0xff] %v7296_v54  ;;  %8907 = vst [vmem:[#allocation18_spill] sm:$0xff] %v7298_v16 }
 0x438   : > { %2755 = vrot.lane.b32.xlu1 %v6826_v48, %s4351_s22  ;;  %3041 = vrot.lane.b32.xlu0 %v6842_v7, %s4354_s30  ;;  %v8912_v48 = vld [vmem:[#allocation113_spill] sm:$0xff] }
 0x43a   : > { %v7304_v1 = vpop.permute.xlu1 %2581  ;;  %v7306_v46 = vpop.permute.xlu0 %2583 }
 0x43b   : > { %8908 = vst [vmem:[#allocation19_spill] sm:$0xff] %v7304_v1  ;;  %8909 = vst [vmem:[#allocation16_spill] sm:$0xff] %v7306_v46 }
 0x43c   : > { %2757 = vrot.lane.b32.xlu1 %v6842_v7, %s4351_s22  ;;  %2851 = vrot.lane.b32.xlu0 %v6524_v49, %s4352_s28  ;;  %v8915_v7 = vld [vmem:[#allocation82_spill] sm:$0xff] }
 0x43e   : > { %v7312_v58 = vpop.permute.xlu1 %2585  ;;  %v7314_v54 = vpop.permute.xlu0 %2587 }
 0x43f   : > { %8910 = vst [vmem:[#allocation17_spill] sm:$0xff] %v7312_v58  ;;  %8911 = vst [vmem:[#allocation46_spill] sm:$0xff] %v7314_v54 }
 0x440   : > { %2853 = vrot.lane.b32.xlu1 %v6521_v6, %s4352_s28  ;;  %2947 = vrot.lane.b32.xlu0 %v8912_v48, %s4353_s29 }
 0x442   : > { %v7320_v16 = vpop.permute.xlu1 %2589  ;;  %v7322_v1 = vpop.permute.xlu0 %2591 }
 0x443   : > { %8913 = vst [vmem:[#allocation32_spill] sm:$0xff] %v7320_v16  ;;  %8914 = vst [vmem:[#allocation34_spill] sm:$0xff] %v7322_v1 }
 0x444   : > { %2663 = vrot.lane.b32.xlu1 %v8912_v48, %s4349_s26  ;;  %2949 = vrot.lane.b32.xlu0 %v8915_v7, %s4353_s29 }
 0x446   : > { %v7328_v46 = vpop.permute.xlu1 %2593  ;;  %v7330_v58 = vpop.permute.xlu0 %2595 }
 0x447   : > { %8916 = vst [vmem:[#allocation20_spill] sm:$0xff] %v7328_v46  ;;  %8917 = vst [vmem:[#allocation35_spill] sm:$0xff] %v7330_v58 }
 0x448   : > { %3043 = vrot.lane.b32.xlu1 %v6839_v24, %s4354_s30  ;;  %2665 = vrot.lane.b32.xlu0 %v8915_v7, %s4349_s26 }
 0x44a   : > { %v7336_v54 = vpop.permute.xlu1 %2597  ;;  %v7338_v16 = vpop.permute.xlu0 %2599 }
 0x44b   : > { %8918 = vst [vmem:[#allocation21_spill] sm:$0xff] %v7336_v54  ;;  %8919 = vst [vmem:[#allocation36_spill] sm:$0xff] %v7338_v16 }
 0x44c   : > { %2759 = vrot.lane.b32.xlu1 %v6839_v24, %s4351_s22  ;;  %3045 = vrot.lane.b32.xlu0 %v6855_v17, %s4354_s30  ;;  %v8924_v24 = vld [vmem:[#allocation87_spill] sm:$0xff] }
 0x44e   : > { %v7344_v48 = vpop.permute.xlu1 %2601  ;;  %v7346_v46 = vpop.permute.xlu0 %2603 }
 0x44f   : > { %8920 = vst [vmem:[#allocation24_spill] sm:$0xff] %v7344_v48  ;;  %8921 = vst [vmem:[#allocation37_spill] sm:$0xff] %v7346_v46 }
 0x450   : > { %2761 = vrot.lane.b32.xlu1 %v6855_v17, %s4351_s22  ;;  %2855 = vrot.lane.b32.xlu0 %v6551_v0, %s4352_s28  ;;  %v8926_v17 = vld [vmem:[#allocation58_spill] sm:$0xff]  ;;  %v3153_v0 = vsel %vm1441_vm6, %v3121_v47, %v7075_v12  ;;  %v8930_v47 = vld [vmem:[#allocation84_spill] sm:$0xff] }
 0x452   : > { %v7352_v7 = vpop.permute.xlu1 %2605  ;;  %v7354_v54 = vpop.permute.xlu0 %2639 }
 0x453   : > { %8922 = vst [vmem:[#allocation25_spill] sm:$0xff] %v7352_v7  ;;  %8923 = vst [vmem:[#allocation137_spill] sm:$0xff] %v7354_v54 }
 0x454   : > { %2857 = vrot.lane.b32.xlu1 %v6548_v21, %s4352_s28  ;;  %2951 = vrot.lane.b32.xlu0 %v8924_v24, %s4353_s29 }
 0x456   : > { %v7360_v16 = vpop.permute.xlu1 %2641  ;;  %v2644_v48 = vpop.permute.xlu0 %2643 }
 0x457   : > { %8925 = vst [vmem:[#allocation28_spill] sm:$0xff] %v7360_v16 }
 0x458   : > { %2667 = vrot.lane.b32.xlu1 %v8924_v24, %s4349_s26  ;;  %2953 = vrot.lane.b32.xlu0 %v8926_v17, %s4353_s29  ;;  %v8927_v24 = vld [vmem:[#allocation93_spill] sm:$0xff] }
 0x45a   : > { %v2646_v46 = vpop.permute.xlu1 %2645  ;;  %v2648_v58 = vpop.permute.xlu0 %2647 }
 0x45c   : > { %3047 = vrot.lane.b32.xlu1 %v6852_v3, %s4354_s30  ;;  %2669 = vrot.lane.b32.xlu0 %v8926_v17, %s4349_s26 }
 0x45e   : > { %v7370_v7 = vpop.permute.xlu1 %2649  ;;  %v7372_v1 = vpop.permute.xlu0 %2651 }
 0x460   : > { %2763 = vrot.lane.b32.xlu1 %v6852_v3, %s4351_s22  ;;  %3049 = vrot.lane.b32.xlu0 %v8927_v24, %s4354_s30  ;;  %v8928_v3 = vld [vmem:[#allocation115_spill] sm:$0xff] }
 0x462   : > { %v2740_v16 = vpop.permute.xlu1 %2739  ;;  %v2742_v21 = vpop.permute.xlu0 %2741 }
 0x464   : > { %2765 = vrot.lane.b32.xlu1 %v8927_v24, %s4351_s22  ;;  %2859 = vrot.lane.b32.xlu0 %v6572_v62, %s4352_s28  ;;  %v3185_v24 = vsel %vm1507_vm8, %v3153_v0, %v7234_v57  ;;  %v3154_v0 = vsel %vm1441_vm6, %v3122_v56, %v7081_v2 }
 0x465   : > { %v3217_v38 = vsel %vm1573_vm10, %v3185_v24, %v2644_v48  ;;  %v3186_v57 = vsel %vm1507_vm8, %v3154_v0, %v7240_v61  ;;  %v8932_v61 = vld [vmem:[#allocation67_spill] sm:$0xff] }
 0x466   : > { %v2836_v54 = vpop.permute.xlu1 %2835  ;;  %v2838_v17 = vpop.permute.xlu0 %2837 }
 0x468   : > { %2861 = vrot.lane.b32.xlu1 %v6569_v22, %s4352_s28  ;;  %2955 = vrot.lane.b32.xlu0 %v8928_v3, %s4353_s29  ;;  %v3250_v22 = vsel %vm3247_vm13, %v3217_v38, %v2740_v16  ;;  %v3218_v38 = vsel %vm1573_vm10, %v3186_v57, %v2646_v46 }
 0x469   : > { %v3283_v12 = vsel %vm3280_vm14, %v3250_v22, %v2836_v54 }
 0x46a   : > { %v2932_v62 = vpop.permute.xlu1 %2931  ;;  %v2934_v6 = vpop.permute.xlu0 %2933 }
 0x46b   : > { %v3316_v48 = vsel %vm3313_vm15, %v3283_v12, %v2932_v62 }
 0x46c   : > { %2671 = vrot.lane.b32.xlu1 %v8928_v3, %s4349_s26  ;;  %2957 = vrot.lane.b32.xlu0 %v8930_v47, %s4353_s29  ;;  %v3251_v3 = vsel %vm3247_vm13, %v3218_v38, %v2742_v21  ;;  %v8935_v38 = vld [vmem:[#allocation66_spill] sm:$0xff] }
 0x46d   : > { %v3284_v54 = vsel %vm3280_vm14, %v3251_v3, %v2838_v17  ;;  %v3123_v17 = vsel %vm1375_vm3, %v6408_v11, %v6932_v60  ;;  %v3124_v60 = vsel %vm1375_vm3, %v6405_v23, %v8935_v38 }
 0x46e   : > { %v3028_v8 = vpop.permute.xlu1 %3027  ;;  %v2744_v24 = vpop.permute.xlu0 %2743  ;;  %v3317_v22 = vsel %vm3313_vm15, %v3284_v54, %v2934_v6  ;;  %v8933_v6 = vld [vmem:[#allocation90_spill] sm:$0xff]  ;;  %v3155_v0 = vsel %vm1441_vm6, %v3123_v17, %v7083_v9  ;;  %v3156_v9 = vsel %vm1441_vm6, %v3124_v60, %v7093_v10  ;;  %v3125_v17 = vsel %vm1375_vm3, %v6431_v51, %v6947_v42 }
 0x46f   : > { %v3349_v16 = vsel %vm3346_vm2, %v3316_v48, %v3028_v8  ;;  %v3187_v12 = vsel %vm1507_vm8, %v3155_v0, %v7242_v34  ;;  %v3126_v51 = vsel %vm1375_vm3, %v6428_v63, %v6949_v41  ;;  %v8938_v42 = vld [vmem:[#allocation26_spill] sm:$0xff] }
 0x470   : > { %3051 = vrot.lane.b32.xlu1 %v8931_v26, %s4354_s30  ;;  %2673 = vrot.lane.b32.xlu0 %v8930_v47, %s4349_s26  ;;  %v8934_v47 = vld [vmem:[#allocation3_spill] sm:$0xff]  ;;  %v3219_v8 = vsel %vm1573_vm10, %v3187_v12, %v2648_v58  ;;  %v3188_v58 = vsel %vm1507_vm8, %v3156_v9, %v7248_v15 }
 0x471   : > { %4182 = vmatprep.mubr.msk.f32.mxu1 %vm3386_vm4, %v3349_v16  ;;  %v3252_v16 = vsel %vm3247_vm13, %v3219_v8, %v2744_v24  ;;  %v3220_v24 = vsel %vm1573_vm10, %v3188_v58, %v7370_v7 }
 0x472   : > { %v3030_v62 = vpop.permute.xlu1 %3029  ;;  %v2746_v2 = vpop.permute.xlu0 %2745 }
 0x473   : > { %v3350_v46 = vsel %vm3346_vm2, %v3317_v22, %v3030_v62  ;;  %v3253_v62 = vsel %vm3247_vm13, %v3220_v24, %v2746_v2  ;;  %v3127_v24 = vsel %vm1375_vm3, %v6456_v52, %v6962_v36  ;;  %v3128_v52 = vsel %vm1375_vm3, %v6453_v44, %v6964_v31 }
 0x474   : > { %2735 = vrot.lane.b32.xlu1 %v8932_v61, %s4351_s22  ;;  %2767 = vrot.lane.b32.xlu0 %v8931_v26, %s4351_s22  ;;  %v8936_v61 = vld [vmem:[#allocation63_spill] sm:$0xff] }
 0x475   : > { %4183 = vmatmul.mubr.msk.f32.vlgmr.msra.gmra.mrb[0].mxu1 %vm3386_vm4, %v3350_v46 }
 0x476   : > { %v2840_v21 = vpop.permute.xlu1 %2839  ;;  %v2842_v56 = vpop.permute.xlu0 %2841 }
 0x477   : > { %v3285_v34 = vsel %vm3280_vm14, %v3252_v16, %v2840_v21 }
 0x478   : > { %3053 = vrot.lane.b32.xlu1 %v8933_v6, %s4354_s30  ;;  %2737 = vrot.lane.b32.xlu0 %v8934_v47, %s4351_s22 }
 0x47a   : > { %v2936_v57 = vpop.permute.xlu1 %2935  ;;  %v2938_v48 = vpop.permute.xlu0 %2937 }
 0x47b   : > { %v3318_v3 = vsel %vm3313_vm15, %v3285_v34, %v2936_v57  ;;  %v8939_v34 = vld [vmem:[#allocation130_spill] sm:$0xff] }
 0x47c   : > { %2769 = vrot.lane.b32.xlu1 %v8933_v6, %s4351_s22  ;;  %2831 = vrot.lane.b32.xlu0 %v6408_v11, %s4352_s28  ;;  %v3286_v11 = vsel %vm3280_vm14, %v3253_v62, %v2842_v56  ;;  %v3157_v6 = vsel %vm1441_vm6, %v3125_v17, %v7095_v35  ;;  %v3158_v35 = vsel %vm1441_vm6, %v3126_v51, %v7107_v13 }
 0x47d   : > { %v3319_v10 = vsel %vm3313_vm15, %v3286_v11, %v2938_v48  ;;  %v3189_v47 = vsel %vm1507_vm8, %v3157_v6, %v7250_v5 }
 0x47e   : > { %v3032_v26 = vpop.permute.xlu1 %3031  ;;  %v2654_v54 = vpop.permute.xlu0 %2653  ;;  %v3221_v57 = vsel %vm1573_vm10, %v3189_v47, %v7372_v1  ;;  %v3190_v1 = vsel %vm1507_vm8, %v3158_v35, %v7256_v32  ;;  %v8943_v47 = vld [vmem:[#allocation5_spill] sm:$0xff]  ;;  %v8945_v35 = vld [vmem:[#allocation8_spill] sm:$0xff] }
 0x47f   : > { %v3351_v22 = vsel %vm3346_vm2, %v3318_v3, %v3032_v26  ;;  %v3222_v41 = vsel %vm1573_vm10, %v3190_v1, %v2654_v54 }
 0x480   : > { %2863 = vrot.lane.b32.xlu1 %v6599_v20, %s4352_s28  ;;  %2833 = vrot.lane.b32.xlu0 %v6405_v23, %s4352_s28 }
 0x481   : > { %4185 = vmatprep.mubr.msk.f32.mxu1 %vm3386_vm4, %v3351_v22  ;;  %v3159_v22 = vsel %vm1441_vm6, %v3127_v24, %v7109_v27  ;;  %v3160_v27 = vsel %vm1441_vm6, %v3128_v52, %v7121_v29 }
 0x482   : > { %v2748_v15 = vpop.permute.xlu1 %2747  ;;  %v3034_v46 = vpop.permute.xlu0 %3033  ;;  %v3191_v62 = vsel %vm1507_vm8, %v3159_v22, %v7258_v40  ;;  %v8950_v22 = vld [vmem:[#allocation2_spill] sm:$0xff] }
 0x483   : > { %v3352_v7 = vsel %vm3346_vm2, %v3319_v10, %v3034_v46  ;;  %v8941_v46 = vld [vmem:[#allocation50_spill] sm:$0xff] }
 0x484   : > { %2865 = vrot.lane.b32.xlu1 %v6596_v28, %s4352_s28  ;;  %2927 = vrot.lane.b32.xlu0 %v6440_v50, %s4353_s29  ;;  %v8937_v50 = vld [vmem:[#allocation112_spill] sm:$0xff] }
 0x485   : > { %4186 = vmatmul.mubr.msk.f32.gmra.mrb[2].mxu1 %vm3386_vm4, %v3352_v7  ;;  %v3192_v7 = vsel %vm1507_vm8, %v3160_v27, %v7264_v33 }
 0x486   : > { %v2750_v2 = vpop.permute.xlu1 %2749  ;;  %v2844_v23 = vpop.permute.xlu0 %2843 }
 0x488   : > { %2959 = vrot.lane.b32.xlu1 %v8936_v61, %s4353_s29  ;;  %2675 = vrot.lane.b32.xlu0 %v8936_v61, %s4349_s26 }
 0x48a   : > { %v2846_v21 = vpop.permute.xlu1 %2845  ;;  %v2940_v56 = vpop.permute.xlu0 %2939 }
 0x48c   : > { %2929 = vrot.lane.b32.xlu1 %v8870_v59, %s4353_s29  ;;  %2961 = vrot.lane.b32.xlu0 %v8937_v50, %s4353_s29  ;;  %v3254_v59 = vsel %vm3247_vm13, %v3221_v57, %v2748_v15 }
 0x48d   : > { %v3287_v5 = vsel %vm3280_vm14, %v3254_v59, %v2844_v23  ;;  %v3129_v59 = vsel %vm1375_vm3, %v6479_v53, %v6979_v43 }
 0x48e   : > { %v2656_v0 = vpop.permute.xlu1 %2655  ;;  %v2942_v12 = vpop.permute.xlu0 %2941  ;;  %v3320_v48 = vsel %vm3313_vm15, %v3287_v5, %v2940_v56  ;;  %v8942_v56 = vld [vmem:[#allocation38_spill] sm:$0xff]  ;;  %v3161_v5 = vsel %vm1441_vm6, %v3129_v59, %v8945_v35 }
 0x48f   : > { %v3223_v15 = vsel %vm1573_vm10, %v3191_v62, %v2656_v0  ;;  %v3193_v1 = vsel %vm1507_vm8, %v3161_v5, %v7266_v45 }
 0x490   : > { %3023 = vrot.lane.b32.xlu1 %v6774_v37, %s4354_s30  ;;  %3055 = vrot.lane.b32.xlu0 %v8938_v42, %s4354_s30  ;;  %v3255_v37 = vsel %vm3247_vm13, %v3222_v41, %v2750_v2  ;;  %v8946_v41 = vld [vmem:[#allocation129_spill] sm:$0xff] }
 0x491   : > { %v3288_v13 = vsel %vm3280_vm14, %v3255_v37, %v2846_v21  ;;  %v3130_v53 = vsel %vm1375_vm3, %v6476_v18, %v8946_v41  ;;  %v8948_v37 = vld [vmem:[#allocation33_spill] sm:$0xff] }
 0x492   : > { %v3036_v8 = vpop.permute.xlu1 %3035  ;;  %v2658_v63 = vpop.permute.xlu0 %2657  ;;  %v3321_v32 = vsel %vm3313_vm15, %v3288_v13, %v2942_v12  ;;  %v3162_v13 = vsel %vm1441_vm6, %v3130_v53, %v8948_v37 }
 0x493   : > { %v3353_v38 = vsel %vm3346_vm2, %v3320_v48, %v3036_v8  ;;  %v3224_v31 = vsel %vm1573_vm10, %v3192_v7, %v2658_v63  ;;  %v8955_v7 = vld [vmem:[#allocation126_spill] sm:$0xff] }
 0x494   : > { %2677 = vrot.lane.b32.xlu1 %v8937_v50, %s4349_s26  ;;  %2771 = vrot.lane.b32.xlu0 %v8938_v42, %s4351_s22  ;;  %v8944_v42 = vld [vmem:[#allocation22_spill] sm:$0xff] }
 0x495   : > { %4188 = vmatprep.mubr.msk.f32.mxu1 %vm3386_vm4, %v3353_v38  ;;  %v8947_v38 = vld [vmem:[#allocation89_spill] sm:$0xff] }
 0x496   : > { %v2752_v60 = vpop.permute.xlu1 %2751  ;;  %v3038_v16 = vpop.permute.xlu0 %3037 }
 0x497   : > { %v3354_v9 = vsel %vm3346_vm2, %v3321_v32, %v3038_v16  ;;  %v3256_v36 = vsel %vm3247_vm13, %v3223_v15, %v2752_v60  ;;  %v3194_v32 = vsel %vm1507_vm8, %v3162_v13, %v7272_v19  ;;  %v8964_v13 = vld [vmem:[#allocation52_spill] sm:$0xff] }
 0x498   : > { %3025 = vrot.lane.b32.xlu1 %v6790_v55, %s4354_s30  ;;  %3057 = vrot.lane.b32.xlu0 %v8939_v34, %s4354_s30  ;;  %v8940_v55 = vld [vmem:[#allocation60_spill] sm:$0xff] }
 0x499   : > { %4189 = vmatmul.mubr.msk.f32.gmra.mrb[4].mxu1 %vm3386_vm4, %v3354_v9 }
 0x49a   : > { %v2754_v58 = vpop.permute.xlu1 %2753  ;;  %v2848_v3 = vpop.permute.xlu0 %2847 }
 0x49b   : > { %v3289_v40 = vsel %vm3280_vm14, %v3256_v36, %v2848_v3  ;;  %v3257_v21 = vsel %vm3247_vm13, %v3224_v31, %v2754_v58  ;;  %v8949_v3 = vld [vmem:[#allocation127_spill] sm:$0xff]  ;;  %v8952_v36 = vld [vmem:[#allocation68_spill] sm:$0xff] }
 0x49c   : > { %2773 = vrot.lane.b32.xlu1 %v8939_v34, %s4351_s22  ;;  %2867 = vrot.lane.b32.xlu0 %v6620_v25, %s4352_s28 }
 0x49e   : > { %v2850_v26 = vpop.permute.xlu1 %2849  ;;  %v2944_v54 = vpop.permute.xlu0 %2943 }
 0x49f   : > { %v3322_v2 = vsel %vm3313_vm15, %v3289_v40, %v2944_v54  ;;  %v3290_v29 = vsel %vm3280_vm14, %v3257_v21, %v2850_v26  ;;  %v8954_v40 = vld [vmem:[#allocation86_spill] sm:$0xff] }
 0x4a0   : > { %2869 = vrot.lane.b32.xlu1 %v6617_v14, %s4352_s28  ;;  %2963 = vrot.lane.b32.xlu0 %v8940_v55, %s4353_s29 }
 0x4a2   : > { %v2660_v11 = vpop.permute.xlu1 %2659  ;;  %v2946_v10 = vpop.permute.xlu0 %2945 }
 0x4a3   : > { %v3323_v33 = vsel %vm3313_vm15, %v3290_v29, %v2946_v10  ;;  %v3225_v63 = vsel %vm1573_vm10, %v3193_v1, %v2660_v11  ;;  %v8951_v10 = vld [vmem:[#allocation117_spill] sm:$0xff]  ;;  %v8958_v29 = vld [vmem:[#allocation54_spill] sm:$0xff]  ;;  %v8962_v1 = vld [vmem:[#allocation95_spill] sm:$0xff] }
 0x4a4   : > { %2679 = vrot.lane.b32.xlu1 %v8940_v55, %s4349_s26  ;;  %2965 = vrot.lane.b32.xlu0 %v8941_v46, %s4353_s29 }
 0x4a6   : > { %v3040_v23 = vpop.permute.xlu1 %3039  ;;  %v2662_v44 = vpop.permute.xlu0 %2661 }
 0x4a7   : > { %v3355_v61 = vsel %vm3346_vm2, %v3322_v2, %v3040_v23  ;;  %v3226_v9 = vsel %vm1573_vm10, %v3194_v32, %v2662_v44  ;;  %v8956_v2 = vld [vmem:[#allocation98_spill] sm:$0xff] }
 0x4a8   : > { %3059 = vrot.lane.b32.xlu1 %v8942_v56, %s4354_s30  ;;  %2681 = vrot.lane.b32.xlu0 %v8941_v46, %s4349_s26  ;;  %v8953_v46 = vld [vmem:[#allocation83_spill] sm:$0xff] }
 0x4a9   : > { %4191 = vmatprep.mubr.msk.f32.mxu1 %vm3386_vm4, %v3355_v61  ;;  %v3131_v27 = vsel %vm1375_vm3, %v8953_v46, %v8952_v36  ;;  %v8971_v36 = vld [vmem:[#allocation97_spill] sm:$0xff]  ;;  %v8972_v46 = vld [vmem:[#allocation106_spill] sm:$0xff] }
 0x4aa   : > { %v2756_v17 = vpop.permute.xlu1 %2755  ;;  %v3042_v50 = vpop.permute.xlu0 %3041  ;;  %v3163_v23 = vsel %vm1441_vm6, %v3131_v27, %v8956_v2  ;;  %v3134_v27 = vsel %vm1375_vm3, %v8972_v46, %v8971_v36  ;;  %v8974_v2 = vld [vmem:[#allocation42_spill] sm:$0xff]  ;;  %v8992_v36 = vld [vmem:[#allocation125_spill] sm:$0xff] }
 0x4ab   : > { %v3356_v6 = vsel %vm3346_vm2, %v3323_v33, %v3042_v50  ;;  %v3258_v43 = vsel %vm3247_vm13, %v3225_v63, %v2756_v17  ;;  %v3195_v44 = vsel %vm1507_vm8, %v3163_v23, %v7274_v30  ;;  %v8959_v50 = vld [vmem:[#allocation114_spill] sm:$0xff]  ;;  %v3166_v23 = vsel %vm1441_vm6, %v3134_v27, %v8974_v2  ;;  %v8993_v27 = vld [vmem:[#allocation137_spill] sm:$0xff] }
 0x4ac   : > { %2775 = vrot.lane.b32.xlu1 %v8942_v56, %s4351_s22  ;;  %3061 = vrot.lane.b32.xlu0 %v8943_v47, %s4354_s30  ;;  %v8957_v56 = vld [vmem:[#allocation7_spill] sm:$0xff]  ;;  %v2342_v46 = vrot.slane %v8992_v36, 1 }
 0x4ad   : > { %4192 = vmatmul.mubr.msk.f32.gmra.mrb[6].mxu1 %vm3386_vm4, %v3356_v6  ;;  %v3132_v33 = vsel %vm1375_vm3, %v8958_v29, %v8957_v56  ;;  %v8960_v6 = vld [vmem:[#allocation30_spill] sm:$0xff] }
 0x4ae   : > { %v2758_v0 = vpop.permute.xlu1 %2757  ;;  %v2852_v12 = vpop.permute.xlu0 %2851 }
 0x4af   : > { %v3291_v45 = vsel %vm3280_vm14, %v3258_v43, %v2852_v12  ;;  %v3259_v58 = vsel %vm3247_vm13, %v3226_v9, %v2758_v0  ;;  %v8961_v0 = vld [vmem:[#allocation77_spill] sm:$0xff]  ;;  %v8963_v43 = vld [vmem:[#allocation120_spill] sm:$0xff]  ;;  %v8967_v9 = vld [vmem:[#allocation62_spill] sm:$0xff] }
 0x4b0   : > { %2777 = vrot.lane.b32.xlu1 %v8943_v47, %s4351_s22  ;;  %2871 = vrot.lane.b32.xlu0 %v6648_v39, %s4352_s28  ;;  %v3164_v47 = vsel %vm1441_vm6, %v3132_v33, %v8960_v6  ;;  %v8976_v33 = vld [vmem:[#allocation132_spill] sm:$0xff] }
 0x4b1   : > { %v3196_v12 = vsel %vm1507_vm8, %v3164_v47, %v8961_v0  ;;  %v8977_v0 = vld [vmem:[#allocation23_spill] sm:$0xff] }
 0x4b2   : > { %v2854_v57 = vpop.permute.xlu1 %2853  ;;  %v2948_v51 = vpop.permute.xlu0 %2947 }
 0x4b3   : > { %v3324_v60 = vsel %vm3313_vm15, %v3291_v45, %v2948_v51  ;;  %v3292_v26 = vsel %vm3280_vm14, %v3259_v58, %v2854_v57 }
 0x4b4   : > { %2873 = vrot.lane.b32.xlu1 %v6645_v4, %s4352_s28  ;;  %2967 = vrot.lane.b32.xlu0 %v8944_v42, %s4353_s29 }
 0x4b6   : > { %v2664_v48 = vpop.permute.xlu1 %2663  ;;  %v2950_v8 = vpop.permute.xlu0 %2949 }
 0x4b7   : > { %v3325_v19 = vsel %vm3313_vm15, %v3292_v26, %v2950_v8  ;;  %v3227_v21 = vsel %vm1573_vm10, %v3195_v44, %v2664_v48  ;;  %v8975_v44 = vld [vmem:[#allocation103_spill] sm:$0xff] }
 0x4b8   : > { %2683 = vrot.lane.b32.xlu1 %v8944_v42, %s4349_s26  ;;  %2969 = vrot.lane.b32.xlu0 %v8947_v38, %s4353_s29 }
 0x4ba   : > { %v3044_v16 = vpop.permute.xlu1 %3043  ;;  %v2666_v18 = vpop.permute.xlu0 %2665 }
 0x4bb   : > { %v3357_v34 = vsel %vm3346_vm2, %v3324_v60, %v3044_v16  ;;  %v3228_v42 = vsel %vm1573_vm10, %v3196_v12, %v2666_v18  ;;  %v8965_v60 = vld [vmem:[#allocation4_spill] sm:$0xff]  ;;  %v8966_v18 = vld [vmem:[#allocation65_spill] sm:$0xff] }
 0x4bc   : > { %3063 = vrot.lane.b32.xlu1 %v8949_v3, %s4354_s30  ;;  %2685 = vrot.lane.b32.xlu0 %v8947_v38, %s4349_s26  ;;  %v3133_v16 = vsel %vm1375_vm3, %v6524_v49, %v8965_v60  ;;  %v8970_v49 = vld [vmem:[#allocation27_spill] sm:$0xff] }
 0x4bd   : > { %4194 = vmatprep.mubr.msk.f32.mxu1 %vm3386_vm4, %v3357_v34  ;;  %v8968_v34 = vld [vmem:[#allocation79_spill] sm:$0xff] }
 0x4be   : > { %v2760_v54 = vpop.permute.xlu1 %2759  ;;  %v3046_v24 = vpop.permute.xlu0 %3045  ;;  %v3165_v58 = vsel %vm1441_vm6, %v3133_v16, %v8968_v34  ;;  %v8986_v16 = vld [vmem:[#allocation51_spill] sm:$0xff] }
 0x4bf   : > { %v3358_v55 = vsel %vm3346_vm2, %v3325_v19, %v3046_v24  ;;  %v3260_v17 = vsel %vm3247_vm13, %v3227_v21, %v2760_v54  ;;  %v8987_v34 = vld [vmem:[#allocation71_spill] sm:$0xff] }
 0x4c0   : > { %2779 = vrot.lane.b32.xlu1 %v8949_v3, %s4351_s22  ;;  %3065 = vrot.lane.b32.xlu0 %v8950_v22, %s4354_s30  ;;  %v8969_v3 = vld [vmem:[#allocation102_spill] sm:$0xff] }
 0x4c1   : > { %4195 = vmatmul.mubr.msk.f32.gmra.mrb[8].mxu1 %vm3386_vm4, %v3358_v55  ;;  %v3197_v26 = vsel %vm1507_vm8, %v3165_v58, %v8969_v3  ;;  %v8988_v58 = vld [vmem:[#allocation110_spill] sm:$0xff] }
 0x4c2   : > { %v2762_v62 = vpop.permute.xlu1 %2761  ;;  %v2856_v11 = vpop.permute.xlu0 %2855 }
 0x4c3   : > { %v3293_v30 = vsel %vm3280_vm14, %v3260_v17, %v2856_v11  ;;  %v3261_v5 = vsel %vm3247_vm13, %v3228_v42, %v2762_v62 }
 0x4c4   : > { %2781 = vrot.lane.b32.xlu1 %v8950_v22, %s4351_s22  ;;  %2875 = vrot.lane.b32.xlu0 %v8951_v10, %s4352_s28 }
 0x4c6   : > { %v2858_v15 = vpop.permute.xlu1 %2857  ;;  %v2952_v52 = vpop.permute.xlu0 %2951 }
 0x4c7   : > { %v3326_v57 = vsel %vm3313_vm15, %v3293_v30, %v2952_v52  ;;  %v3294_v48 = vsel %vm3280_vm14, %v3261_v5, %v2858_v15  ;;  %v8980_v5 = vld [vmem:[#allocation88_spill] sm:$0xff] }
 0x4c8   : > { %2877 = vrot.lane.b32.xlu1 %v8954_v40, %s4352_s28  ;;  %2971 = vrot.lane.b32.xlu0 %v8955_v7, %s4353_s29 }
 0x4ca   : > { %v2668_v31 = vpop.permute.xlu1 %2667  ;;  %v2954_v61 = vpop.permute.xlu0 %2953 }
 0x4cb   : > { %v3327_v8 = vsel %vm3313_vm15, %v3294_v48, %v2954_v61  ;;  %v3229_v24 = vsel %vm1573_vm10, %v3197_v26, %v2668_v31  ;;  %v3198_v31 = vsel %vm1507_vm8, %v3166_v23, %v8975_v44  ;;  %v8994_v23 = vld [vmem:[#allocation128_spill] sm:$0xff] }
 0x4cc   : > { %2687 = vrot.lane.b32.xlu1 %v8955_v7, %s4349_s26  ;;  %2973 = vrot.lane.b32.xlu0 %v8959_v50, %s4353_s29  ;;  %v8973_v7 = vld [vmem:[#allocation92_spill] sm:$0xff]  ;;  %v2137_v44 = vsel %vm2004_vm12, %v8994_v23, 0.0 }
 0x4cd   : > { %v2349_v23 = vrot.slane %v2137_v44, 2 }
 0x4ce   : > { %v3048_v51 = vpop.permute.xlu1 %3047  ;;  %v2670_v59 = vpop.permute.xlu0 %2669 }
 0x4cf   : > { %v3359_v35 = vsel %vm3346_vm2, %v3326_v57, %v3048_v51  ;;  %v3230_v56 = vsel %vm1573_vm10, %v3198_v31, %v2670_v59  ;;  %v8978_v51 = vld [vmem:[#allocation91_spill] sm:$0xff]  ;;  %v8979_v59 = vld [vmem:[#allocation118_spill] sm:$0xff] }
 0x4d0   : > { %3067 = vrot.lane.b32.xlu1 %v8962_v1, %s4354_s30  ;;  %2689 = vrot.lane.b32.xlu0 %v8959_v50, %s4349_s26 }
 0x4d1   : > { %4197 = vmatprep.mubr.msk.f32.mxu1 %vm3386_vm4, %v3359_v35 }
 0x4d2   : > { %v2764_v63 = vpop.permute.xlu1 %2763  ;;  %v3050_v41 = vpop.permute.xlu0 %3049 }
 0x4d3   : > { %v3360_v53 = vsel %vm3346_vm2, %v3327_v8, %v3050_v41  ;;  %v3262_v55 = vsel %vm3247_vm13, %v3229_v24, %v2764_v63  ;;  %v8981_v8 = vld [vmem:[#allocation119_spill] sm:$0xff] }
 0x4d4   : > { %2783 = vrot.lane.b32.xlu1 %v8962_v1, %s4351_s22  ;;  %3069 = vrot.lane.b32.xlu0 %v8963_v43, %s4354_s30  ;;  %v4286_v63 = vunpack.i.l.bf16 %v8981_v8  ;;  %v8982_v41 = vld [vmem:[#allocation39_spill] sm:$0xff]  ;;  %v4287_v31 = vunpack.i.h.bf16 %v8981_v8 }
 0x4d5   : > { %4198 = vmatmul.mubr.msk.f32.gmra.mrb[10].mxu1 %vm3386_vm4, %v3360_v53  ;;  %v8983_v53 = vld [vmem:[#allocation11_spill] sm:$0xff] }
 0x4d6   : > { %v2766_v38 = vpop.permute.xlu1 %2765  ;;  %v2860_v37 = vpop.permute.xlu0 %2859 }
 0x4d7   : > { %v3295_v22 = vsel %vm3280_vm14, %v3262_v55, %v2860_v37  ;;  %v3263_v29 = vsel %vm3247_vm13, %v3230_v56, %v2766_v38  ;;  %v8990_v55 = vld [vmem:[#allocation45_spill] sm:$0xff] }
 0x4d8   : > { %2785 = vrot.lane.b32.xlu1 %v8963_v43, %s4351_s22  ;;  %2879 = vrot.lane.b32.xlu0 %v8964_v13, %s4352_s28  ;;  %v4291_v43 = vunpack.i.l.bf16 %v8983_v53 }
 0x4da   : > { %v2862_v45 = vpop.permute.xlu1 %2861  ;;  %v2956_v32 = vpop.permute.xlu0 %2955 }
 0x4db   : > { %v3328_v62 = vsel %vm3313_vm15, %v3295_v22, %v2956_v32  ;;  %v3296_v17 = vsel %vm3280_vm14, %v3263_v29, %v2862_v45  ;;  %v8984_v45 = vld [vmem:[#allocation94_spill] sm:$0xff]  ;;  %v8985_v32 = vld [vmem:[#allocation85_spill] sm:$0xff] }
 0x4dc   : > { %2881 = vrot.lane.b32.xlu1 %v8966_v18, %s4352_s28  ;;  %2975 = vrot.lane.b32.xlu0 %v8967_v9, %s4353_s29  ;;  %v3135_v60 = vsel %vm1375_vm3, %v8985_v32, %v8984_v45  ;;  %v8999_v32 = vld [vmem:[#allocation76_spill] sm:$0xff] }
 0x4dd   : > { %v3167_v3 = vsel %vm1441_vm6, %v3135_v60, %v8988_v58 }
 0x4de   : > { %v2672_v19 = vpop.permute.xlu1 %2671  ;;  %v2958_v54 = vpop.permute.xlu0 %2957 }
 0x4df   : > { %v3329_v50 = vsel %vm3313_vm15, %v3296_v17, %v2958_v54  ;;  %v8989_v54 = vld [vmem:[#allocation44_spill] sm:$0xff] }
 0x4e0   : > { %2691 = vrot.lane.b32.xlu1 %v8967_v9, %s4349_s26  ;;  %2977 = vrot.lane.b32.xlu0 %v8970_v49, %s4353_s29  ;;  %v3119_v9 = vsel %vm1375_vm3, %v8986_v16, %v4286_v63  ;;  %v8995_v63 = vld [vmem:[#allocation121_spill] sm:$0xff] }
 0x4e1   : > { %v3151_v26 = vsel %vm1441_vm6, %v3119_v9, %v4291_v43  ;;  %v9000_v9 = vld [vmem:[#allocation124_spill] sm:$0xff] }
 0x4e2   : > { %v3052_v11 = vpop.permute.xlu1 %3051  ;;  %v7675_v15 = vpop.permute.xlu0 %2673  ;;  %v3183_v24 = vsel %vm1507_vm8, %v3151_v26, %v8989_v54  ;;  %v2347_v26 = vrot.slane %v8992_v36, 2  ;;  %v9001_v54 = vld [vmem:[#allocation28_spill] sm:$0xff] }
 0x4e3   : > { %v3361_v52 = vsel %vm3346_vm2, %v3328_v62, %v3052_v11  ;;  %v8991_v11 = vld [vmem:[#allocation72_spill] sm:$0xff] }
 0x4e4   : > { %3071 = vrot.lane.b32.xlu1 %v8973_v7, %s4354_s30  ;;  %2693 = vrot.lane.b32.xlu0 %v8970_v49, %s4349_s26  ;;  %v3199_v49 = vsel %vm1507_vm8, %v3167_v3, %v8990_v55  ;;  %v2346_v45 = vrot.slane %v8991_v11, 2 }
 0x4e5   : > { %4200 = vmatprep.mubr.msk.f32.mxu1 %vm3386_vm4, %v3361_v52  ;;  %v2341_v52 = vrot.slane %v8991_v11, 1  ;;  %v3231_v2 = vsel %vm1573_vm10, %v3199_v49, %v2672_v19 }
 0x4e6   : > { %v2736_v61 = vpop.permute.xlu1 %2735  ;;  %v2768_v21 = vpop.permute.xlu0 %2767 }
 0x4e7   : > { %v3264_v29 = vsel %vm3247_vm13, %v3231_v2, %v2768_v21  ;;  %v2343_v8 = vsel %vm386_vm0, %v2341_v52, %v2342_v46 }
 0x4e8   : > { %2787 = vrot.lane.b32.xlu1 %v8973_v7, %s4351_s22  ;;  %3073 = vrot.lane.b32.xlu0 %v8976_v33, %s4354_s30  ;;  %v3215_v7 = vsel %vm1573_vm10, %v3183_v24, %v8993_v27 }
 0x4e9   : > { %v3248_v56 = vsel %vm3247_vm13, %v3215_v7, %v2736_v61 }
 0x4ea   : > { %v3054_v6 = vpop.permute.xlu1 %3053  ;;  %v7698_v47 = vpop.permute.xlu0 %2737 }
 0x4eb   : > { %v3362_v30 = vsel %vm3346_vm2, %v3329_v50, %v3054_v6 }
 0x4ec   : > { %2789 = vrot.lane.b32.xlu1 %v8976_v33, %s4351_s22  ;;  %2883 = vrot.lane.b32.xlu0 %v8977_v0, %s4352_s28  ;;  %v4292_v33 = vunpack.i.h.bf16 %v8983_v53 }
 0x4ed   : > { %4201 = vmatmul.mubr.msk.f32.gmra.mrb[12].mxu1 %vm3386_vm4, %v3362_v30 }
 0x4ee   : > { %v7706_v12 = vpop.permute.xlu1 %2769  ;;  %v2832_v57 = vpop.permute.xlu0 %2831 }
 0x4ef   : > { %v3281_v17 = vsel %vm3280_vm14, %v3248_v56, %v2832_v57  ;;  %v8997_v57 = vld [vmem:[#allocation105_spill] sm:$0xff] }
 0x4f0   : > { %2885 = vrot.lane.b32.xlu1 %v8978_v51, %s4352_s28  ;;  %2979 = vrot.lane.b32.xlu0 %v8979_v59, %s4353_s29 }
 0x4f2   : > { %v2864_v42 = vpop.permute.xlu1 %2863  ;;  %v7712_v35 = vpop.permute.xlu0 %2833 }
 0x4f3   : > { %v3297_v19 = vsel %vm3280_vm14, %v3264_v29, %v2864_v42  ;;  %v3120_v42 = vsel %vm1375_vm3, %v8997_v57, %v4287_v31  ;;  %v2348_v31 = vsel %vm467_vm1, %v2346_v45, %v2347_v26  ;;  %v9002_v29 = vld [vmem:[#allocation40_spill] sm:$0xff] }
 0x4f4   : > { %2695 = vrot.lane.b32.xlu1 %v8979_v59, %s4349_s26  ;;  %2981 = vrot.lane.b32.xlu0 %v8980_v5, %s4353_s29  ;;  %v2344_v59 = vrot.slane %v2137_v44, 1 }
 0x4f6   : > { %v2866_v1 = vpop.permute.xlu1 %2865  ;;  %v2928_v48 = vpop.permute.xlu0 %2927  ;;  %v2345_v49 = vsel %vm386_vm0, %v2342_v46, %v2344_v59 }
 0x4f7   : > { %v3314_v50 = vsel %vm3313_vm15, %v3281_v17, %v2928_v48  ;;  %v8998_v48 = vld [vmem:[#allocation74_spill] sm:$0xff] }
 0x4f8   : > { %3075 = vrot.lane.b32.xlu1 %v8982_v41, %s4354_s30  ;;  %2697 = vrot.lane.b32.xlu0 %v8980_v5, %s4349_s26 }
 0x4fa   : > { %v2960_v38 = vpop.permute.xlu1 %2959  ;;  %v7724_v37 = vpop.permute.xlu0 %2675 }
 0x4fb   : > { %v3330_v6 = vsel %vm3313_vm15, %v3297_v19, %v2960_v38  ;;  %v3152_v38 = vsel %vm1441_vm6, %v3120_v42, %v4292_v33  ;;  %v9003_v33 = vld [vmem:[#allocation61_spill] sm:$0xff]  ;;  %v9004_v19 = vld [vmem:[#allocation135_spill] sm:$0xff] }
 0x4fc   : > { %2791 = vrot.lane.b32.xlu1 %v8982_v41, %s4351_s22  ;;  %3077 = vrot.lane.b32.xlu0 %v8987_v34, %s4354_s30  ;;  %v8996_v41 = vld [vmem:[#allocation56_spill] sm:$0xff]  ;;  %v3184_v60 = vsel %vm1507_vm8, %v3152_v38, %v8999_v32  ;;  %v3137_v17 = vsel %vm1375_vm3, %v9003_v33, %v9002_v29 }
 0x4fd   : > { %v3136_v53 = vsel %vm1375_vm3, %v8996_v41, %v8995_v63  ;;  %v3216_v24 = vsel %vm1573_vm10, %v3184_v60, %v9001_v54  ;;  %v9008_v41 = vld [vmem:[#allocation55_spill] sm:$0xff] }
 0x4fe   : > { %v2930_v22 = vpop.permute.xlu1 %2929  ;;  %v2962_v62 = vpop.permute.xlu0 %2961  ;;  %v3168_v43 = vsel %vm1441_vm6, %v3136_v53, %v8998_v48  ;;  %v9009_v53 = vld [vmem:[#allocation116_spill] sm:$0xff] }
 0x500   : > { %2793 = vrot.lane.b32.xlu1 %v8987_v34, %s4351_s22  ;;  %2887 = vrot.lane.b32.xlu0 %v8991_v11, %s4352_s28  ;;  %v3200_v34 = vsel %vm1507_vm8, %v3168_v43, %v9000_v9  ;;  %v3249_v11 = vsel %vm3247_vm13, %v3216_v24, %v7698_v47  ;;  %v9011_v43 = vld [vmem:[#allocation19_spill] sm:$0xff] }
 0x501   : > { %v3232_v55 = vsel %vm1573_vm10, %v3200_v34, %v7675_v15 }
 0x502   : > { %v3024_v30 = vpop.permute.xlu1 %3023  ;;  %v3056_v61 = vpop.permute.xlu0 %3055  ;;  %v3265_v52 = vsel %vm3247_vm13, %v3232_v55, %v7706_v12 }
 0x503   : > { %v3347_v21 = vsel %vm3346_vm2, %v3314_v50, %v3024_v30  ;;  %v3363_v5 = vsel %vm3346_vm2, %v3330_v6, %v3056_v61  ;;  %v3298_v27 = vsel %vm3280_vm14, %v3265_v52, %v2866_v1  ;;  %v3169_v50 = vsel %vm1441_vm6, %v3137_v17, %v9004_v19  ;;  %v9005_v6 = vld [vmem:[#allocation18_spill] sm:$0xff] }
 0x504   : > { %2889 = vrot.lane.b32.xlu1 %v8992_v36, %s4352_s28  ;;  %2983 = vrot.lane.b32.xlu0 %v2343_v8, %s4353_s29  ;;  %v3282_v36 = vsel %vm3280_vm14, %v3249_v11, %v7712_v35  ;;  %v3331_v15 = vsel %vm3313_vm15, %v3298_v27, %v2962_v62  ;;  %v4293_v62 = vpack.i.bf16 %v8997_v57, %v8986_v16  ;;  %v9010_v57 = vld [vmem:[#allocation75_spill] sm:$0xff] }
 0x505   : > { %4179 = vmatprep.mubr.msk.f32.mxu0 %vm3386_vm4, %v3347_v21  ;;  %4203 = vmatprep.mubr.msk.f32.mxu1 %vm3386_vm4, %v3363_v5  ;;  %v3315_v7 = vsel %vm3313_vm15, %v3282_v36, %v2930_v22  ;;  %v2350_v22 = vsel %vm467_vm1, %v2347_v26, %v2349_v23  ;;  %v3201_v30 = vsel %vm1507_vm8, %v3169_v50, %v9005_v6  ;;  %v9006_v21 = vld [vmem:[#allocation134_spill] sm:$0xff]  ;;  %v9007_v5 = vld [vmem:[#allocation109_spill] sm:$0xff] }
 0x506   : > { %v2678_v58 = vpop.permute.xlu1 %2677  ;;  %v2772_v3 = vpop.permute.xlu0 %2771  ;;  %v3233_v16 = vsel %vm1573_vm10, %v3201_v30, %v7724_v37  ;;  %v9012_v36 = vld [vmem:[#allocation73_spill] sm:$0xff] }
 0x507   : > { %v3266_v63 = vsel %vm3247_vm13, %v3233_v16, %v2772_v3  ;;  %v3139_v27 = vsel %vm1375_vm3, %v6599_v20, %v9012_v36 }
 0x508   : > { %2699 = vrot.lane.b32.xlu1 %v2343_v8, %s4349_s26  ;;  %2985 = vrot.lane.b32.xlu0 %v2345_v49, %s4353_s29  ;;  %v3138_v8 = vsel %vm1375_vm3, %v9007_v5, %v9006_v21 }
 0x509   : > { %v3170_v42 = vsel %vm1441_vm6, %v3138_v8, %v9010_v57  ;;  %v9019_v57 = vld [vmem:[#allocation101_spill] sm:$0xff] }
 0x50a   : > { %v3026_v46 = vpop.permute.xlu1 %3025  ;;  %v3058_v2 = vpop.permute.xlu0 %3057  ;;  %v3202_v37 = vsel %vm1507_vm8, %v3170_v42, %v9011_v43 }
 0x50b   : > { %v3348_v47 = vsel %vm3346_vm2, %v3315_v7, %v3026_v46  ;;  %v3364_v12 = vsel %vm3346_vm2, %v3331_v15, %v3058_v2  ;;  %v3234_v60 = vsel %vm1573_vm10, %v3202_v37, %v2678_v58  ;;  %v9013_v7 = vld [vmem:[#allocation100_spill] sm:$0xff] }
 0x50c   : > { %3079 = vrot.lane.b32.xlu1 %v2348_v31, %s4354_s30  ;;  %2701 = vrot.lane.b32.xlu0 %v2345_v49, %s4349_s26  ;;  %v3171_v15 = vsel %vm1441_vm6, %v3139_v27, %v9013_v7  ;;  %v9014_v46 = vld [vmem:[#allocation16_spill] sm:$0xff] }
 0x50d   : > { %4180 = vmatmul.mubr.msk.f32.vlgmr.msra.gmra.mrb[32].mxu0 %vm3386_vm4, %v3348_v47  ;;  %4204 = vmatmul.mubr.msk.f32.gmra.mrb[14].mxu1 %vm3386_vm4, %v3364_v12  ;;  %v3203_v2 = vsel %vm1507_vm8, %v3171_v15, %v9014_v46 }
 0x50e   : > { %v2774_v35 = vpop.permute.xlu1 %2773  ;;  %v2868_v1 = vpop.permute.xlu0 %2867 }
 0x50f   : > { %v3299_v48 = vsel %vm3280_vm14, %v3266_v63, %v2868_v1  ;;  %v3267_v34 = vsel %vm3247_vm13, %v3234_v60, %v2774_v35 }
 0x510   : > { %2795 = vrot.lane.b32.xlu1 %v2348_v31, %s4351_s22  ;;  %3081 = vrot.lane.b32.xlu0 %v2350_v22, %s4354_s30  ;;  %v9015_v31 = vld [vmem:[#allocation131_spill] sm:$0xff] }
 0x511   : > { %v3140_v35 = vsel %vm1375_vm3, %v6596_v28, %v9015_v31 }
 0x512   : > { %v2870_v44 = vpop.permute.xlu1 %2869  ;;  %v2964_v56 = vpop.permute.xlu0 %2963 }
 0x513   : > { %v3332_v38 = vsel %vm3313_vm15, %v3299_v48, %v2964_v56  ;;  %v3300_v3 = vsel %vm3280_vm14, %v3267_v34, %v2870_v44  ;;  %v9017_v44 = vld [vmem:[#allocation17_spill] sm:$0xff]  ;;  %v9020_v48 = vld [vmem:[#allocation46_spill] sm:$0xff]  ;;  %v9022_v34 = vld [vmem:[#allocation43_spill] sm:$0xff] }
 0x514   : > { %2797 = vrot.lane.b32.xlu1 %v2350_v22, %s4351_s22  ;;  %4294 = vrot.lane.b32.xlu0 %v4293_v62, %s4352_s28  ;;  %v9016_v22 = vld [vmem:[#allocation10_spill] sm:$0xff] }
 0x515   : > { %v3172_v62 = vsel %vm1441_vm6, %v3140_v35, %v9016_v22  ;;  %v9024_v35 = vld [vmem:[#allocation99_spill] sm:$0xff] }
 0x516   : > { %v2680_v61 = vpop.permute.xlu1 %2679  ;;  %v2966_v59 = vpop.permute.xlu0 %2965  ;;  %v3204_v56 = vsel %vm1507_vm8, %v3172_v62, %v9017_v44  ;;  %v9025_v22 = vld [vmem:[#allocation31_spill] sm:$0xff] }
 0x517   : > { %v3333_v26 = vsel %vm3313_vm15, %v3300_v3, %v2966_v59  ;;  %v3235_v12 = vsel %vm1573_vm10, %v3203_v2, %v2680_v61 }
 0x518   : > { %4299 = vrot.lane.b32.xlu1 %v9008_v41, %s4353_s29  ;;  %4304 = vrot.lane.b32.xlu0 %v9009_v53, %s4354_s30  ;;  %v9018_v41 = vld [vmem:[#allocation9_spill] sm:$0xff] }
 0x519   : > { %v3141_v53 = vsel %vm1375_vm3, %v6620_v25, %v9018_v41 }
 0x51a   : > { %v3060_v45 = vpop.permute.xlu1 %3059  ;;  %v2682_v32 = vpop.permute.xlu0 %2681  ;;  %v3173_v42 = vsel %vm1441_vm6, %v3141_v53, %v9019_v57 }
 0x51b   : > { %v3365_v9 = vsel %vm3346_vm2, %v3332_v38, %v3060_v45  ;;  %v3236_v19 = vsel %vm1573_vm10, %v3204_v56, %v2682_v32  ;;  %v3205_v43 = vsel %vm1507_vm8, %v3173_v42, %v9020_v48  ;;  %v9021_v32 = vld [vmem:[#allocation70_spill] sm:$0xff] }
 0x51c   : > { %4206 = vmatprep.mubr.msk.f32.mxu1 %vm3386_vm4, %v3365_v9  ;;  %v3142_v60 = vsel %vm1375_vm3, %v6617_v14, %v9021_v32 }
 0x51d   : > { %v3174_v3 = vsel %vm1441_vm6, %v3142_v60, %v9022_v34  ;;  %v9030_v60 = vld [vmem:[#allocation96_spill] sm:$0xff]  ;;  %v9031_v34 = vld [vmem:[#allocation14_spill] sm:$0xff] }
 0x51e   : > { %v2776_v54 = vpop.permute.xlu1 %2775  ;;  %v3062_v24 = vpop.permute.xlu0 %3061 }
 0x51f   : > { %v3366_v55 = vsel %vm3346_vm2, %v3333_v26, %v3062_v24  ;;  %v3268_v1 = vsel %vm3247_vm13, %v3235_v12, %v2776_v54  ;;  %v9023_v26 = vld [vmem:[#allocation32_spill] sm:$0xff] }
 0x520   : > { %4207 = vmatmul.mubr.msk.f32.gmra.mrb[16].mxu1 %vm3386_vm4, %v3366_v55  ;;  %v3206_v54 = vsel %vm1507_vm8, %v3174_v3, %v9023_v26 }
 0x522   : > { %v2778_v49 = vpop.permute.xlu1 %2777  ;;  %v2872_v11 = vpop.permute.xlu0 %2871 }
 0x523   : > { %v3301_v20 = vsel %vm3280_vm14, %v3268_v1, %v2872_v11  ;;  %v3269_v28 = vsel %vm3247_vm13, %v3236_v19, %v2778_v49  ;;  %v3143_v1 = vsel %vm1375_vm3, %v6648_v39, %v9024_v35 }
 0x524   : > { %v3175_v62 = vsel %vm1441_vm6, %v3143_v1, %v9025_v22 }
 0x526   : > { %v2874_v52 = vpop.permute.xlu1 %2873  ;;  %v2968_v58 = vpop.permute.xlu0 %2967 }
 0x527   : > { %v3334_v29 = vsel %vm3313_vm15, %v3301_v20, %v2968_v58  ;;  %v3302_v6 = vsel %vm3280_vm14, %v3269_v28, %v2874_v52  ;;  %v9026_v20 = vld [vmem:[#allocation34_spill] sm:$0xff]  ;;  %v9028_v28 = vld [vmem:[#allocation123_spill] sm:$0xff] }
 0x528   : > { %v3207_v44 = vsel %vm1507_vm8, %v3175_v62, %v9026_v20 }
 0x52a   : > { %v2684_v23 = vpop.permute.xlu1 %2683  ;;  %v2970_v47 = vpop.permute.xlu0 %2969 }
 0x52b   : > { %v3335_v30 = vsel %vm3313_vm15, %v3302_v6, %v2970_v47  ;;  %v3237_v45 = vsel %vm1573_vm10, %v3205_v43, %v2684_v23 }
 0x52e   : > { %v3064_v33 = vpop.permute.xlu1 %3063  ;;  %v2686_v17 = vpop.permute.xlu0 %2685 }
 0x52f   : > { %v3367_v50 = vsel %vm3346_vm2, %v3334_v29, %v3064_v33  ;;  %v3238_v11 = vsel %vm1573_vm10, %v3206_v54, %v2686_v17  ;;  %v9027_v17 = vld [vmem:[#allocation6_spill] sm:$0xff] }
 0x530   : > { %4209 = vmatprep.mubr.msk.f32.mxu1 %vm3386_vm4, %v3367_v50  ;;  %v3144_v19 = vsel %vm1375_vm3, %v6645_v4, %v9027_v17 }
 0x531   : > { %v3176_v6 = vsel %vm1441_vm6, %v3144_v19, %v9028_v28  ;;  %v9036_v19 = vld [vmem:[#allocation41_spill] sm:$0xff]  ;;  %v9037_v28 = vld [vmem:[#allocation15_spill] sm:$0xff] }
 0x532   : > { %v2780_v61 = vpop.permute.xlu1 %2779  ;;  %v3066_v59 = vpop.permute.xlu0 %3065 }
 0x533   : > { %v3368_v16 = vsel %vm3346_vm2, %v3335_v30, %v3066_v59  ;;  %v3270_v9 = vsel %vm3247_vm13, %v3237_v45, %v2780_v61  ;;  %v9029_v30 = vld [vmem:[#allocation20_spill] sm:$0xff] }
 0x534   : > { %4210 = vmatmul.mubr.msk.f32.gmra.mrb[18].mxu1 %vm3386_vm4, %v3368_v16  ;;  %v3208_v61 = vsel %vm1507_vm8, %v3176_v6, %v9029_v30 }
 0x536   : > { %v2782_v21 = vpop.permute.xlu1 %2781  ;;  %v2876_v5 = vpop.permute.xlu0 %2875 }
 0x537   : > { %v3303_v25 = vsel %vm3280_vm14, %v3270_v9, %v2876_v5  ;;  %v3271_v14 = vsel %vm3247_vm13, %v3238_v11, %v2782_v21  ;;  %v3145_v9 = vsel %vm1375_vm3, %v8951_v10, %v9030_v60 }
 0x538   : > { %v3177_v3 = vsel %vm1441_vm6, %v3145_v9, %v9031_v34 }
 0x53a   : > { %v2878_v8 = vpop.permute.xlu1 %2877  ;;  %v2972_v63 = vpop.permute.xlu0 %2971 }
 0x53b   : > { %v3336_v24 = vsel %vm3313_vm15, %v3303_v25, %v2972_v63  ;;  %v3304_v58 = vsel %vm3280_vm14, %v3271_v14, %v2878_v8  ;;  %v9032_v25 = vld [vmem:[#allocation35_spill] sm:$0xff]  ;;  %v9034_v14 = vld [vmem:[#allocation53_spill] sm:$0xff] }
 0x53c   : > { %v3209_v26 = vsel %vm1507_vm8, %v3177_v3, %v9032_v25 }
 0x53e   : > { %v2688_v37 = vpop.permute.xlu1 %2687  ;;  %v2974_v38 = vpop.permute.xlu0 %2973 }
 0x53f   : > { %v3337_v36 = vsel %vm3313_vm15, %v3304_v58, %v2974_v38  ;;  %v3239_v33 = vsel %vm1573_vm10, %v3207_v44, %v2688_v37 }
 0x542   : > { %v3068_v55 = vpop.permute.xlu1 %3067  ;;  %v2690_v49 = vpop.permute.xlu0 %2689 }
 0x543   : > { %v3369_v52 = vsel %vm3346_vm2, %v3336_v24, %v3068_v55  ;;  %v3240_v5 = vsel %vm1573_vm10, %v3208_v61, %v2690_v49  ;;  %v9033_v49 = vld [vmem:[#allocation122_spill] sm:$0xff] }
 0x544   : > { %4212 = vmatprep.mubr.msk.f32.mxu1 %vm3386_vm4, %v3369_v52  ;;  %v3146_v11 = vsel %vm1375_vm3, %v8954_v40, %v9033_v49 }
 0x545   : > { %v3178_v58 = vsel %vm1441_vm6, %v3146_v11, %v9034_v14  ;;  %v9044_v11 = vld [vmem:[#allocation47_spill] sm:$0xff] }
 0x546   : > { %v2784_v27 = vpop.permute.xlu1 %2783  ;;  %v3070_v7 = vpop.permute.xlu0 %3069 }
 0x547   : > { %v3370_v15 = vsel %vm3346_vm2, %v3337_v36, %v3070_v7  ;;  %v3272_v50 = vsel %vm3247_vm13, %v3239_v33, %v2784_v27  ;;  %v9035_v36 = vld [vmem:[#allocation21_spill] sm:$0xff] }
 0x548   : > { %v7895_v46 = vpop.f32.mrb[0].mxu1  ;;  %4213 = vmatmul.mubr.msk.f32.gmra.mrb[20].mxu1 %vm3386_vm4, %v3370_v15  ;;  %v3210_v27 = vsel %vm1507_vm8, %v3178_v58, %v9035_v36 }
 0x549   : > { %v7898_v2 = vpop.f32.mrb[1].mxu1 }
 0x54a   : > { %v2786_v23 = vpop.permute.xlu1 %2785  ;;  %v2880_v47 = vpop.permute.xlu0 %2879 }
 0x54b   : > { %v3305_v39 = vsel %vm3280_vm14, %v3272_v50, %v2880_v47  ;;  %v3273_v4 = vsel %vm3247_vm13, %v3240_v5, %v2786_v23  ;;  %v3147_v50 = vsel %vm1375_vm3, %v8964_v13, %v9036_v19 }
 0x54c   : > { %v3179_v6 = vsel %vm1441_vm6, %v3147_v50, %v9037_v28 }
 0x54e   : > { %v2882_v12 = vpop.permute.xlu1 %2881  ;;  %v2976_v31 = vpop.permute.xlu0 %2975 }
 0x54f   : > { %v3338_v59 = vsel %vm3313_vm15, %v3305_v39, %v2976_v31  ;;  %v3306_v41 = vsel %vm3280_vm14, %v3273_v4, %v2882_v12  ;;  %v9038_v39 = vld [vmem:[#allocation36_spill] sm:$0xff] }
 0x550   : > { %v3211_v30 = vsel %vm1507_vm8, %v3179_v6, %v9038_v39  ;;  %v9040_v4 = vld [vmem:[#allocation12_spill] sm:$0xff] }
 0x552   : > { %v2692_v56 = vpop.permute.xlu1 %2691  ;;  %v2978_v29 = vpop.permute.xlu0 %2977 }
 0x553   : > { %v3339_v57 = vsel %vm3313_vm15, %v3306_v41, %v2978_v29  ;;  %v3241_v55 = vsel %vm1573_vm10, %v3209_v26, %v2692_v56 }
 0x556   : > { %v3072_v16 = vpop.permute.xlu1 %3071  ;;  %v2694_v21 = vpop.permute.xlu0 %2693 }
 0x557   : > { %v3371_v8 = vsel %vm3346_vm2, %v3338_v59, %v3072_v16  ;;  %v3242_v47 = vsel %vm1573_vm10, %v3210_v27, %v2694_v21  ;;  %v9039_v21 = vld [vmem:[#allocation136_spill] sm:$0xff]  ;;  %v9046_v27 = vld [vmem:[#allocation25_spill] sm:$0xff] }
 0x558   : > { %v7921_v63 = vpop.f32.mrb[2].mxu1  ;;  %4215 = vmatprep.mubr.msk.f32.mxu1 %vm3386_vm4, %v3371_v8  ;;  %v3148_v5 = vsel %vm1375_vm3, %v8966_v18, %v9039_v21 }
 0x559   : > { %v7925_v53 = vpop.f32.mrb[3].mxu1  ;;  %v3180_v41 = vsel %vm1441_vm6, %v3148_v5, %v9040_v4  ;;  %v8031_v5 = vld [vmem:[%s8164_s4] ss:$0 sm:$0xff] }
 0x55a   : > { %v2788_v42 = vpop.permute.xlu1 %2787  ;;  %v3074_v48 = vpop.permute.xlu0 %3073 }
 0x55b   : > { %v3372_v43 = vsel %vm3346_vm2, %v3339_v57, %v3074_v48  ;;  %v3274_v52 = vsel %vm3247_vm13, %v3241_v55, %v2788_v42  ;;  %v9041_v57 = vld [vmem:[#allocation24_spill] sm:$0xff] }
 0x55c   : > { %4216 = vmatmul.mubr.msk.f32.gmra.mrb[22].mxu1 %vm3386_vm4, %v3372_v43  ;;  %v3212_v42 = vsel %vm1507_vm8, %v3180_v41, %v9041_v57  ;;  %v9043_v55 = vld [vmem:[#allocation108_spill] sm:$0xff] }
 0x55d   : > { %v3149_v49 = vsel %vm1375_vm3, %v8977_v0, %v9043_v55 }
 0x55e   : > { %v2790_v37 = vpop.permute.xlu1 %2789  ;;  %v2884_v38 = vpop.permute.xlu0 %2883 }
 0x55f   : > { %v3307_v10 = vsel %vm3280_vm14, %v3274_v52, %v2884_v38  ;;  %v3275_v40 = vsel %vm3247_vm13, %v3242_v47, %v2790_v37 }
 0x562   : > { %v2886_v45 = vpop.permute.xlu1 %2885  ;;  %v2980_v32 = vpop.permute.xlu0 %2979 }
 0x563   : > { %v3340_v7 = vsel %vm3313_vm15, %v3307_v10, %v2980_v32  ;;  %v3308_v35 = vsel %vm3280_vm14, %v3275_v40, %v2886_v45  ;;  %v9045_v10 = vld [vmem:[#allocation13_spill] sm:$0xff] }
 0x564   : > { %v3181_v36 = vsel %vm1441_vm6, %v3149_v49, %v9045_v10 }
 0x566   : > { %v2696_v54 = vpop.permute.xlu1 %2695  ;;  %v2982_v24 = vpop.permute.xlu0 %2981 }
 0x567   : > { %v3341_v22 = vsel %vm3313_vm15, %v3308_v35, %v2982_v24  ;;  %v3243_v16 = vsel %vm1573_vm10, %v3211_v30, %v2696_v54  ;;  %v9042_v54 = vld [vmem:[#allocation133_spill] sm:$0xff] }
 0x568   : > { %v3150_v24 = vsel %vm1375_vm3, %v8978_v51, %v9042_v54 }
 0x569   : > { %v3182_v52 = vsel %vm1441_vm6, %v3150_v24, %v9044_v11 }
 0x56a   : > { %v3076_v15 = vpop.permute.xlu1 %3075  ;;  %v2698_v23 = vpop.permute.xlu0 %2697 }
 0x56b   : > { %v3373_v12 = vsel %vm3346_vm2, %v3340_v7, %v3076_v15  ;;  %v3244_v38 = vsel %vm1573_vm10, %v3212_v42, %v2698_v23  ;;  %v3214_v7 = vsel %vm1507_vm8, %v3182_v52, %v9046_v27  ;;  %v9047_v15 = vld [vmem:[#allocation37_spill] sm:$0xff]  ;;  %v3575_v27 = vadd.f32 %v7921_v63, %v8031_v5 }
 0x56c   : > { %v7951_v31 = vpop.f32.mrb[4].mxu1  ;;  %4218 = vmatprep.mubr.msk.f32.mxu1 %vm3386_vm4, %v3373_v12  ;;  %v3213_v23 = vsel %vm1507_vm8, %v3181_v36, %v9047_v15 }
 0x56d   : > { %v7955_v1 = vpop.f32.mrb[5].mxu1 }
 0x56e   : > { %v2792_v62 = vpop.permute.xlu1 %2791  ;;  %v3078_v20 = vpop.permute.xlu0 %3077 }
 0x56f   : > { %v3374_v44 = vsel %vm3346_vm2, %v3341_v22, %v3078_v20  ;;  %v3276_v8 = vsel %vm3247_vm13, %v3243_v16, %v2792_v62 }
 0x570   : > { %4219 = vmatmul.mubr.msk.f32.gmra.mrb[24].mxu1 %vm3386_vm4, %v3374_v44 }
 0x572   : > { %v2794_v56 = vpop.permute.xlu1 %2793  ;;  %v2888_v29 = vpop.permute.xlu0 %2887 }
 0x573   : > { %v3309_v13 = vsel %vm3280_vm14, %v3276_v8, %v2888_v29  ;;  %v3277_v18 = vsel %vm3247_vm13, %v3244_v38, %v2794_v56 }
 0x576   : > { %v2890_v33 = vpop.permute.xlu1 %2889  ;;  %v2984_v17 = vpop.permute.xlu0 %2983 }
 0x577   : > { %v3342_v48 = vsel %vm3313_vm15, %v3309_v13, %v2984_v17  ;;  %v3310_v60 = vsel %vm3280_vm14, %v3277_v18, %v2890_v33 }
 0x57a   : > { %v2700_v61 = vpop.permute.xlu1 %2699  ;;  %v2986_v59 = vpop.permute.xlu0 %2985 }
 0x57b   : > { %v3343_v34 = vsel %vm3313_vm15, %v3310_v60, %v2986_v59  ;;  %v3245_v0 = vsel %vm1573_vm10, %v3213_v23, %v2700_v61 }
 0x57e   : > { %v3080_v43 = vpop.permute.xlu1 %3079  ;;  %v2702_v37 = vpop.permute.xlu0 %2701 }
 0x57f   : > { %v3375_v45 = vsel %vm3346_vm2, %v3342_v48, %v3080_v43  ;;  %v3246_v51 = vsel %vm1573_vm10, %v3214_v7, %v2702_v37  ;;  %v3560_v37 = vadd.f32 %v8031_v5, %v7898_v2  ;;  %v8051_v2 = vld [vmem:[%s8166_s6] ss:$0 sm:$0xff] }
 0x580   : > { %v7981_v32 = vpop.f32.mrb[6].mxu1  ;;  %4221 = vmatprep.mubr.msk.f32.mxu1 %vm3386_vm4, %v3375_v45 }
 0x581   : > { %v7985_v9 = vpop.f32.mrb[7].mxu1  ;;  %v3710_v54 = vmax.f32 %v3560_v37, 0.0 }
 0x582   : > { %v2796_v3 = vpop.permute.xlu1 %2795  ;;  %v3082_v25 = vpop.permute.xlu0 %3081 }
 0x583   : > { %v3376_v26 = vsel %vm3346_vm2, %v3343_v34, %v3082_v25  ;;  %v3278_v35 = vsel %vm3247_vm13, %v3245_v0, %v2796_v3  ;;  %v8042_v34 = vld [vmem:[%s8165_s5] ss:$0 sm:$0xff] }
 0x584   : > { %4222 = vmatmul.mubr.msk.f32.gmra.mrb[26].mxu1 %vm3386_vm4, %v3376_v26  ;;  %v3565_v26 = vadd.f32 %v7895_v46, %v8031_v5  ;;  %v3570_v46 = vadd.f32 %v8031_v5, %v7925_v53 }
 0x586   : > { %v2798_v14 = vpop.permute.xlu1 %2797  ;;  %v4295_v58 = vpop.permute.xlu0 %4294  ;;  %v3711_v52 = vmax.f32 %v3565_v26, 0.0  ;;  %v3712_v7 = vmax.f32 %v3570_v46, 0.0 }
 0x587   : > { %v4297_v47 = vunpack.i.h.bf16 %v4295_v58  ;;  %v4296_v12 = vunpack.i.l.bf16 %v4295_v58  ;;  %v3279_v40 = vsel %vm3247_vm13, %v3246_v51, %v2798_v14  ;;  %v3749_v14 = vmul.f32 %v8042_v34, %v3710_v54 }
 0x588   : > { %v3750_v36 = vmul.f32 %v8042_v34, %v3711_v52  ;;  %v3751_v53 = vmul.f32 %v8042_v34, %v3712_v7 }
 0x589   : > { %v3312_v33 = vsel %vm3280_vm14, %v3279_v40, %v4297_v47  ;;  %v3311_v17 = vsel %vm3280_vm14, %v3278_v35, %v4296_v12  ;;  %v3788_v15 = vadd.f32 %v8051_v2, %v3749_v14  ;;  %v3713_v47 = vmax.f32 %v3575_v27, 0.0 }
 0x58a   : > { %v4300_v22 = vpop.permute.xlu1 %4299  ;;  %v4305_v62 = vpop.permute.xlu0 %4304  ;;  %v3789_v51 = vadd.f32 %v8051_v2, %v3750_v36  ;;  %v3580_v12 = vadd.f32 %v8031_v5, %v7955_v1 }
 0x58b   : > { %v4302_v20 = vunpack.i.h.bf16 %v4300_v22  ;;  %v4301_v44 = vunpack.i.l.bf16 %v4300_v22  ;;  %v4307_v56 = vunpack.i.h.bf16 %v4305_v62  ;;  %v4306_v29 = vunpack.i.l.bf16 %v4305_v62 }
 0x58c   : > { %v3752_v62 = vmul.f32 %v8042_v34, %v3713_v47 }
 0x58d   : > { %v3344_v19 = vsel %vm3313_vm15, %v3311_v17, %v4301_v44  ;;  %v3345_v50 = vsel %vm3313_vm15, %v3312_v33, %v4302_v20  ;;  %v3585_v20 = vadd.f32 %v7951_v31, %v8031_v5  ;;  %v3714_v44 = vmax.f32 %v3580_v12, 0.0 }
 0x58e   : > { %v3377_v28 = vsel %vm3346_vm2, %v3344_v19, %v4306_v29  ;;  %v3378_v6 = vsel %vm3346_vm2, %v3345_v50, %v4307_v56  ;;  %v3790_v56 = vadd.f32 %v8051_v2, %v3751_v53  ;;  %v3590_v50 = vadd.f32 %v8031_v5, %v7985_v9 }
 0x58f   : > { %4224 = vmatprep.mubr.msk.f32.mxu1 %vm3386_vm4, %v3377_v28  ;;  %v3715_v17 = vmax.f32 %v3585_v20, 0.0  ;;  %v3753_v19 = vmul.f32 %v8042_v34, %v3714_v44  ;;  %v3791_v28 = vadd.f32 %v8051_v2, %v3752_v62  ;;  %v3595_v31 = vadd.f32 %v7981_v32, %v8031_v5 }
 0x590   : > { %4225 = vmatmul.mubr.msk.f32.gmra.mrb[28].mxu1 %vm3386_vm4, %v3378_v6 }
 0x594   : > { %v8016_v39 = vpop.f32.mrb[8].mxu1 }
 0x595   : > { %v8018_v30 = vpop.f32.mrb[9].mxu1 }
 0x596   : > { %v3600_v9 = vadd.f32 %v8031_v5, %v8018_v30 }
 0x598   : > { %v3718_v37 = vmax.f32 %v3600_v9, 0.0 }
 0x59a   : > { %v3757_v26 = vmul.f32 %v8042_v34, %v3718_v37 }
 0x59c   : > { %v3796_v46 = vadd.f32 %v8051_v2, %v3757_v26 }
 0x5a8   : > { %v8020_v61 = vpop.f32.mrb[10].mxu1 }
 0x5a9   : > { %v8022_v59 = vpop.f32.mrb[11].mxu1  ;;  %v3615_v52 = vadd.f32 %v8020_v61, %v8031_v5 }
 0x5aa   : > { %v3610_v54 = vadd.f32 %v8031_v5, %v8022_v59 }
 0x5ac   : > { %v3720_v14 = vmax.f32 %v3610_v54, 0.0 }
 0x5c0   : > { %v8024_v16 = vpop.f32.mrb[12].mxu1 }
 0x5c1   : > { %v8026_v21 = vpop.f32.mrb[13].mxu1  ;;  %v3625_v61 = vadd.f32 %v8024_v16, %v8031_v5 }
 0x5c2   : > { %v3620_v36 = vadd.f32 %v8031_v5, %v8026_v21 }
 0x5c3   : > { %v3723_v47 = vmax.f32 %v3625_v61, 0.0 }
 0x5c5   : > { %v3762_v16 = vmul.f32 %v8042_v34, %v3723_v47 }
 0x5e0   : > { %v4181_v8 = vpop.f32.mrb[32].mxu0  ;;  %v4205_v4 = vpop.f32.mrb[14].mxu1 }
 0x5e1   : > { %v3555_v41 = vadd.f32 %v4181_v8, %v8031_v5  ;;  %v3635_v13 = vadd.f32 %v4205_v4, %v8031_v5  ;;  %v3549_v57 = vpop.f32.mrb[33].mxu0  ;;  %v3629_v42 = vpop.f32.mrb[15].mxu1  ;;  %v3754_v8 = vmul.f32 %v8042_v34, %v3715_v17  ;;  %v3716_v4 = vmax.f32 %v3590_v50, 0.0 }
 0x5e2   : > { %v3550_v48 = vadd.f32 %v8031_v5, %v3549_v57  ;;  %v3630_v43 = vadd.f32 %v8031_v5, %v3629_v42 }
 0x5e3   : > { %v3709_v38 = vmax.f32 %v3555_v41, 0.0  ;;  %v3725_v45 = vmax.f32 %v3635_v13, 0.0  ;;  %v3792_v41 = vadd.f32 %v8051_v2, %v3753_v19  ;;  %v3717_v13 = vmax.f32 %v3595_v31, 0.0 }
 0x5e4   : > { %v3708_v18 = vmax.f32 %v3550_v48, 0.0  ;;  %v3724_v60 = vmax.f32 %v3630_v43, 0.0  ;;  %v3755_v57 = vmul.f32 %v8042_v34, %v3716_v4  ;;  %v3793_v42 = vadd.f32 %v8051_v2, %v3754_v8 }
 0x5e5   : > { %v3748_v24 = vmul.f32 %v8042_v34, %v3709_v38  ;;  %v3764_v55 = vmul.f32 %v8042_v34, %v3725_v45  ;;  %v3756_v32 = vmul.f32 %v8042_v34, %v3717_v13  ;;  %v3605_v43 = vadd.f32 %v8016_v39, %v8031_v5 }
 0x5e6   : > { %v3747_v3 = vmul.f32 %v8042_v34, %v3708_v18  ;;  %v3763_v25 = vmul.f32 %v8042_v34, %v3724_v60  ;;  %v3794_v18 = vadd.f32 %v8051_v2, %v3755_v57 }
 0x5e7   : > { %v3803_v58 = vadd.f32 %v8051_v2, %v3764_v55  ;;  %v3787_v10 = vadd.f32 %v8051_v2, %v3748_v24  ;;  %v3795_v24 = vadd.f32 %v8051_v2, %v3756_v32 }
 0x5e8   : > { %v3802_v49 = vadd.f32 %v8051_v2, %v3763_v25  ;;  %v3786_v11 = vadd.f32 %v8051_v2, %v3747_v3  ;;  %v3719_v25 = vmax.f32 %v3605_v43, 0.0 }
 0x5ea   : > { %3850 = vxpose.xlu0.b32.start [1/16] (narrow) %v3802_v49, 32  ;;  %3818 = vxpose.xlu1.b32.start [1/16] (narrow) %v3786_v11, 32  ;;  %v3758_v11 = vmul.f32 %v8042_v34, %v3719_v25 }
 0x5ec   : > { %v3797_v27 = vadd.f32 %v8051_v2, %v3758_v11 }
 0x5ee   : > { %3851 = vxpose.xlu0.b32.cont [2/16] (narrow) %v3803_v58, 32  ;;  %3819 = vxpose.xlu1.b32.cont [2/16] (narrow) %v3787_v10, 32  ;;  %v3721_v58 = vmax.f32 %v3615_v52, 0.0  ;;  %v3759_v10 = vmul.f32 %v8042_v34, %v3720_v14 }
 0x5f0   : > { %v3760_v7 = vmul.f32 %v8042_v34, %v3721_v58 }
 0x5f2   : > { %3820 = vxpose.xlu1.b32.cont [3/16] (narrow) %v3788_v15, 32  ;;  %v3722_v15 = vmax.f32 %v3620_v36, 0.0 }
 0x5f3   : > { %v4208_v23 = vpop.f32.mrb[16].mxu1 }
 0x5f4   : > { %v3645_v0 = vadd.f32 %v4208_v23, %v8031_v5  ;;  %v3639_v40 = vpop.f32.mrb[17].mxu1  ;;  %v3798_v23 = vadd.f32 %v8051_v2, %v3759_v10  ;;  %v3761_v53 = vmul.f32 %v8042_v34, %v3722_v15 }
 0x5f5   : > { %v3640_v35 = vadd.f32 %v8031_v5, %v3639_v40 }
 0x5f6   : > { %3821 = vxpose.xlu1.b32.cont [4/16] (narrow) %v3789_v51, 32  ;;  %v3727_v63 = vmax.f32 %v3645_v0, 0.0  ;;  %v3799_v0 = vadd.f32 %v8051_v2, %v3760_v7 }
 0x5f7   : > { %v3726_v22 = vmax.f32 %v3640_v35, 0.0 }
 0x5f8   : > { %v3766_v1 = vmul.f32 %v8042_v34, %v3727_v63 }
 0x5f9   : > { %v3765_v29 = vmul.f32 %v8042_v34, %v3726_v22  ;;  %v3800_v22 = vadd.f32 %v8051_v2, %v3761_v53 }
 0x5fa   : > { %3822 = vxpose.xlu1.b32.cont [5/16] (narrow) %v3790_v56, 32  ;;  %v3805_v6 = vadd.f32 %v8051_v2, %v3766_v1  ;;  %v3801_v56 = vadd.f32 %v8051_v2, %v3762_v16 }
 0x5fb   : > { %v3804_v33 = vadd.f32 %v8051_v2, %v3765_v29 }
 0x5fd   : > { %3852 = vxpose.xlu0.b32.cont [3/16] (narrow) %v3804_v33, 32 }
 0x5fe   : > { %3823 = vxpose.xlu1.b32.cont [6/16] (narrow) %v3791_v28, 32 }
 0x601   : > { %3853 = vxpose.xlu0.b32.cont [4/16] (narrow) %v3805_v6, 32 }
 0x602   : > { %3824 = vxpose.xlu1.b32.cont [7/16] (narrow) %v3792_v41, 32 }
 0x606   : > { %3825 = vxpose.xlu1.b32.cont [8/16] (narrow) %v3793_v42, 32 }
 0x607   : > { %v4211_v48 = vpop.f32.mrb[18].mxu1 }
 0x608   : > { %v3655_v38 = vadd.f32 %v4211_v48, %v8031_v5  ;;  %v3649_v45 = vpop.f32.mrb[19].mxu1 }
 0x609   : > { %v3650_v60 = vadd.f32 %v8031_v5, %v3649_v45 }
 0x60a   : > { %3826 = vxpose.xlu1.b32.cont [9/16] (narrow) %v3794_v18, 32  ;;  %v3729_v3 = vmax.f32 %v3655_v38, 0.0 }
 0x60b   : > { %v3728_v30 = vmax.f32 %v3650_v60, 0.0 }
 0x60c   : > { %v3768_v55 = vmul.f32 %v8042_v34, %v3729_v3 }
 0x60d   : > { %v3767_v39 = vmul.f32 %v8042_v34, %v3728_v30 }
 0x60e   : > { %3827 = vxpose.xlu1.b32.cont [10/16] (narrow) %v3795_v24, 32  ;;  %v3807_v59 = vadd.f32 %v8051_v2, %v3768_v55 }
 0x60f   : > { %v3806_v49 = vadd.f32 %v8051_v2, %v3767_v39 }
 0x611   : > { %3854 = vxpose.xlu0.b32.cont [5/16] (narrow) %v3806_v49, 32 }
 0x612   : > { %3828 = vxpose.xlu1.b32.cont [11/16] (narrow) %v3796_v46, 32 }
 0x615   : > { %3855 = vxpose.xlu0.b32.cont [6/16] (narrow) %v3807_v59, 32 }
 0x616   : > { %3829 = vxpose.xlu1.b32.cont [12/16] (narrow) %v3797_v27, 32 }
 0x61a   : > { %3830 = vxpose.xlu1.b32.cont [13/16] (narrow) %v3798_v23, 32 }
 0x61b   : > { %v4214_v51 = vpop.f32.mrb[20].mxu1 }
 0x61c   : > { %v3665_v12 = vadd.f32 %v4214_v51, %v8031_v5  ;;  %v3659_v21 = vpop.f32.mrb[21].mxu1 }
 0x61d   : > { %v3660_v40 = vadd.f32 %v8031_v5, %v3659_v21 }
 0x61e   : > { %3831 = vxpose.xlu1.b32.cont [14/16] (narrow) %v3799_v0, 32  ;;  %v3731_v35 = vmax.f32 %v3665_v12, 0.0 }
 0x61f   : > { %v3730_v63 = vmax.f32 %v3660_v40, 0.0 }
 0x620   : > { %v3770_v20 = vmul.f32 %v8042_v34, %v3731_v35 }
 0x621   : > { %v3769_v62 = vmul.f32 %v8042_v34, %v3730_v63 }
 0x622   : > { %3832 = vxpose.xlu1.b32.cont [15/16] (narrow) %v3800_v22, 32  ;;  %v3809_v29 = vadd.f32 %v8051_v2, %v3770_v20 }
 0x623   : > { %v3808_v44 = vadd.f32 %v8051_v2, %v3769_v62 }
 0x625   : > { %3856 = vxpose.xlu0.b32.cont [7/16] (narrow) %v3808_v44, 32 }
 0x626   : > { %3833 = vxpose.xlu1.b32.end [16/16] (narrow) %v3801_v56, 32 }
 0x629   : > { %3857 = vxpose.xlu0.b32.cont [8/16] (narrow) %v3809_v29, 32 }
 0x62f   : > { %v4217_v1 = vpop.f32.mrb[22].mxu1 }
 0x630   : > { %v3675_v33 = vadd.f32 %v4217_v1, %v8031_v5  ;;  %v3669_v17 = vpop.f32.mrb[23].mxu1 }
 0x631   : > { %v3670_v19 = vadd.f32 %v8031_v5, %v3669_v17 }
 0x632   : > { %v3733_v50 = vmax.f32 %v3675_v33, 0.0 }
 0x633   : > { %v3732_v28 = vmax.f32 %v3670_v19, 0.0 }
 0x634   : > { %v3772_v6 = vmul.f32 %v8042_v34, %v3733_v50 }
 0x635   : > { %v3771_v31 = vmul.f32 %v8042_v34, %v3732_v28 }
 0x636   : > { %v3811_v4 = vadd.f32 %v8051_v2, %v3772_v6 }
 0x637   : > { %v3810_v8 = vadd.f32 %v8051_v2, %v3771_v31 }
 0x639   : > { %3858 = vxpose.xlu0.b32.cont [9/16] (narrow) %v3810_v8, 32 }
 0x63d   : > { %3859 = vxpose.xlu0.b32.cont [10/16] (narrow) %v3811_v4, 32 }
 0x643   : > { %v4220_v41 = vpop.f32.mrb[24].mxu1 }
 0x644   : > { %v3685_v13 = vadd.f32 %v4220_v41, %v8031_v5  ;;  %v3679_v57 = vpop.f32.mrb[25].mxu1 }
 0x645   : > { %v3680_v9 = vadd.f32 %v8031_v5, %v3679_v57 }
 0x646   : > { %v3735_v42 = vmax.f32 %v3685_v13, 0.0 }
 0x647   : > { %v3734_v32 = vmax.f32 %v3680_v9, 0.0 }
 0x648   : > { %v3774_v43 = vmul.f32 %v8042_v34, %v3735_v42 }
 0x649   : > { %v3773_v48 = vmul.f32 %v8042_v34, %v3734_v32 }
 0x64a   : > { %v3813_v38 = vadd.f32 %v8051_v2, %v3774_v43 }
 0x64b   : > { %v3812_v37 = vadd.f32 %v8051_v2, %v3773_v48 }
 0x64d   : > { %3860 = vxpose.xlu0.b32.cont [11/16] (narrow) %v3812_v37, 32 }
 0x651   : > { %3861 = vxpose.xlu0.b32.cont [12/16] (narrow) %v3813_v38, 32 }
 0x657   : > { %v4223_v45 = vpop.f32.mrb[26].mxu1 }
 0x658   : > { %v3695_v18 = vadd.f32 %v4223_v45, %v8031_v5  ;;  %v3689_v60 = vpop.f32.mrb[27].mxu1 }
 0x659   : > { %v3690_v3 = vadd.f32 %v8031_v5, %v3689_v60 }
 0x65a   : > { %v3737_v30 = vmax.f32 %v3695_v18, 0.0 }
 0x65b   : > { %v3736_v25 = vmax.f32 %v3690_v3, 0.0 }
 0x65c   : > { %v3776_v54 = vmul.f32 %v8042_v34, %v3737_v30 }
 0x65d   : > { %v3775_v26 = vmul.f32 %v8042_v34, %v3736_v25 }
 0x65e   : > { %v3815_v55 = vadd.f32 %v8051_v2, %v3776_v54 }
 0x65f   : > { %v3814_v24 = vadd.f32 %v8051_v2, %v3775_v26 }
 0x661   : > { %3862 = vxpose.xlu0.b32.cont [13/16] (narrow) %v3814_v24, 32 }
 0x663   : > { %v4226_v39 = vpop.f32.mrb[28].mxu1 }
 0x664   : > { %v3705_v49 = vadd.f32 %v4226_v39, %v8031_v5  ;;  %v3699_v11 = vpop.f32.mrb[29].mxu1 }
 0x665   : > { %v3700_v52 = vadd.f32 %v8031_v5, %v3699_v11  ;;  %3863 = vxpose.xlu0.b32.cont [14/16] (narrow) %v3815_v55, 32 }
 0x666   : > { %v3739_v14 = vmax.f32 %v3705_v49, 0.0 }
 0x667   : > { %v3738_v46 = vmax.f32 %v3700_v52, 0.0 }
 0x668   : > { %v3778_v10 = vmul.f32 %v8042_v34, %v3739_v14 }
 0x669   : > { %v3777_v59 = vmul.f32 %v8042_v34, %v3738_v46 }
 0x66a   : > { %v3834_v58 = vpop.trf.xlu1  ;;  %v3817_v5 = vadd.f32 %v8051_v2, %v3778_v10 }
 0x66b   : > { %v3816_v36 = vadd.f32 %v8051_v2, %v3777_v59  ;;  %3882 = vst [vmem:[%s278_s16] sm:$0xff] %v3834_v58 }
 0x66d   : > { %3864 = vxpose.xlu0.b32.cont [15/16] (narrow) %v3816_v36, 32 }
 0x66e   : > { %v3835_v27 = vpop.trf.xlu1 }
 0x66f   : > { %3884 = vst [vmem:[%s278_s16 + $0x10] sm:$0xff] %v3835_v27 }
 0x671   : > { %3865 = vxpose.xlu0.b32.end [16/16] (narrow) %v3817_v5, 32 }
 0x672   : > { %v3836_v7 = vpop.trf.xlu1 }
 0x673   : > { %3886 = vst [vmem:[%s278_s16 + $0x20] sm:$0xff] %v3836_v7 }
 0x676   : > { %v3837_v61 = vpop.trf.xlu1 }
 0x677   : > { %3888 = vst [vmem:[%s278_s16 + $0x30] sm:$0xff] %v3837_v61 }
 0x6b5   : > { %v3866_v15 = vpop.trf.xlu0 }
 0x6b6   : > { %3883 = vst [vmem:[%s278_s16 + $0x8] sm:$0xff] %v3866_v15 }
 0x6b9   : > { %v3867_v23 = vpop.trf.xlu0 }
 0x6ba   : > { %3885 = vst [vmem:[%s278_s16 + $0x18] sm:$0xff] %v3867_v23 }
 0x6bd   : > { %v3868_v51 = vpop.trf.xlu0 }
 0x6be   : > { %3887 = vst [vmem:[%s278_s16 + $0x28] sm:$0xff] %v3868_v51 }
 0x6c1   : > { %v3869_v34 = vpop.trf.xlu0 }
 0x6c2   : > { %3889 = vst [vmem:[%s278_s16 + $0x38] sm:$0xff] %v3869_v34 }
 0x6c3 PF: > { %s17_s24 = sadd.s32 1, %s4340_s24  }
 0x6c4   : > { %p14_p4 = scmp.ge.s32.totalorder %s17_s24, 4  }
 0x6c6   :  { %16 = sbr.rel (!%p14_p4) target bundleno = 1 (0x1), region = 78 }

</bundles_post_ra>
